<compile_context>
chip_gen: v7x
topology: tpu7x:2x2x1
jax: 0.10.0
libtpu: 0.0.40
codegen_flags: <defaults>
</compile_context>

<pallas_src>
import math

import jax
import jax.numpy as jnp
from jax.experimental import pallas as pl
from jax.experimental.pallas import tpu as pltpu

EPS = 1e-5
HID = 512        # hidden width of layers 0..9
MID32 = 32       # width of the 512->32 layer
TAIL_PAD = 128   # lane-padded width of the two tail layers
OUT_FEATURES = 7


# ----------------------------------------------------------------------------
# Pallas kernel: the whole MLP in a single invocation, everything VMEM-resident
# ----------------------------------------------------------------------------
def _fused_mlp_kernel(x_ref, w0_ref, wmid_ref, w10_ref, w11_ref,
                      scale_ref, shift_ref, scale10_ref, shift10_ref,
                      bias11_ref, o_ref):
    """Fused 12-layer MLP.

    x_ref:       (Np, 128)        bf16 flattened+padded input
    w0_ref:      (128, 512)       bf16 layer-0 weight (compact, no row padding)
    wmid_ref:    (9, 512, 512)    bf16 hidden-layer weights
    w10_ref:     (512, 128)       bf16 512->32 weight (lane-padded to 128)
    w11_ref:     (128, 128)       bf16 32->7 weight (padded)
    scale_ref:   (10, 1, 512)     f32 folded BN scale, layers 0..9
    shift_ref:   (10, 1, 512)     f32 folded BN shift (bias absorbed)
    scale10_ref: (1, 128)         f32 folded BN scale for the 512->32 layer
    shift10_ref: (1, 128)         f32 folded BN shift for the 512->32 layer
    bias11_ref:  (1, 128)         f32 bias of the final 32->7 layer
    o_ref:       (Np, 128)        f32 output (tanh), real cols 0..6
    """
    # Layer 0: 128 -> 512, BN + ReLU (Dropout is identity in eval mode).
    y = jnp.dot(x_ref[...], w0_ref[...], preferred_element_type=jnp.float32)
    y = y * scale_ref[0] + shift_ref[0]
    h = jnp.maximum(y, 0.0).astype(jnp.bfloat16)

    # Layers 1..9: 512 -> 512, BN + ReLU.  Statically unrolled; weights are
    # indexed on the leading (untiled) axis of the resident VMEM block.
    for i in range(wmid_ref.shape[0]):
        y = jnp.dot(h, wmid_ref[i], preferred_element_type=jnp.float32)
        y = y * scale_ref[i + 1] + shift_ref[i + 1]
        h = jnp.maximum(y, 0.0).astype(jnp.bfloat16)

    # Layer 10: 512 -> 32 (lane-padded to 128), BN + ReLU.  Padded columns have
    # scale = shift = 0 -> ReLU(0) = 0.
    y = jnp.dot(h, w10_ref[...], preferred_element_type=jnp.float32)
    y = y * scale10_ref[...] + shift10_ref[...]
    h = jnp.maximum(y, 0.0).astype(jnp.bfloat16)

    # Layer 11: 32 -> 7 (padded to 128), bias + Tanh.  Padded weight rows are
    # zero so the zero-padded activations contribute nothing.
    y = jnp.dot(h, w11_ref[...], preferred_element_type=jnp.float32)
    o_ref[...] = jnp.tanh(y + bias11_ref[...])


# ----------------------------------------------------------------------------
# Wrapper
# ----------------------------------------------------------------------------
def action_mlp3d_forward(x, params):
    """x: (N, ...) flattening to (N, 128). Returns (N, 7)."""
    (w0, wmid, w10, w11, scale_h, shift_h, scale10, shift10, bias11) = params

    n = x.shape[0]
    x_flat = x.reshape(n, -1)
    din = x_flat.shape[1]
    din_pad = w0.shape[0]
    assert din <= din_pad, (din, din_pad)

    # Pad the batch to a multiple of 16 (bf16 sublane packing).
    n_pad = max(16, ((n + 15) // 16) * 16)
    x_pad = jnp.zeros((n_pad, din_pad), jnp.bfloat16)
    x_pad = x_pad.at[:n, :din].set(x_flat.astype(jnp.bfloat16))

    vmem = pl.BlockSpec(memory_space=pltpu.MemorySpace.VMEM)
    out = pl.pallas_call(
        _fused_mlp_kernel,
        out_shape=jax.ShapeDtypeStruct((n_pad, TAIL_PAD), jnp.float32),
        in_specs=[vmem] * 10,   # everything fully VMEM-resident, single step
        out_specs=vmem,
    )(x_pad, w0, wmid, w10, w11, scale_h, shift_h, scale10, shift10, bias11)

    return out[:n, :OUT_FEATURES]


# ----------------------------------------------------------------------------
# Parameter construction (PyTorch-default-style init, eval-mode BN folded)
# ----------------------------------------------------------------------------
def init_params(key, latent_dim=4, latent_length=2, action_length=1, num_layers=9):
    # TODO(synk): folds BatchNorm with init-time running stats (mean=0, var=1,
    # gamma=1, beta=0); a trained checkpoint must fold its real running stats
    # into scale/shift (shift += -mean * gamma / sqrt(var + eps) + beta).
    bn_scale = 1.0 / math.sqrt(1.0 + EPS)
    in_features = latent_length * latent_dim ** 3            # 2 * 64 = 128
    din_pad = ((max(in_features, 1) + 127) // 128) * 128      # lane-align input
    out_features = 7 * action_length

    def linear(k, din, dout):
        kw, kb = jax.random.split(k)
        bound = 1.0 / math.sqrt(din)
        w = jax.random.uniform(kw, (din, dout), jnp.float32, -bound, bound)
        b = jax.random.uniform(kb, (dout,), jnp.float32, -bound, bound)
        return w, b

    keys = jax.random.split(key, num_layers + 3)

    # Layer 0: in_features -> 512 (+ BN fold).
    w, b = linear(keys[0], in_features, HID)
    w0 = jnp.zeros((din_pad, HID), jnp.float32).at[:in_features].set(w)
    scale_h = jnp.zeros((num_layers + 1, 1, HID), jnp.float32)
    shift_h = jnp.zeros((num_layers + 1, 1, HID), jnp.float32)
    scale_h = scale_h.at[0, 0].set(bn_scale)
    shift_h = shift_h.at[0, 0].set(b * bn_scale)

    # Layers 1..9: 512 -> 512 (+ BN fold).
    wmid = jnp.zeros((num_layers, HID, HID), jnp.float32)
    for i in range(num_layers):
        w, b = linear(keys[1 + i], HID, HID)
        wmid = wmid.at[i].set(w)
        scale_h = scale_h.at[1 + i, 0].set(bn_scale)
        shift_h = shift_h.at[1 + i, 0].set(b * bn_scale)

    # Layer 10: 512 -> 32 (+ BN fold), lane-padded to 128 with zero scale/shift.
    w, b = linear(keys[num_layers + 1], HID, MID32)
    w10 = jnp.zeros((HID, TAIL_PAD), jnp.float32).at[:, :MID32].set(w)
    scale10 = jnp.zeros((1, TAIL_PAD), jnp.float32).at[0, :MID32].set(bn_scale)
    shift10 = jnp.zeros((1, TAIL_PAD), jnp.float32).at[0, :MID32].set(b * bn_scale)

    # Layer 11: 32 -> 7, no BN, Tanh.  Padded to (128, 128) with zero rows/cols.
    w, b = linear(keys[num_layers + 2], MID32, out_features)
    w11 = jnp.zeros((TAIL_PAD, TAIL_PAD), jnp.float32).at[:MID32, :out_features].set(w)
    bias11 = jnp.zeros((1, TAIL_PAD), jnp.float32).at[0, :out_features].set(b)

    # bf16 weights for the MXU; scale/shift/bias stay f32 for the epilogue.
    return (w0.astype(jnp.bfloat16), wmid.astype(jnp.bfloat16),
            w10.astype(jnp.bfloat16), w11.astype(jnp.bfloat16),
            scale_h, shift_h, scale10, shift10, bias11)


# ----------------------------------------------------------------------------
# Pure-JAX reference using only the REAL (unpadded) weights, same arithmetic
# ----------------------------------------------------------------------------
def reference_forward(x, params):
    (w0, wmid, w10, w11, scale_h, shift_h, scale10, shift10, bias11) = params
    n = x.shape[0]
    h = x.reshape(n, -1).astype(jnp.float32)
    din = h.shape[1]

    y = jnp.dot(h.astype(jnp.bfloat16), w0[:din], preferred_element_type=jnp.float32)
    y = y * scale_h[0, 0] + shift_h[0, 0]
    h = jnp.maximum(y, 0.0)
    for i in range(wmid.shape[0]):
        y = jnp.dot(h.astype(jnp.bfloat16), wmid[i], preferred_element_type=jnp.float32)
        y = y * scale_h[i + 1, 0] + shift_h[i + 1, 0]
        h = jnp.maximum(y, 0.0)
    y = jnp.dot(h.astype(jnp.bfloat16), w10[:, :MID32], preferred_element_type=jnp.float32)
    y = y * scale10[0, :MID32] + shift10[0, :MID32]
    h = jnp.maximum(y, 0.0)
    y = jnp.dot(h.astype(jnp.bfloat16), w11[:MID32, :OUT_FEATURES],
                preferred_element_type=jnp.float32)
    return jnp.tanh(y + bias11[0, :OUT_FEATURES])


if __name__ == "__main__":
    root = jax.random.PRNGKey(0)
    key_params, key_x = jax.random.split(root)
    params = init_params(key_params)

    # latent_dim=4, latent_length=2 -> latent (N, 2, 4, 4, 4), flattens to 128.
    x = jax.random.normal(key_x, (2, 2, 4, 4, 4), dtype=jnp.float32)

    # TODO(synk): Dropout(p=0.5) is identity in eval mode; training-mode
    # stochastic dropout and batch-statistic BatchNorm are not modeled.
    fwd = jax.jit(lambda inp: action_mlp3d_forward(inp, params))
    out = jax.block_until_ready(fwd(x))

    ref = jax.block_until_ready(reference_forward(x, params))

    assert out.shape == (2, OUT_FEATURES), out.shape
    assert bool(jnp.all(jnp.isfinite(out)))
    assert bool(jnp.all(jnp.abs(out) <= 1.0))          # Tanh output range
    assert bool(jnp.allclose(out, ref, atol=2e-2)), (out, ref)
    print("KERNEL_OK")
</pallas_src>

<mosaic_0001>
module attributes {stable_mosaic.version = 11 : i64} {
  func.func @_fused_mlp_kernel(%arg0: memref<16x128xbf16, #tpu.memory_space<vmem>>, %arg1: memref<128x512xbf16, #tpu.memory_space<vmem>>, %arg2: memref<9x512x512xbf16, #tpu.memory_space<vmem>>, %arg3: memref<512x128xbf16, #tpu.memory_space<vmem>>, %arg4: memref<128x128xbf16, #tpu.memory_space<vmem>>, %arg5: memref<10x1x512xf32, #tpu.memory_space<vmem>>, %arg6: memref<10x1x512xf32, #tpu.memory_space<vmem>>, %arg7: memref<1x128xf32, #tpu.memory_space<vmem>>, %arg8: memref<1x128xf32, #tpu.memory_space<vmem>>, %arg9: memref<1x128xf32, #tpu.memory_space<vmem>>, %arg10: memref<16x128xf32, #tpu.memory_space<vmem>>) attributes {dimension_semantics = [], scalar_prefetch = 0 : i64, scratch_operands = 0 : i64, tpu.core_type = #tpu.core_type<tc>} {
    %c0 = arith.constant 0 : index
    %c0_0 = arith.constant 0 : index
    %0 = vector.load %arg0[%c0, %c0_0] : memref<16x128xbf16, #tpu.memory_space<vmem>>, vector<16x128xbf16>
    %c0_1 = arith.constant 0 : index
    %c0_2 = arith.constant 0 : index
    %1 = vector.load %arg1[%c0_1, %c0_2] : memref<128x512xbf16, #tpu.memory_space<vmem>>, vector<128x512xbf16>
    %cst = arith.constant dense<0.000000e+00> : vector<16x512xf32>
    %2 = tpu.matmul %0, %1, %cst {dimension_numbers = #tpu.dot_dimension_numbers<[1], [0], [0], [1], [0, 0, 1, 1], [], []>} : vector<16x128xbf16>, vector<128x512xbf16>, vector<16x512xf32> -> vector<16x512xf32>
    %c0_3 = arith.constant 0 : index
    %c0_4 = arith.constant 0 : index
    %c0_5 = arith.constant 0 : index
    %3 = vector.load %arg5[%c0_3, %c0_4, %c0_5] : memref<10x1x512xf32, #tpu.memory_space<vmem>>, vector<1x1x512xf32>
    %4 = vector.shape_cast %3 : vector<1x1x512xf32> to vector<1x512xf32>
    %5 = vector.broadcast %4 : vector<1x512xf32> to vector<16x512xf32>
    %6 = arith.mulf %2, %5 : vector<16x512xf32>
    %c0_6 = arith.constant 0 : index
    %c0_7 = arith.constant 0 : index
    %c0_8 = arith.constant 0 : index
    %7 = vector.load %arg6[%c0_6, %c0_7, %c0_8] : memref<10x1x512xf32, #tpu.memory_space<vmem>>, vector<1x1x512xf32>
    %8 = vector.shape_cast %7 : vector<1x1x512xf32> to vector<1x512xf32>
    %9 = vector.broadcast %8 : vector<1x512xf32> to vector<16x512xf32>
    %10 = arith.addf %6, %9 : vector<16x512xf32>
    %cst_9 = arith.constant 0.000000e+00 : f32
    %11 = vector.broadcast %cst_9 : f32 to vector<16x512xf32>
    %12 = arith.maximumf %10, %11 : vector<16x512xf32>
    %13 = arith.truncf %12 : vector<16x512xf32> to vector<16x512xbf16>
    %c0_10 = arith.constant 0 : index
    %c0_11 = arith.constant 0 : index
    %c0_12 = arith.constant 0 : index
    %14 = vector.load %arg2[%c0_10, %c0_11, %c0_12] : memref<9x512x512xbf16, #tpu.memory_space<vmem>>, vector<1x512x512xbf16>
    %15 = vector.shape_cast %14 : vector<1x512x512xbf16> to vector<512x512xbf16>
    %cst_13 = arith.constant dense<0.000000e+00> : vector<16x512xf32>
    %16 = tpu.matmul %13, %15, %cst_13 {dimension_numbers = #tpu.dot_dimension_numbers<[1], [0], [0], [1], [0, 0, 1, 1], [], []>} : vector<16x512xbf16>, vector<512x512xbf16>, vector<16x512xf32> -> vector<16x512xf32>
    %c1 = arith.constant 1 : index
    %c0_14 = arith.constant 0 : index
    %c0_15 = arith.constant 0 : index
    %17 = vector.load %arg5[%c1, %c0_14, %c0_15] : memref<10x1x512xf32, #tpu.memory_space<vmem>>, vector<1x1x512xf32>
    %18 = vector.shape_cast %17 : vector<1x1x512xf32> to vector<1x512xf32>
    %19 = vector.broadcast %18 : vector<1x512xf32> to vector<16x512xf32>
    %20 = arith.mulf %16, %19 : vector<16x512xf32>
    %c1_16 = arith.constant 1 : index
    %c0_17 = arith.constant 0 : index
    %c0_18 = arith.constant 0 : index
    %21 = vector.load %arg6[%c1_16, %c0_17, %c0_18] : memref<10x1x512xf32, #tpu.memory_space<vmem>>, vector<1x1x512xf32>
    %22 = vector.shape_cast %21 : vector<1x1x512xf32> to vector<1x512xf32>
    %23 = vector.broadcast %22 : vector<1x512xf32> to vector<16x512xf32>
    %24 = arith.addf %20, %23 : vector<16x512xf32>
    %cst_19 = arith.constant 0.000000e+00 : f32
    %25 = vector.broadcast %cst_19 : f32 to vector<16x512xf32>
    %26 = arith.maximumf %24, %25 : vector<16x512xf32>
    %27 = arith.truncf %26 : vector<16x512xf32> to vector<16x512xbf16>
    %c1_20 = arith.constant 1 : index
    %c0_21 = arith.constant 0 : index
    %c0_22 = arith.constant 0 : index
    %28 = vector.load %arg2[%c1_20, %c0_21, %c0_22] : memref<9x512x512xbf16, #tpu.memory_space<vmem>>, vector<1x512x512xbf16>
    %29 = vector.shape_cast %28 : vector<1x512x512xbf16> to vector<512x512xbf16>
    %cst_23 = arith.constant dense<0.000000e+00> : vector<16x512xf32>
    %30 = tpu.matmul %27, %29, %cst_23 {dimension_numbers = #tpu.dot_dimension_numbers<[1], [0], [0], [1], [0, 0, 1, 1], [], []>} : vector<16x512xbf16>, vector<512x512xbf16>, vector<16x512xf32> -> vector<16x512xf32>
    %c2 = arith.constant 2 : index
    %c0_24 = arith.constant 0 : index
    %c0_25 = arith.constant 0 : index
    %31 = vector.load %arg5[%c2, %c0_24, %c0_25] : memref<10x1x512xf32, #tpu.memory_space<vmem>>, vector<1x1x512xf32>
    %32 = vector.shape_cast %31 : vector<1x1x512xf32> to vector<1x512xf32>
    %33 = vector.broadcast %32 : vector<1x512xf32> to vector<16x512xf32>
    %34 = arith.mulf %30, %33 : vector<16x512xf32>
    %c2_26 = arith.constant 2 : index
    %c0_27 = arith.constant 0 : index
    %c0_28 = arith.constant 0 : index
    %35 = vector.load %arg6[%c2_26, %c0_27, %c0_28] : memref<10x1x512xf32, #tpu.memory_space<vmem>>, vector<1x1x512xf32>
    %36 = vector.shape_cast %35 : vector<1x1x512xf32> to vector<1x512xf32>
    %37 = vector.broadcast %36 : vector<1x512xf32> to vector<16x512xf32>
    %38 = arith.addf %34, %37 : vector<16x512xf32>
    %cst_29 = arith.constant 0.000000e+00 : f32
    %39 = vector.broadcast %cst_29 : f32 to vector<16x512xf32>
    %40 = arith.maximumf %38, %39 : vector<16x512xf32>
    %41 = arith.truncf %40 : vector<16x512xf32> to vector<16x512xbf16>
    %c2_30 = arith.constant 2 : index
    %c0_31 = arith.constant 0 : index
    %c0_32 = arith.constant 0 : index
    %42 = vector.load %arg2[%c2_30, %c0_31, %c0_32] : memref<9x512x512xbf16, #tpu.memory_space<vmem>>, vector<1x512x512xbf16>
    %43 = vector.shape_cast %42 : vector<1x512x512xbf16> to vector<512x512xbf16>
    %cst_33 = arith.constant dense<0.000000e+00> : vector<16x512xf32>
    %44 = tpu.matmul %41, %43, %cst_33 {dimension_numbers = #tpu.dot_dimension_numbers<[1], [0], [0], [1], [0, 0, 1, 1], [], []>} : vector<16x512xbf16>, vector<512x512xbf16>, vector<16x512xf32> -> vector<16x512xf32>
    %c3 = arith.constant 3 : index
    %c0_34 = arith.constant 0 : index
    %c0_35 = arith.constant 0 : index
    %45 = vector.load %arg5[%c3, %c0_34, %c0_35] : memref<10x1x512xf32, #tpu.memory_space<vmem>>, vector<1x1x512xf32>
    %46 = vector.shape_cast %45 : vector<1x1x512xf32> to vector<1x512xf32>
    %47 = vector.broadcast %46 : vector<1x512xf32> to vector<16x512xf32>
    %48 = arith.mulf %44, %47 : vector<16x512xf32>
    %c3_36 = arith.constant 3 : index
    %c0_37 = arith.constant 0 : index
    %c0_38 = arith.constant 0 : index
    %49 = vector.load %arg6[%c3_36, %c0_37, %c0_38] : memref<10x1x512xf32, #tpu.memory_space<vmem>>, vector<1x1x512xf32>
    %50 = vector.shape_cast %49 : vector<1x1x512xf32> to vector<1x512xf32>
    %51 = vector.broadcast %50 : vector<1x512xf32> to vector<16x512xf32>
    %52 = arith.addf %48, %51 : vector<16x512xf32>
    %cst_39 = arith.constant 0.000000e+00 : f32
    %53 = vector.broadcast %cst_39 : f32 to vector<16x512xf32>
    %54 = arith.maximumf %52, %53 : vector<16x512xf32>
    %55 = arith.truncf %54 : vector<16x512xf32> to vector<16x512xbf16>
    %c3_40 = arith.constant 3 : index
    %c0_41 = arith.constant 0 : index
    %c0_42 = arith.constant 0 : index
    %56 = vector.load %arg2[%c3_40, %c0_41, %c0_42] : memref<9x512x512xbf16, #tpu.memory_space<vmem>>, vector<1x512x512xbf16>
    %57 = vector.shape_cast %56 : vector<1x512x512xbf16> to vector<512x512xbf16>
    %cst_43 = arith.constant dense<0.000000e+00> : vector<16x512xf32>
    %58 = tpu.matmul %55, %57, %cst_43 {dimension_numbers = #tpu.dot_dimension_numbers<[1], [0], [0], [1], [0, 0, 1, 1], [], []>} : vector<16x512xbf16>, vector<512x512xbf16>, vector<16x512xf32> -> vector<16x512xf32>
    %c4 = arith.constant 4 : index
    %c0_44 = arith.constant 0 : index
    %c0_45 = arith.constant 0 : index
    %59 = vector.load %arg5[%c4, %c0_44, %c0_45] : memref<10x1x512xf32, #tpu.memory_space<vmem>>, vector<1x1x512xf32>
    %60 = vector.shape_cast %59 : vector<1x1x512xf32> to vector<1x512xf32>
    %61 = vector.broadcast %60 : vector<1x512xf32> to vector<16x512xf32>
    %62 = arith.mulf %58, %61 : vector<16x512xf32>
    %c4_46 = arith.constant 4 : index
    %c0_47 = arith.constant 0 : index
    %c0_48 = arith.constant 0 : index
    %63 = vector.load %arg6[%c4_46, %c0_47, %c0_48] : memref<10x1x512xf32, #tpu.memory_space<vmem>>, vector<1x1x512xf32>
    %64 = vector.shape_cast %63 : vector<1x1x512xf32> to vector<1x512xf32>
    %65 = vector.broadcast %64 : vector<1x512xf32> to vector<16x512xf32>
    %66 = arith.addf %62, %65 : vector<16x512xf32>
    %cst_49 = arith.constant 0.000000e+00 : f32
    %67 = vector.broadcast %cst_49 : f32 to vector<16x512xf32>
    %68 = arith.maximumf %66, %67 : vector<16x512xf32>
    %69 = arith.truncf %68 : vector<16x512xf32> to vector<16x512xbf16>
    %c4_50 = arith.constant 4 : index
    %c0_51 = arith.constant 0 : index
    %c0_52 = arith.constant 0 : index
    %70 = vector.load %arg2[%c4_50, %c0_51, %c0_52] : memref<9x512x512xbf16, #tpu.memory_space<vmem>>, vector<1x512x512xbf16>
    %71 = vector.shape_cast %70 : vector<1x512x512xbf16> to vector<512x512xbf16>
    %cst_53 = arith.constant dense<0.000000e+00> : vector<16x512xf32>
    %72 = tpu.matmul %69, %71, %cst_53 {dimension_numbers = #tpu.dot_dimension_numbers<[1], [0], [0], [1], [0, 0, 1, 1], [], []>} : vector<16x512xbf16>, vector<512x512xbf16>, vector<16x512xf32> -> vector<16x512xf32>
    %c5 = arith.constant 5 : index
    %c0_54 = arith.constant 0 : index
    %c0_55 = arith.constant 0 : index
    %73 = vector.load %arg5[%c5, %c0_54, %c0_55] : memref<10x1x512xf32, #tpu.memory_space<vmem>>, vector<1x1x512xf32>
    %74 = vector.shape_cast %73 : vector<1x1x512xf32> to vector<1x512xf32>
    %75 = vector.broadcast %74 : vector<1x512xf32> to vector<16x512xf32>
    %76 = arith.mulf %72, %75 : vector<16x512xf32>
    %c5_56 = arith.constant 5 : index
    %c0_57 = arith.constant 0 : index
    %c0_58 = arith.constant 0 : index
    %77 = vector.load %arg6[%c5_56, %c0_57, %c0_58] : memref<10x1x512xf32, #tpu.memory_space<vmem>>, vector<1x1x512xf32>
    %78 = vector.shape_cast %77 : vector<1x1x512xf32> to vector<1x512xf32>
    %79 = vector.broadcast %78 : vector<1x512xf32> to vector<16x512xf32>
    %80 = arith.addf %76, %79 : vector<16x512xf32>
    %cst_59 = arith.constant 0.000000e+00 : f32
    %81 = vector.broadcast %cst_59 : f32 to vector<16x512xf32>
    %82 = arith.maximumf %80, %81 : vector<16x512xf32>
    %83 = arith.truncf %82 : vector<16x512xf32> to vector<16x512xbf16>
    %c5_60 = arith.constant 5 : index
    %c0_61 = arith.constant 0 : index
    %c0_62 = arith.constant 0 : index
    %84 = vector.load %arg2[%c5_60, %c0_61, %c0_62] : memref<9x512x512xbf16, #tpu.memory_space<vmem>>, vector<1x512x512xbf16>
    %85 = vector.shape_cast %84 : vector<1x512x512xbf16> to vector<512x512xbf16>
    %cst_63 = arith.constant dense<0.000000e+00> : vector<16x512xf32>
    %86 = tpu.matmul %83, %85, %cst_63 {dimension_numbers = #tpu.dot_dimension_numbers<[1], [0], [0], [1], [0, 0, 1, 1], [], []>} : vector<16x512xbf16>, vector<512x512xbf16>, vector<16x512xf32> -> vector<16x512xf32>
    %c6 = arith.constant 6 : index
    %c0_64 = arith.constant 0 : index
    %c0_65 = arith.constant 0 : index
    %87 = vector.load %arg5[%c6, %c0_64, %c0_65] : memref<10x1x512xf32, #tpu.memory_space<vmem>>, vector<1x1x512xf32>
    %88 = vector.shape_cast %87 : vector<1x1x512xf32> to vector<1x512xf32>
    %89 = vector.broadcast %88 : vector<1x512xf32> to vector<16x512xf32>
    %90 = arith.mulf %86, %89 : vector<16x512xf32>
    %c6_66 = arith.constant 6 : index
    %c0_67 = arith.constant 0 : index
    %c0_68 = arith.constant 0 : index
    %91 = vector.load %arg6[%c6_66, %c0_67, %c0_68] : memref<10x1x512xf32, #tpu.memory_space<vmem>>, vector<1x1x512xf32>
    %92 = vector.shape_cast %91 : vector<1x1x512xf32> to vector<1x512xf32>
    %93 = vector.broadcast %92 : vector<1x512xf32> to vector<16x512xf32>
    %94 = arith.addf %90, %93 : vector<16x512xf32>
    %cst_69 = arith.constant 0.000000e+00 : f32
    %95 = vector.broadcast %cst_69 : f32 to vector<16x512xf32>
    %96 = arith.maximumf %94, %95 : vector<16x512xf32>
    %97 = arith.truncf %96 : vector<16x512xf32> to vector<16x512xbf16>
    %c6_70 = arith.constant 6 : index
    %c0_71 = arith.constant 0 : index
    %c0_72 = arith.constant 0 : index
    %98 = vector.load %arg2[%c6_70, %c0_71, %c0_72] : memref<9x512x512xbf16, #tpu.memory_space<vmem>>, vector<1x512x512xbf16>
    %99 = vector.shape_cast %98 : vector<1x512x512xbf16> to vector<512x512xbf16>
    %cst_73 = arith.constant dense<0.000000e+00> : vector<16x512xf32>
    %100 = tpu.matmul %97, %99, %cst_73 {dimension_numbers = #tpu.dot_dimension_numbers<[1], [0], [0], [1], [0, 0, 1, 1], [], []>} : vector<16x512xbf16>, vector<512x512xbf16>, vector<16x512xf32> -> vector<16x512xf32>
    %c7 = arith.constant 7 : index
    %c0_74 = arith.constant 0 : index
    %c0_75 = arith.constant 0 : index
    %101 = vector.load %arg5[%c7, %c0_74, %c0_75] : memref<10x1x512xf32, #tpu.memory_space<vmem>>, vector<1x1x512xf32>
    %102 = vector.shape_cast %101 : vector<1x1x512xf32> to vector<1x512xf32>
    %103 = vector.broadcast %102 : vector<1x512xf32> to vector<16x512xf32>
    %104 = arith.mulf %100, %103 : vector<16x512xf32>
    %c7_76 = arith.constant 7 : index
    %c0_77 = arith.constant 0 : index
    %c0_78 = arith.constant 0 : index
    %105 = vector.load %arg6[%c7_76, %c0_77, %c0_78] : memref<10x1x512xf32, #tpu.memory_space<vmem>>, vector<1x1x512xf32>
    %106 = vector.shape_cast %105 : vector<1x1x512xf32> to vector<1x512xf32>
    %107 = vector.broadcast %106 : vector<1x512xf32> to vector<16x512xf32>
    %108 = arith.addf %104, %107 : vector<16x512xf32>
    %cst_79 = arith.constant 0.000000e+00 : f32
    %109 = vector.broadcast %cst_79 : f32 to vector<16x512xf32>
    %110 = arith.maximumf %108, %109 : vector<16x512xf32>
    %111 = arith.truncf %110 : vector<16x512xf32> to vector<16x512xbf16>
    %c7_80 = arith.constant 7 : index
    %c0_81 = arith.constant 0 : index
    %c0_82 = arith.constant 0 : index
    %112 = vector.load %arg2[%c7_80, %c0_81, %c0_82] : memref<9x512x512xbf16, #tpu.memory_space<vmem>>, vector<1x512x512xbf16>
    %113 = vector.shape_cast %112 : vector<1x512x512xbf16> to vector<512x512xbf16>
    %cst_83 = arith.constant dense<0.000000e+00> : vector<16x512xf32>
    %114 = tpu.matmul %111, %113, %cst_83 {dimension_numbers = #tpu.dot_dimension_numbers<[1], [0], [0], [1], [0, 0, 1, 1], [], []>} : vector<16x512xbf16>, vector<512x512xbf16>, vector<16x512xf32> -> vector<16x512xf32>
    %c8 = arith.constant 8 : index
    %c0_84 = arith.constant 0 : index
    %c0_85 = arith.constant 0 : index
    %115 = vector.load %arg5[%c8, %c0_84, %c0_85] : memref<10x1x512xf32, #tpu.memory_space<vmem>>, vector<1x1x512xf32>
    %116 = vector.shape_cast %115 : vector<1x1x512xf32> to vector<1x512xf32>
    %117 = vector.broadcast %116 : vector<1x512xf32> to vector<16x512xf32>
    %118 = arith.mulf %114, %117 : vector<16x512xf32>
    %c8_86 = arith.constant 8 : index
    %c0_87 = arith.constant 0 : index
    %c0_88 = arith.constant 0 : index
    %119 = vector.load %arg6[%c8_86, %c0_87, %c0_88] : memref<10x1x512xf32, #tpu.memory_space<vmem>>, vector<1x1x512xf32>
    %120 = vector.shape_cast %119 : vector<1x1x512xf32> to vector<1x512xf32>
    %121 = vector.broadcast %120 : vector<1x512xf32> to vector<16x512xf32>
    %122 = arith.addf %118, %121 : vector<16x512xf32>
    %cst_89 = arith.constant 0.000000e+00 : f32
    %123 = vector.broadcast %cst_89 : f32 to vector<16x512xf32>
    %124 = arith.maximumf %122, %123 : vector<16x512xf32>
    %125 = arith.truncf %124 : vector<16x512xf32> to vector<16x512xbf16>
    %c8_90 = arith.constant 8 : index
    %c0_91 = arith.constant 0 : index
    %c0_92 = arith.constant 0 : index
    %126 = vector.load %arg2[%c8_90, %c0_91, %c0_92] : memref<9x512x512xbf16, #tpu.memory_space<vmem>>, vector<1x512x512xbf16>
    %127 = vector.shape_cast %126 : vector<1x512x512xbf16> to vector<512x512xbf16>
    %cst_93 = arith.constant dense<0.000000e+00> : vector<16x512xf32>
    %128 = tpu.matmul %125, %127, %cst_93 {dimension_numbers = #tpu.dot_dimension_numbers<[1], [0], [0], [1], [0, 0, 1, 1], [], []>} : vector<16x512xbf16>, vector<512x512xbf16>, vector<16x512xf32> -> vector<16x512xf32>
    %c9 = arith.constant 9 : index
    %c0_94 = arith.constant 0 : index
    %c0_95 = arith.constant 0 : index
    %129 = vector.load %arg5[%c9, %c0_94, %c0_95] : memref<10x1x512xf32, #tpu.memory_space<vmem>>, vector<1x1x512xf32>
    %130 = vector.shape_cast %129 : vector<1x1x512xf32> to vector<1x512xf32>
    %131 = vector.broadcast %130 : vector<1x512xf32> to vector<16x512xf32>
    %132 = arith.mulf %128, %131 : vector<16x512xf32>
    %c9_96 = arith.constant 9 : index
    %c0_97 = arith.constant 0 : index
    %c0_98 = arith.constant 0 : index
    %133 = vector.load %arg6[%c9_96, %c0_97, %c0_98] : memref<10x1x512xf32, #tpu.memory_space<vmem>>, vector<1x1x512xf32>
    %134 = vector.shape_cast %133 : vector<1x1x512xf32> to vector<1x512xf32>
    %135 = vector.broadcast %134 : vector<1x512xf32> to vector<16x512xf32>
    %136 = arith.addf %132, %135 : vector<16x512xf32>
    %cst_99 = arith.constant 0.000000e+00 : f32
    %137 = vector.broadcast %cst_99 : f32 to vector<16x512xf32>
    %138 = arith.maximumf %136, %137 : vector<16x512xf32>
    %139 = arith.truncf %138 : vector<16x512xf32> to vector<16x512xbf16>
    %c0_100 = arith.constant 0 : index
    %c0_101 = arith.constant 0 : index
    %140 = vector.load %arg3[%c0_100, %c0_101] : memref<512x128xbf16, #tpu.memory_space<vmem>>, vector<512x128xbf16>
    %cst_102 = arith.constant dense<0.000000e+00> : vector<16x128xf32>
    %141 = tpu.matmul %139, %140, %cst_102 {dimension_numbers = #tpu.dot_dimension_numbers<[1], [0], [0], [1], [0, 0, 1, 1], [], []>} : vector<16x512xbf16>, vector<512x128xbf16>, vector<16x128xf32> -> vector<16x128xf32>
    %c0_103 = arith.constant 0 : index
    %c0_104 = arith.constant 0 : index
    %142 = vector.load %arg7[%c0_103, %c0_104] : memref<1x128xf32, #tpu.memory_space<vmem>>, vector<1x128xf32>
    %143 = vector.broadcast %142 : vector<1x128xf32> to vector<16x128xf32>
    %144 = arith.mulf %141, %143 : vector<16x128xf32>
    %c0_105 = arith.constant 0 : index
    %c0_106 = arith.constant 0 : index
    %145 = vector.load %arg8[%c0_105, %c0_106] : memref<1x128xf32, #tpu.memory_space<vmem>>, vector<1x128xf32>
    %146 = vector.broadcast %145 : vector<1x128xf32> to vector<16x128xf32>
    %147 = arith.addf %144, %146 : vector<16x128xf32>
    %cst_107 = arith.constant 0.000000e+00 : f32
    %148 = vector.broadcast %cst_107 : f32 to vector<16x128xf32>
    %149 = arith.maximumf %147, %148 : vector<16x128xf32>
    %150 = arith.truncf %149 : vector<16x128xf32> to vector<16x128xbf16>
    %c0_108 = arith.constant 0 : index
    %c0_109 = arith.constant 0 : index
    %151 = vector.load %arg4[%c0_108, %c0_109] : memref<128x128xbf16, #tpu.memory_space<vmem>>, vector<128x128xbf16>
    %cst_110 = arith.constant dense<0.000000e+00> : vector<16x128xf32>
    %152 = tpu.matmul %150, %151, %cst_110 {dimension_numbers = #tpu.dot_dimension_numbers<[1], [0], [0], [1], [0, 0, 1, 1], [], []>} : vector<16x128xbf16>, vector<128x128xbf16>, vector<16x128xf32> -> vector<16x128xf32>
    %c0_111 = arith.constant 0 : index
    %c0_112 = arith.constant 0 : index
    %153 = vector.load %arg9[%c0_111, %c0_112] : memref<1x128xf32, #tpu.memory_space<vmem>>, vector<1x128xf32>
    %154 = vector.broadcast %153 : vector<1x128xf32> to vector<16x128xf32>
    %155 = arith.addf %152, %154 : vector<16x128xf32>
    %156 = math.tanh %155 : vector<16x128xf32>
    %c0_113 = arith.constant 0 : index
    %c0_114 = arith.constant 0 : index
    %157 = vector.load %arg10[%c0_113, %c0_114] : memref<16x128xf32, #tpu.memory_space<vmem>>, vector<16x128xf32>
    tpu.vector_store %arg10[%c0_113, %c0_114], %156 {strides = array<i32>} : memref<16x128xf32, #tpu.memory_space<vmem>>, vector<16x128xf32>,
    return
  }
}

</mosaic_0001>

<bundles_post_ra>
// kernel: _lambda_.1
= control target key start
LH: loop header
LB: loop body
LE: loop exit
PB: predicated region body
PF: predicated region fallthrough
CT: control target
= control target key end

     0   :  { %v14246_v1 = vmov 0   ;;  %vm14248_vm0 = vmmov 0   ;;  %s18187_s1 = inlined_call_operand.vmem [shape: bf16[128,512], index: 1, kind: input, shape index: {}]   ;;  %s18188_s0 = inlined_call_operand.vmem [shape: bf16[16,128], index: 0, kind: input, shape index: {}]   ;;  %s18189_s2 = inlined_call_operand.vmem [shape: bf16[9,512,512], index: 2, kind: input, shape index: {}]   ;;  %s18190_s5 = inlined_call_operand.vmem [shape: f32[10,1,512], index: 5, kind: input, shape index: {}]   ;;  %s18191_s6 = inlined_call_operand.vmem [shape: f32[10,1,512], index: 6, kind: input, shape index: {}]   ;;  %s18192_s3 = inlined_call_operand.vmem [shape: bf16[512,128], index: 3, kind: input, shape index: {}]   ;;  %s18193_s4 = inlined_call_operand.vmem [shape: bf16[128,128], index: 4, kind: input, shape index: {}]   ;;  %s18194_s7 = inlined_call_operand.vmem [shape: f32[1,128], index: 7, kind: input, shape index: {}]   ;;  %s18195_s8 = inlined_call_operand.vmem [shape: f32[1,128], index: 8, kind: input, shape index: {}]   ;;  %s18196_s9 = inlined_call_operand.vmem [shape: f32[1,128], index: 9, kind: input, shape index: {}]   ;;  %s18197_s10 = inlined_call_operand.vmem [shape: f32[16,128], index: 10, kind: output, shape index: {}]  }
   0x1   :  { %v12425_v0 = vld [vmem:[%s18187_s1 + $0x4] ss:$16 sps:$4 sm:$0xff]   ;;  %268 = vmatprep.mubr.bf16.mxu0 %v14246_v1  ;;  %311 = vmatprep.mubr.bf16.mxu1 %v14246_v1  ;;  %v12427_v2 = vld [vmem:[%s18187_s1] ss:$16 sps:$4 sm:$0xff]   ;;  %v12450_v10 = vld [vmem:[%s18187_s1 + $0xc] ss:$16 sps:$4 sm:$0xff]  }
   0x2   :  { %236 = vmatprep.subr.bf16.mxu0 %v12425_v0  ;;  %v12428_v3 = vld [vmem:[%s18187_s1 + $0x24] ss:$16 sps:$4 sm:$0xff]   ;;  %v12430_v4 = vld [vmem:[%s18187_s1 + $0x20] ss:$16 sps:$4 sm:$0xff]   ;;  %v12452_v11 = vld [vmem:[%s18187_s1 + $0x8] ss:$16 sps:$4 sm:$0xff]   ;;  %279 = vmatprep.subr.bf16.mxu1 %v12450_v10 }
   0x3   :  { %237 = vmatpush1.bf16.msra.mxu0 %v12427_v2  ;;  %v12431_v5 = vld [vmem:[%s18187_s1 + $0x44] ss:$16 sps:$4 sm:$0xff]   ;;  %v12433_v6 = vld [vmem:[%s18187_s1 + $0x40] ss:$16 sps:$4 sm:$0xff]   ;;  %v12453_v12 = vld [vmem:[%s18187_s1 + $0x2c] ss:$16 sps:$4 sm:$0xff]   ;;  %280 = vmatpush1.bf16.msra.mxu1 %v12452_v11 }
   0x4   :  { %238 = vmatprep.subr.bf16.mxu0 %v12428_v3  ;;  %v12434_v7 = vld [vmem:[%s18187_s1 + $0x64] ss:$16 sps:$4 sm:$0xff]   ;;  %v12436_v8 = vld [vmem:[%s18187_s1 + $0x60] ss:$16 sps:$4 sm:$0xff]   ;;  %v12455_v14 = vld [vmem:[%s18187_s1 + $0x28] ss:$16 sps:$4 sm:$0xff]   ;;  %281 = vmatprep.subr.bf16.mxu1 %v12453_v12 }
   0x5   :  { %v12437_v9 = vld [vmem:[%s18187_s1 + $0x84] ss:$16 sps:$4 sm:$0xff]   ;;  %v12439_v13 = vld [vmem:[%s18187_s1 + $0x80] ss:$16 sps:$4 sm:$0xff]   ;;  %v12456_v16 = vld [vmem:[%s18187_s1 + $0x4c] ss:$16 sps:$4 sm:$0xff]  }
   0x6   :  { %v12440_v15 = vld [vmem:[%s18187_s1 + $0xa4] ss:$16 sps:$4 sm:$0xff]   ;;  %v12442_v17 = vld [vmem:[%s18187_s1 + $0xa0] ss:$16 sps:$4 sm:$0xff]   ;;  %v12458_v18 = vld [vmem:[%s18187_s1 + $0x48] ss:$16 sps:$4 sm:$0xff]  }
   0x7   :  { %239 = vmatpush1.bf16.msra.mxu0 %v12430_v4  ;;  %282 = vmatpush1.bf16.msra.mxu1 %v12455_v14  ;;  %v12443_v19 = vld [vmem:[%s18187_s1 + $0xc4] ss:$16 sps:$4 sm:$0xff]   ;;  %v12459_v20 = vld [vmem:[%s18187_s1 + $0x6c] ss:$16 sps:$4 sm:$0xff]   ;;  %v12445_v21 = vld [vmem:[%s18187_s1 + $0xc0] ss:$16 sps:$4 sm:$0xff]  }
   0x8   :  { %240 = vmatprep.subr.bf16.mxu0 %v12431_v5  ;;  %283 = vmatprep.subr.bf16.mxu1 %v12456_v16  ;;  %v12461_v22 = vld [vmem:[%s18187_s1 + $0x68] ss:$16 sps:$4 sm:$0xff]   ;;  %v12446_v23 = vld [vmem:[%s18187_s1 + $0xe4] ss:$16 sps:$4 sm:$0xff]   ;;  %v12462_v24 = vld [vmem:[%s18187_s1 + $0x8c] ss:$16 sps:$4 sm:$0xff]  }
   0x9   :  { %v12448_v25 = vld [vmem:[%s18187_s1 + $0xe0] ss:$16 sps:$4 sm:$0xff]   ;;  %v12464_v26 = vld [vmem:[%s18187_s1 + $0x88] ss:$16 sps:$4 sm:$0xff]   ;;  %v12465_v27 = vld [vmem:[%s18187_s1 + $0xac] ss:$16 sps:$4 sm:$0xff]  }
   0xa   :  { %v12476_v28 = vld [vmem:[%s18189_s2 + $0x4] ss:$16 sps:$4 sm:$0xff]   ;;  %v12467_v30 = vld [vmem:[%s18187_s1 + $0xa8] ss:$16 sps:$4 sm:$0xff]   ;;  %v12474_v31 = vld [vmem:[%s18189_s2] ss:$16 sps:$4 sm:$0xff]  }
   0xb   :  { %241 = vmatpush1.bf16.msra.mxu0 %v12433_v6  ;;  %284 = vmatpush1.bf16.msra.mxu1 %v12458_v18  ;;  %v12449_v29 = vld [vmem:[%s18188_s0] sm:$0xff]   ;;  %v12468_v32 = vld [vmem:[%s18187_s1 + $0xcc] ss:$16 sps:$4 sm:$0xff]   ;;  %v12470_v34 = vld [vmem:[%s18187_s1 + $0xc8] ss:$16 sps:$4 sm:$0xff]  }
   0xc   :  { %242 = vmatprep.subr.bf16.mxu0 %v12434_v7  ;;  %285 = vmatprep.subr.bf16.mxu1 %v12459_v20  ;;  %v12482_v33 = vld [vmem:[%s18189_s2 + $0x24] ss:$16 sps:$4 sm:$0xff]   ;;  %v12480_v35 = vld [vmem:[%s18189_s2 + $0x20] ss:$16 sps:$4 sm:$0xff]   ;;  %v12471_v36 = vld [vmem:[%s18187_s1 + $0xec] ss:$16 sps:$4 sm:$0xff]  }
   0xd   :  { %v12488_v37 = vld [vmem:[%s18189_s2 + $0x44] ss:$16 sps:$4 sm:$0xff]   ;;  %v12473_v38 = vld [vmem:[%s18187_s1 + $0xe8] ss:$16 sps:$4 sm:$0xff]   ;;  %v12486_v39 = vld [vmem:[%s18189_s2 + $0x40] ss:$16 sps:$4 sm:$0xff]  }
   0xe   :  { %v12479_v40 = vld [vmem:[%s18189_s2 + $0xc] ss:$16 sps:$4 sm:$0xff]   ;;  %v12494_v41 = vld [vmem:[%s18189_s2 + $0x64] ss:$16 sps:$4 sm:$0xff]   ;;  %v12477_v42 = vld [vmem:[%s18189_s2 + $0x8] ss:$16 sps:$4 sm:$0xff]  }
   0xf   :  { %243 = vmatpush1.bf16.msra.mxu0 %v12436_v8  ;;  %286 = vmatpush1.bf16.msra.mxu1 %v12461_v22  ;;  %v12492_v43 = vld [vmem:[%s18189_s2 + $0x60] ss:$16 sps:$4 sm:$0xff]   ;;  %v12485_v44 = vld [vmem:[%s18189_s2 + $0x2c] ss:$16 sps:$4 sm:$0xff]   ;;  %v12500_v45 = vld [vmem:[%s18189_s2 + $0x84] ss:$16 sps:$4 sm:$0xff]  }
  0x10   :  { %244 = vmatprep.subr.bf16.mxu0 %v12437_v9  ;;  %287 = vmatprep.subr.bf16.mxu1 %v12462_v24  ;;  %v12483_v46 = vld [vmem:[%s18189_s2 + $0x28] ss:$16 sps:$4 sm:$0xff]   ;;  %v12498_v47 = vld [vmem:[%s18189_s2 + $0x80] ss:$16 sps:$4 sm:$0xff]   ;;  %v12491_v48 = vld [vmem:[%s18189_s2 + $0x4c] ss:$16 sps:$4 sm:$0xff]  }
  0x11   :  { %v12506_v49 = vld [vmem:[%s18189_s2 + $0xa4] ss:$16 sps:$4 sm:$0xff]   ;;  %v12489_v50 = vld [vmem:[%s18189_s2 + $0x48] ss:$16 sps:$4 sm:$0xff]   ;;  %v12504_v51 = vld [vmem:[%s18189_s2 + $0xa0] ss:$16 sps:$4 sm:$0xff]  }
  0x12   :  { %v12497_v52 = vld [vmem:[%s18189_s2 + $0x6c] ss:$16 sps:$4 sm:$0xff]   ;;  %v12512_v53 = vld [vmem:[%s18189_s2 + $0xc4] ss:$16 sps:$4 sm:$0xff]   ;;  %v12495_v54 = vld [vmem:[%s18189_s2 + $0x68] ss:$16 sps:$4 sm:$0xff]  }
  0x13   :  { %245 = vmatpush1.bf16.msra.mxu0 %v12439_v13  ;;  %288 = vmatpush1.bf16.msra.mxu1 %v12464_v26  ;;  %v12510_v55 = vld [vmem:[%s18189_s2 + $0xc0] ss:$16 sps:$4 sm:$0xff]   ;;  %v12503_v56 = vld [vmem:[%s18189_s2 + $0x8c] ss:$16 sps:$4 sm:$0xff]   ;;  %v12518_v57 = vld [vmem:[%s18189_s2 + $0xe4] ss:$16 sps:$4 sm:$0xff]  }
  0x14   :  { %246 = vmatprep.subr.bf16.mxu0 %v12440_v15  ;;  %289 = vmatprep.subr.bf16.mxu1 %v12465_v27  ;;  %v12501_v58 = vld [vmem:[%s18189_s2 + $0x88] ss:$16 sps:$4 sm:$0xff]   ;;  %v12516_v59 = vld [vmem:[%s18189_s2 + $0xe0] ss:$16 sps:$4 sm:$0xff]   ;;  %v12509_v60 = vld [vmem:[%s18189_s2 + $0xac] ss:$16 sps:$4 sm:$0xff]  }
  0x15   :  { %v12524_v61 = vld [vmem:[%s18189_s2 + $0x104] ss:$16 sps:$4 sm:$0xff]   ;;  %v12507_v62 = vld [vmem:[%s18189_s2 + $0xa8] ss:$16 sps:$4 sm:$0xff]   ;;  %v12522_v63 = vld [vmem:[%s18189_s2 + $0x100] ss:$16 sps:$4 sm:$0xff]  }
  0x16   :  { %v12515_v0 = vld [vmem:[%s18189_s2 + $0xcc] ss:$16 sps:$4 sm:$0xff]   ;;  %v12530_v1 = vld [vmem:[%s18189_s2 + $0x124] ss:$16 sps:$4 sm:$0xff]   ;;  %v12513_v2 = vld [vmem:[%s18189_s2 + $0xc8] ss:$16 sps:$4 sm:$0xff]  }
  0x17   :  { %247 = vmatpush1.bf16.msra.mxu0 %v12442_v17  ;;  %290 = vmatpush1.bf16.msra.mxu1 %v12467_v30  ;;  %v12528_v3 = vld [vmem:[%s18189_s2 + $0x120] ss:$16 sps:$4 sm:$0xff]   ;;  %v12521_v4 = vld [vmem:[%s18189_s2 + $0xec] ss:$16 sps:$4 sm:$0xff]   ;;  %v12536_v5 = vld [vmem:[%s18189_s2 + $0x144] ss:$16 sps:$4 sm:$0xff]  }
  0x18   :  { %248 = vmatprep.subr.bf16.mxu0 %v12443_v19  ;;  %291 = vmatprep.subr.bf16.mxu1 %v12468_v32  ;;  %v12519_v6 = vld [vmem:[%s18189_s2 + $0xe8] ss:$16 sps:$4 sm:$0xff]   ;;  %v12534_v7 = vld [vmem:[%s18189_s2 + $0x140] ss:$16 sps:$4 sm:$0xff]   ;;  %v12527_v8 = vld [vmem:[%s18189_s2 + $0x10c] ss:$16 sps:$4 sm:$0xff]  }
  0x19   :  { %v12542_v9 = vld [vmem:[%s18189_s2 + $0x164] ss:$16 sps:$4 sm:$0xff]   ;;  %v12525_v10 = vld [vmem:[%s18189_s2 + $0x108] ss:$16 sps:$4 sm:$0xff]   ;;  %v12540_v11 = vld [vmem:[%s18189_s2 + $0x160] ss:$16 sps:$4 sm:$0xff]  }
  0x1a   :  { %v12533_v12 = vld [vmem:[%s18189_s2 + $0x12c] ss:$16 sps:$4 sm:$0xff]   ;;  %v12548_v13 = vld [vmem:[%s18189_s2 + $0x184] ss:$16 sps:$4 sm:$0xff]   ;;  %v12531_v14 = vld [vmem:[%s18189_s2 + $0x128] ss:$16 sps:$4 sm:$0xff]  }
  0x1b   :  { %249 = vmatpush1.bf16.msra.mxu0 %v12445_v21  ;;  %292 = vmatpush1.bf16.msra.mxu1 %v12470_v34  ;;  %v12546_v15 = vld [vmem:[%s18189_s2 + $0x180] ss:$16 sps:$4 sm:$0xff]   ;;  %v12539_v16 = vld [vmem:[%s18189_s2 + $0x14c] ss:$16 sps:$4 sm:$0xff]   ;;  %v12537_v17 = vld [vmem:[%s18189_s2 + $0x148] ss:$16 sps:$4 sm:$0xff]  }
  0x1c   :  { %250 = vmatprep.subr.bf16.mxu0 %v12446_v23  ;;  %293 = vmatprep.subr.bf16.mxu1 %v12471_v36  ;;  %v12545_v18 = vld [vmem:[%s18189_s2 + $0x16c] ss:$16 sps:$4 sm:$0xff]   ;;  %v12543_v19 = vld [vmem:[%s18189_s2 + $0x168] ss:$16 sps:$4 sm:$0xff]   ;;  %v12554_v22 = vld [vmem:[%s18189_s2 + $0x1a4] ss:$16 sps:$4 sm:$0xff]   ;;  %v324_v36 = vlaneseq }
  0x1d   :  { %v12551_v20 = vld [vmem:[%s18189_s2 + $0x18c] ss:$16 sps:$4 sm:$0xff]   ;;  %v12549_v21 = vld [vmem:[%s18189_s2 + $0x188] ss:$16 sps:$4 sm:$0xff]   ;;  %v12552_v24 = vld [vmem:[%s18189_s2 + $0x1a0] ss:$16 sps:$4 sm:$0xff]  }
  0x1e   :  { %v12557_v23 = vld [vmem:[%s18189_s2 + $0x1ac] ss:$16 sps:$4 sm:$0xff]   ;;  %v12560_v26 = vld [vmem:[%s18189_s2 + $0x1c4] ss:$16 sps:$4 sm:$0xff]   ;;  %v12564_v32 = vld [vmem:[%s18189_s2 + $0x1e0] ss:$16 sps:$4 sm:$0xff]  }
  0x1f   :  { %251 = vmatpush1.bf16.msra.mxu0 %v12448_v25  ;;  %294 = vmatpush1.bf16.msra.mxu1 %v12473_v38  ;;  %v12555_v25 = vld [vmem:[%s18189_s2 + $0x1a8] ss:$16 sps:$4 sm:$0xff]   ;;  %v12563_v27 = vld [vmem:[%s18189_s2 + $0x1cc] ss:$16 sps:$4 sm:$0xff]   ;;  %v12566_v30 = vld [vmem:[%s18189_s2 + $0x1e4] ss:$16 sps:$4 sm:$0xff]  }
  0x20   :  { %1162 = vmatprep.subr.bf16.mxu0 %v12476_v28  ;;  %1248 = vmatprep.subr.bf16.mxu1 %v12479_v40  ;;  %v12558_v28 = vld [vmem:[%s18189_s2 + $0x1c0] ss:$16 sps:$4 sm:$0xff]   ;;  %v12572_v34 = vld [vmem:[%s18189_s2 + $0x204] ss:$16 sps:$4 sm:$0xff]  }
  0x22   :  { %269 = vmatmul.mubr.bf16.vlgmr.msra.gmra.mrb[0].mxu0 %v12449_v29  ;;  %312 = vmatmul.mubr.bf16.vlgmr.msra.gmra.mrb[0].mxu1 %v12449_v29  ;;  %v12561_v29 = vld [vmem:[%s18189_s2 + $0x1c8] ss:$16 sps:$4 sm:$0xff]  }
  0x23   :  { %1163 = vmatpush1.bf16.msra.mxu0 %v12474_v31  ;;  %1249 = vmatpush1.bf16.msra.mxu1 %v12477_v42  ;;  %v12569_v31 = vld [vmem:[%s18189_s2 + $0x1ec] ss:$16 sps:$4 sm:$0xff]  }
  0x24   :  { %1164 = vmatprep.subr.bf16.mxu0 %v12482_v33  ;;  %1250 = vmatprep.subr.bf16.mxu1 %v12485_v44  ;;  %v12567_v33 = vld [vmem:[%s18189_s2 + $0x1e8] ss:$16 sps:$4 sm:$0xff]  }
  0x27   :  { %1165 = vmatpush1.bf16.msra.mxu0 %v12480_v35  ;;  %1251 = vmatpush1.bf16.msra.mxu1 %v12483_v46  ;;  %v12575_v35 = vld [vmem:[%s18189_s2 + $0x20c] ss:$16 sps:$4 sm:$0xff]  }
  0x28   :  { %1166 = vmatprep.subr.bf16.mxu0 %v12488_v37  ;;  %1252 = vmatprep.subr.bf16.mxu1 %v12491_v48  ;;  %v325_v37 = vshrl.u32 %v324_v36, 7  ;;  %v12596_v36 = vld [vmem:[%s18189_s2 + $0x284] ss:$16 sps:$4 sm:$0xff]  }
  0x2a   :  { %v14601_v38 = vsub.s32 0, %v325_v37  ;;  %v14606_v40 = vsub.s32 1, %v325_v37 }
  0x2b   :  { %1167 = vmatpush1.bf16.msra.mxu0 %v12486_v39  ;;  %1253 = vmatpush1.bf16.msra.mxu1 %v12489_v50  ;;  %v322_v39 = vld [vmem:[%s18190_s5] sm:$0xf] }
  0x2c   :  { %1168 = vmatprep.subr.bf16.mxu0 %v12494_v41  ;;  %1254 = vmatprep.subr.bf16.mxu1 %v12497_v52  ;;  %v352_v41 = vld [vmem:[%s18191_s6] sm:$0xf]  ;;  %v327_v42 = vrot.slane %v322_v39, %v14601_v38 }
  0x2d   :  { %v357_v44 = vrot.slane %v352_v41, %v14601_v38  ;;  %v361_v46 = vrot.slane %v352_v41, %v14606_v40 }
  0x2f   :  { %1169 = vmatpush1.bf16.msra.mxu0 %v12492_v43  ;;  %1255 = vmatpush1.bf16.msra.mxu1 %v12495_v54  ;;  %v331_v43 = vrot.slane %v322_v39, %v14606_v40 }
  0x30   :  { %1170 = vmatprep.subr.bf16.mxu0 %v12500_v45  ;;  %1256 = vmatprep.subr.bf16.mxu1 %v12503_v56 }
  0x33   :  { %1171 = vmatpush1.bf16.msra.mxu0 %v12498_v47  ;;  %1257 = vmatpush1.bf16.msra.mxu1 %v12501_v58 }
  0x34   :  { %1172 = vmatprep.subr.bf16.mxu0 %v12506_v49  ;;  %1258 = vmatprep.subr.bf16.mxu1 %v12509_v60 }
  0x37   :  { %1173 = vmatpush1.bf16.msra.mxu0 %v12504_v51  ;;  %1259 = vmatpush1.bf16.msra.mxu1 %v12507_v62 }
  0x38   :  { %1174 = vmatprep.subr.bf16.mxu0 %v12512_v53  ;;  %1260 = vmatprep.subr.bf16.mxu1 %v12515_v0  ;;  %v12570_v0 = vld [vmem:[%s18189_s2 + $0x200] ss:$16 sps:$4 sm:$0xff]  }
  0x3b   :  { %1175 = vmatpush1.bf16.msra.mxu0 %v12510_v55  ;;  %1261 = vmatpush1.bf16.msra.mxu1 %v12513_v2 }
  0x3c   :  { %1176 = vmatprep.subr.bf16.mxu0 %v12518_v57  ;;  %1262 = vmatprep.subr.bf16.mxu1 %v12521_v4  ;;  %v14615_v57 = vsub.s32 2, %v325_v37  ;;  %v12581_v4 = vld [vmem:[%s18189_s2 + $0x22c] ss:$16 sps:$4 sm:$0xff]  }
  0x3f   :  { %1177 = vmatpush1.bf16.msra.mxu0 %v12516_v59  ;;  %1263 = vmatpush1.bf16.msra.mxu1 %v12519_v6  ;;  %v14617_v59 = vsub.s32 3, %v325_v37  ;;  %v12599_v37 = vld [vmem:[%s18189_s2 + $0x28c] ss:$16 sps:$4 sm:$0xff]  }
  0x40   :  { %1178 = vmatprep.subr.bf16.mxu0 %v12524_v61  ;;  %1264 = vmatprep.subr.bf16.mxu1 %v12527_v8  ;;  %v365_v8 = vrot.slane %v352_v41, %v14615_v57 }
  0x43   :  { %1179 = vmatpush1.bf16.msra.mxu0 %v12522_v63  ;;  %1265 = vmatpush1.bf16.msra.mxu1 %v12525_v10  ;;  %v12579_v10 = vld [vmem:[%s18189_s2 + $0x228] ss:$16 sps:$4 sm:$0xff]  }
  0x44   :  { %1180 = vmatprep.subr.bf16.mxu0 %v12530_v1  ;;  %1266 = vmatprep.subr.bf16.mxu1 %v12533_v12  ;;  %v12573_v1 = vld [vmem:[%s18189_s2 + $0x208] ss:$16 sps:$4 sm:$0xff]   ;;  %v369_v12 = vrot.slane %v352_v41, %v14617_v59 }
  0x47   :  { %1181 = vmatpush1.bf16.msra.mxu0 %v12528_v3  ;;  %1267 = vmatpush1.bf16.msra.mxu1 %v12531_v14  ;;  %v12578_v3 = vld [vmem:[%s18189_s2 + $0x224] ss:$16 sps:$4 sm:$0xff]   ;;  %v12587_v14 = vld [vmem:[%s18189_s2 + $0x24c] ss:$16 sps:$4 sm:$0xff]  }
  0x48   :  { %1182 = vmatprep.subr.bf16.mxu0 %v12536_v5  ;;  %1268 = vmatprep.subr.bf16.mxu1 %v12539_v16  ;;  %v335_v5 = vrot.slane %v322_v39, %v14615_v57 }
  0x4b   :  { %1183 = vmatpush1.bf16.msra.mxu0 %v12534_v7  ;;  %1269 = vmatpush1.bf16.msra.mxu1 %v12537_v17  ;;  %v339_v7 = vrot.slane %v322_v39, %v14617_v59 }
  0x4c   :  { %1184 = vmatprep.subr.bf16.mxu0 %v12542_v9  ;;  %1270 = vmatprep.subr.bf16.mxu1 %v12545_v18  ;;  %v12576_v9 = vld [vmem:[%s18189_s2 + $0x220] ss:$16 sps:$4 sm:$0xff]  }
  0x4f   :  { %1185 = vmatpush1.bf16.msra.mxu0 %v12540_v11  ;;  %1271 = vmatpush1.bf16.msra.mxu1 %v12543_v19 }
  0x50   :  { %1186 = vmatprep.subr.bf16.mxu0 %v12548_v13  ;;  %1272 = vmatprep.subr.bf16.mxu1 %v12551_v20  ;;  %v12584_v13 = vld [vmem:[%s18189_s2 + $0x244] ss:$16 sps:$4 sm:$0xff]  }
  0x53   :  { %1187 = vmatpush1.bf16.msra.mxu0 %v12546_v15  ;;  %1273 = vmatpush1.bf16.msra.mxu1 %v12549_v21 }
  0x54   :  { %1188 = vmatprep.subr.bf16.mxu0 %v12554_v22  ;;  %1274 = vmatprep.subr.bf16.mxu1 %v12557_v23  ;;  %v12582_v22 = vld [vmem:[%s18189_s2 + $0x240] ss:$16 sps:$4 sm:$0xff]   ;;  %v12585_v23 = vld [vmem:[%s18189_s2 + $0x248] ss:$16 sps:$4 sm:$0xff]  }
  0x57   :  { %1189 = vmatpush1.bf16.msra.mxu0 %v12552_v24  ;;  %1275 = vmatpush1.bf16.msra.mxu1 %v12555_v25 }
  0x58   :  { %1190 = vmatprep.subr.bf16.mxu0 %v12560_v26  ;;  %1276 = vmatprep.subr.bf16.mxu1 %v12563_v27  ;;  %v12590_v26 = vld [vmem:[%s18189_s2 + $0x264] ss:$16 sps:$4 sm:$0xff]   ;;  %v12593_v27 = vld [vmem:[%s18189_s2 + $0x26c] ss:$16 sps:$4 sm:$0xff]  }
  0x5b   :  { %1191 = vmatpush1.bf16.msra.mxu0 %v12558_v28  ;;  %1277 = vmatpush1.bf16.msra.mxu1 %v12561_v29 }
  0x5c   :  { %1192 = vmatprep.subr.bf16.mxu0 %v12566_v30  ;;  %1278 = vmatprep.subr.bf16.mxu1 %v12569_v31 }
  0x5f   :  { %1193 = vmatpush1.bf16.msra.mxu0 %v12564_v32  ;;  %1279 = vmatpush1.bf16.msra.mxu1 %v12567_v33  ;;  %v12588_v33 = vld [vmem:[%s18189_s2 + $0x260] ss:$16 sps:$4 sm:$0xff]  }
  0x60   :  { %1205 = vmatprep.subr.bf16.mxu0 %v12572_v34  ;;  %1291 = vmatprep.subr.bf16.mxu1 %v12575_v35  ;;  %v12591_v34 = vld [vmem:[%s18189_s2 + $0x268] ss:$16 sps:$4 sm:$0xff]  }
  0xf5   :  { %v270_v45 = vpop.f32.mrb[0].mxu0  ;;  %v313_v11 = vpop.f32.mrb[0].mxu1 }
  0xf6   :  { %v344_v47 = vmul.f32 %v327_v42, %v270_v45  ;;  %v272_v48 = vpop.f32.mrb[1].mxu0  ;;  %v346_v15 = vmul.f32 %v335_v5, %v313_v11  ;;  %v315_v16 = vpop.f32.mrb[1].mxu1  ;;  %v12605_v45 = vld [vmem:[%s18189_s2 + $0x2ac] ss:$16 sps:$4 sm:$0xff]  }
  0xf7   :  { %v345_v49 = vmul.f32 %v331_v43, %v272_v48  ;;  %v274_v50 = vpop.f32.mrb[2].mxu0  ;;  %v347_v17 = vmul.f32 %v339_v7, %v315_v16  ;;  %v317_v18 = vpop.f32.mrb[2].mxu1  ;;  %v12608_v48 = vld [vmem:[%s18189_s2 + $0x2c4] ss:$16 sps:$4 sm:$0xff]   ;;  %v12647_v11 = vld [vmem:[%s18189_s2 + $0x38c] ss:$16 sps:$4 sm:$0xff]  }
  0xf8   :  { %v374_v51 = vadd.f32 %v357_v44, %v344_v47  ;;  %v348_v52 = vmul.f32 %v327_v42, %v274_v50  ;;  %v276_v53 = vpop.f32.mrb[3].mxu0  ;;  %v376_v19 = vadd.f32 %v365_v8, %v346_v15  ;;  %v350_v20 = vmul.f32 %v335_v5, %v317_v18  ;;  %v319_v21 = vpop.f32.mrb[3].mxu1  ;;  %v12594_v42 = vld [vmem:[%s18189_s2 + $0x280] ss:$16 sps:$4 sm:$0xff]   ;;  %v12603_v47 = vld [vmem:[%s18189_s2 + $0x2a8] ss:$16 sps:$4 sm:$0xff]  }
  0xf9   :  { %v375_v54 = vadd.f32 %v361_v46, %v345_v49  ;;  %v349_v55 = vmul.f32 %v331_v43, %v276_v53  ;;  %v377_v24 = vadd.f32 %v369_v12, %v347_v17  ;;  %v351_v25 = vmul.f32 %v339_v7, %v319_v21  ;;  %v12597_v43 = vld [vmem:[%s18189_s2 + $0x288] ss:$16 sps:$4 sm:$0xff]   ;;  %v12611_v49 = vld [vmem:[%s18189_s2 + $0x2cc] ss:$16 sps:$4 sm:$0xff]   ;;  %v12606_v50 = vld [vmem:[%s18189_s2 + $0x2c0] ss:$16 sps:$4 sm:$0xff]  }
  0xfa   :  { %v378_v56 = vadd.f32 %v357_v44, %v348_v52  ;;  %v382_v60 = vmax.f32 %v374_v51, 0.0  ;;  %v384_v28 = vmax.f32 %v376_v19, 0.0  ;;  %v380_v29 = vadd.f32 %v365_v8, %v350_v20  ;;  %v12602_v44 = vld [vmem:[%s18189_s2 + $0x2a4] ss:$16 sps:$4 sm:$0xff]   ;;  %v12609_v51 = vld [vmem:[%s18189_s2 + $0x2c8] ss:$16 sps:$4 sm:$0xff]  }
  0xfb   :  { %v379_v58 = vadd.f32 %v361_v46, %v349_v55  ;;  %v383_v62 = vmax.f32 %v375_v54, 0.0  ;;  %v385_v30 = vmax.f32 %v377_v24, 0.0  ;;  %v381_v31 = vadd.f32 %v369_v12, %v351_v25  ;;  %v12600_v46 = vld [vmem:[%s18189_s2 + $0x2a0] ss:$16 sps:$4 sm:$0xff]   ;;  %v12614_v52 = vld [vmem:[%s18189_s2 + $0x2e4] ss:$16 sps:$4 sm:$0xff]  }
  0xfc   :  { %v386_v61 = vmax.f32 %v378_v56, 0.0  ;;  %v388_v32 = vmax.f32 %v380_v29, 0.0  ;;  %v12617_v53 = vld [vmem:[%s18189_s2 + $0x2ec] ss:$16 sps:$4 sm:$0xff]   ;;  %v12612_v54 = vld [vmem:[%s18189_s2 + $0x2e0] ss:$16 sps:$4 sm:$0xff]  }
  0xfd   :  { %v387_v63 = vmax.f32 %v379_v58, 0.0  ;;  %v389_v35 = vmax.f32 %v381_v31, 0.0  ;;  %v12615_v55 = vld [vmem:[%s18189_s2 + $0x2e8] ss:$16 sps:$4 sm:$0xff]   ;;  %v12620_v56 = vld [vmem:[%s18189_s2 + $0x304] ss:$16 sps:$4 sm:$0xff]  }
  0xfe   :  { %v390_v2 = vpack.c.bf16 %v386_v61, %v382_v60  ;;  %v14671_v39 = vpack.c.bf16 %v388_v32, %v384_v28  ;;  %v12623_v58 = vld [vmem:[%s18189_s2 + $0x30c] ss:$16 sps:$4 sm:$0xff]   ;;  %v12618_v60 = vld [vmem:[%s18189_s2 + $0x300] ss:$16 sps:$4 sm:$0xff]   ;;  %v12621_v61 = vld [vmem:[%s18189_s2 + $0x308] ss:$16 sps:$4 sm:$0xff]  }
  0xff   :  { %v391_v6 = vpack.c.bf16 %v387_v63, %v383_v62  ;;  %v393_v41 = vpack.c.bf16 %v389_v35, %v385_v30  ;;  %v12626_v62 = vld [vmem:[%s18189_s2 + $0x324] ss:$16 sps:$4 sm:$0xff]   ;;  %v12629_v63 = vld [vmem:[%s18189_s2 + $0x32c] ss:$16 sps:$4 sm:$0xff]   ;;  %v12633_v5 = vld [vmem:[%s18189_s2 + $0x348] ss:$16 sps:$4 sm:$0xff]  }
 0x100   :  { %v12641_v7 = vld [vmem:[%s18189_s2 + $0x36c] ss:$16 sps:$4 sm:$0xff]   ;;  %v12636_v8 = vld [vmem:[%s18189_s2 + $0x360] ss:$16 sps:$4 sm:$0xff]   ;;  %v12651_v17 = vld [vmem:[%s18189_s2 + $0x3a8] ss:$16 sps:$4 sm:$0xff]  }
 0x101   :  { %1194 = vmatprep.mubr.bf16.mxu0 %v391_v6  ;;  %1280 = vmatprep.mubr.bf16.mxu1 %v391_v6  ;;  %v12638_v6 = vld [vmem:[%s18189_s2 + $0x364] ss:$16 sps:$4 sm:$0xff]   ;;  %v12642_v12 = vld [vmem:[%s18189_s2 + $0x380] ss:$16 sps:$4 sm:$0xff]   ;;  %v12653_v15 = vld [vmem:[%s18189_s2 + $0x3ac] ss:$16 sps:$4 sm:$0xff]  }
 0x102   :  { %1195 = vmatmul.mubr.bf16.vlgmr.msra.gmra.mrb[4].mxu0 %v390_v2  ;;  %1281 = vmatmul.mubr.bf16.vlgmr.msra.gmra.mrb[4].mxu1 %v390_v2  ;;  %v12632_v2 = vld [vmem:[%s18189_s2 + $0x344] ss:$16 sps:$4 sm:$0xff]   ;;  %v12648_v16 = vld [vmem:[%s18189_s2 + $0x3a0] ss:$16 sps:$4 sm:$0xff]   ;;  %v12659_v19 = vld [vmem:[%s18189_s2 + $0x3cc] ss:$16 sps:$4 sm:$0xff]  }
 0x103   :  { %1206 = vmatpush1.bf16.msra.mxu0 %v12570_v0  ;;  %1292 = vmatpush1.bf16.msra.mxu1 %v12573_v1  ;;  %v12624_v0 = vld [vmem:[%s18189_s2 + $0x320] ss:$16 sps:$4 sm:$0xff]   ;;  %v12627_v1 = vld [vmem:[%s18189_s2 + $0x328] ss:$16 sps:$4 sm:$0xff]   ;;  %v12656_v18 = vld [vmem:[%s18189_s2 + $0x3c4] ss:$16 sps:$4 sm:$0xff]  }
 0x104   :  { %1207 = vmatprep.subr.bf16.mxu0 %v12578_v3  ;;  %1293 = vmatprep.subr.bf16.mxu1 %v12581_v4  ;;  %v12635_v3 = vld [vmem:[%s18189_s2 + $0x34c] ss:$16 sps:$4 sm:$0xff]   ;;  %v12630_v4 = vld [vmem:[%s18189_s2 + $0x340] ss:$16 sps:$4 sm:$0xff]   ;;  %v12657_v21 = vld [vmem:[%s18189_s2 + $0x3c8] ss:$16 sps:$4 sm:$0xff]  }
 0x105   :  { %1237 = vmatprep.mubr.bf16.mxu0 %v393_v41  ;;  %1323 = vmatprep.mubr.bf16.mxu1 %v393_v41  ;;  %v12654_v20 = vld [vmem:[%s18189_s2 + $0x3c0] ss:$16 sps:$4 sm:$0xff]   ;;  %v12663_v25 = vld [vmem:[%s18189_s2 + $0x3e8] ss:$16 sps:$4 sm:$0xff]   ;;  %v12674_v30 = vld [vmem:[%s18189_s2 + $0x424] ss:$16 sps:$4 sm:$0xff]  }
 0x106   :  { %v12660_v24 = vld [vmem:[%s18189_s2 + $0x3e0] ss:$16 sps:$4 sm:$0xff]   ;;  %v12669_v29 = vld [vmem:[%s18189_s2 + $0x408] ss:$16 sps:$4 sm:$0xff]   ;;  %v12677_v31 = vld [vmem:[%s18189_s2 + $0x42c] ss:$16 sps:$4 sm:$0xff]  }
 0x107   :  { %1208 = vmatpush1.bf16.msra.mxu0 %v12576_v9  ;;  %1294 = vmatpush1.bf16.msra.mxu1 %v12579_v10  ;;  %v12639_v9 = vld [vmem:[%s18189_s2 + $0x368] ss:$16 sps:$4 sm:$0xff]   ;;  %v12644_v10 = vld [vmem:[%s18189_s2 + $0x384] ss:$16 sps:$4 sm:$0xff]   ;;  %v12666_v28 = vld [vmem:[%s18189_s2 + $0x400] ss:$16 sps:$4 sm:$0xff]  }
 0x108   :  { %1209 = vmatprep.subr.bf16.mxu0 %v12584_v13  ;;  %1295 = vmatprep.subr.bf16.mxu1 %v12587_v14  ;;  %v12645_v13 = vld [vmem:[%s18189_s2 + $0x388] ss:$16 sps:$4 sm:$0xff]   ;;  %v12650_v14 = vld [vmem:[%s18189_s2 + $0x3a4] ss:$16 sps:$4 sm:$0xff]   ;;  %v12672_v32 = vld [vmem:[%s18189_s2 + $0x420] ss:$16 sps:$4 sm:$0xff]  }
 0x109   :  { %v12683_v35 = vld [vmem:[%s18189_s2 + $0x44c] ss:$16 sps:$4 sm:$0xff]  }
 0x10a   :  { %v12689_v41 = vld [vmem:[%s18189_s2 + $0x46c] ss:$16 sps:$4 sm:$0xff]  }
 0x10b   :  { %1210 = vmatpush1.bf16.msra.mxu0 %v12582_v22  ;;  %1296 = vmatpush1.bf16.msra.mxu1 %v12585_v23  ;;  %v12662_v22 = vld [vmem:[%s18189_s2 + $0x3e4] ss:$16 sps:$4 sm:$0xff]   ;;  %v12665_v23 = vld [vmem:[%s18189_s2 + $0x3ec] ss:$16 sps:$4 sm:$0xff]  }
 0x10c   :  { %1211 = vmatprep.subr.bf16.mxu0 %v12590_v26  ;;  %1297 = vmatprep.subr.bf16.mxu1 %v12593_v27  ;;  %v12668_v26 = vld [vmem:[%s18189_s2 + $0x404] ss:$16 sps:$4 sm:$0xff]   ;;  %v12671_v27 = vld [vmem:[%s18189_s2 + $0x40c] ss:$16 sps:$4 sm:$0xff]  }
 0x10f   :  { %1212 = vmatpush1.bf16.msra.mxu0 %v12588_v33  ;;  %1298 = vmatpush1.bf16.msra.mxu1 %v12591_v34  ;;  %v12675_v33 = vld [vmem:[%s18189_s2 + $0x428] ss:$16 sps:$4 sm:$0xff]   ;;  %v12680_v34 = vld [vmem:[%s18189_s2 + $0x444] ss:$16 sps:$4 sm:$0xff]  }
 0x110   :  { %1213 = vmatprep.subr.bf16.mxu0 %v12596_v36  ;;  %1299 = vmatprep.subr.bf16.mxu1 %v12599_v37  ;;  %v12678_v36 = vld [vmem:[%s18189_s2 + $0x440] ss:$16 sps:$4 sm:$0xff]   ;;  %v12681_v37 = vld [vmem:[%s18189_s2 + $0x448] ss:$16 sps:$4 sm:$0xff]  }
 0x113   :  { %1214 = vmatpush1.bf16.msra.mxu0 %v12594_v42  ;;  %1300 = vmatpush1.bf16.msra.mxu1 %v12597_v43  ;;  %v12684_v42 = vld [vmem:[%s18189_s2 + $0x460] ss:$16 sps:$4 sm:$0xff]   ;;  %v12687_v43 = vld [vmem:[%s18189_s2 + $0x468] ss:$16 sps:$4 sm:$0xff]  }
 0x114   :  { %1215 = vmatprep.subr.bf16.mxu0 %v12602_v44  ;;  %1301 = vmatprep.subr.bf16.mxu1 %v12605_v45  ;;  %v12692_v44 = vld [vmem:[%s18189_s2 + $0x484] ss:$16 sps:$4 sm:$0xff]   ;;  %v12695_v45 = vld [vmem:[%s18189_s2 + $0x48c] ss:$16 sps:$4 sm:$0xff]  }
 0x117   :  { %1216 = vmatpush1.bf16.msra.mxu0 %v12600_v46  ;;  %1302 = vmatpush1.bf16.msra.mxu1 %v12603_v47  ;;  %v12690_v46 = vld [vmem:[%s18189_s2 + $0x480] ss:$16 sps:$4 sm:$0xff]   ;;  %v12693_v47 = vld [vmem:[%s18189_s2 + $0x488] ss:$16 sps:$4 sm:$0xff]  }
 0x118   :  { %1217 = vmatprep.subr.bf16.mxu0 %v12608_v48  ;;  %1303 = vmatprep.subr.bf16.mxu1 %v12611_v49  ;;  %v12698_v48 = vld [vmem:[%s18189_s2 + $0x4a4] ss:$16 sps:$4 sm:$0xff]   ;;  %v12701_v49 = vld [vmem:[%s18189_s2 + $0x4ac] ss:$16 sps:$4 sm:$0xff]  }
 0x11b   :  { %1218 = vmatpush1.bf16.msra.mxu0 %v12606_v50  ;;  %1304 = vmatpush1.bf16.msra.mxu1 %v12609_v51  ;;  %v12696_v50 = vld [vmem:[%s18189_s2 + $0x4a0] ss:$16 sps:$4 sm:$0xff]   ;;  %v12699_v51 = vld [vmem:[%s18189_s2 + $0x4a8] ss:$16 sps:$4 sm:$0xff]  }
 0x11c   :  { %1219 = vmatprep.subr.bf16.mxu0 %v12614_v52  ;;  %1305 = vmatprep.subr.bf16.mxu1 %v12617_v53  ;;  %v12704_v52 = vld [vmem:[%s18189_s2 + $0x4c4] ss:$16 sps:$4 sm:$0xff]   ;;  %v12707_v53 = vld [vmem:[%s18189_s2 + $0x4cc] ss:$16 sps:$4 sm:$0xff]  }
 0x11f   :  { %1220 = vmatpush1.bf16.msra.mxu0 %v12612_v54  ;;  %1306 = vmatpush1.bf16.msra.mxu1 %v12615_v55  ;;  %v12702_v54 = vld [vmem:[%s18189_s2 + $0x4c0] ss:$16 sps:$4 sm:$0xff]   ;;  %v12705_v55 = vld [vmem:[%s18189_s2 + $0x4c8] ss:$16 sps:$4 sm:$0xff]  }
 0x120   :  { %1221 = vmatprep.subr.bf16.mxu0 %v12620_v56  ;;  %1307 = vmatprep.subr.bf16.mxu1 %v12623_v58  ;;  %v12710_v56 = vld [vmem:[%s18189_s2 + $0x4e4] ss:$16 sps:$4 sm:$0xff]   ;;  %v12713_v58 = vld [vmem:[%s18189_s2 + $0x4ec] ss:$16 sps:$4 sm:$0xff]  }
 0x123   :  { %1222 = vmatpush1.bf16.msra.mxu0 %v12618_v60  ;;  %1308 = vmatpush1.bf16.msra.mxu1 %v12621_v61  ;;  %v12708_v60 = vld [vmem:[%s18189_s2 + $0x4e0] ss:$16 sps:$4 sm:$0xff]   ;;  %v12711_v61 = vld [vmem:[%s18189_s2 + $0x4e8] ss:$16 sps:$4 sm:$0xff]  }
 0x124   :  { %1223 = vmatprep.subr.bf16.mxu0 %v12626_v62  ;;  %1309 = vmatprep.subr.bf16.mxu1 %v12629_v63  ;;  %v12716_v62 = vld [vmem:[%s18189_s2 + $0x504] ss:$16 sps:$4 sm:$0xff]   ;;  %v12719_v63 = vld [vmem:[%s18189_s2 + $0x50c] ss:$16 sps:$4 sm:$0xff]  }
 0x127   :  { %1224 = vmatpush1.bf16.msra.mxu0 %v12624_v0  ;;  %1310 = vmatpush1.bf16.msra.mxu1 %v12627_v1  ;;  %v12714_v0 = vld [vmem:[%s18189_s2 + $0x500] ss:$16 sps:$4 sm:$0xff]   ;;  %v12717_v1 = vld [vmem:[%s18189_s2 + $0x508] ss:$16 sps:$4 sm:$0xff]  }
 0x128   :  { %1225 = vmatprep.subr.bf16.mxu0 %v12632_v2  ;;  %1311 = vmatprep.subr.bf16.mxu1 %v12635_v3  ;;  %v12722_v2 = vld [vmem:[%s18189_s2 + $0x524] ss:$16 sps:$4 sm:$0xff]   ;;  %v12725_v3 = vld [vmem:[%s18189_s2 + $0x52c] ss:$16 sps:$4 sm:$0xff]  }
 0x12b   :  { %1226 = vmatpush1.bf16.msra.mxu0 %v12630_v4  ;;  %1312 = vmatpush1.bf16.msra.mxu1 %v12633_v5  ;;  %v12720_v4 = vld [vmem:[%s18189_s2 + $0x520] ss:$16 sps:$4 sm:$0xff]   ;;  %v12723_v5 = vld [vmem:[%s18189_s2 + $0x528] ss:$16 sps:$4 sm:$0xff]  }
 0x12c   :  { %1227 = vmatprep.subr.bf16.mxu0 %v12638_v6  ;;  %1313 = vmatprep.subr.bf16.mxu1 %v12641_v7  ;;  %v12728_v6 = vld [vmem:[%s18189_s2 + $0x544] ss:$16 sps:$4 sm:$0xff]   ;;  %v12731_v7 = vld [vmem:[%s18189_s2 + $0x54c] ss:$16 sps:$4 sm:$0xff]  }
 0x12f   :  { %1228 = vmatpush1.bf16.msra.mxu0 %v12636_v8  ;;  %1314 = vmatpush1.bf16.msra.mxu1 %v12639_v9  ;;  %v12726_v8 = vld [vmem:[%s18189_s2 + $0x540] ss:$16 sps:$4 sm:$0xff]   ;;  %v12729_v9 = vld [vmem:[%s18189_s2 + $0x548] ss:$16 sps:$4 sm:$0xff]  }
 0x130   :  { %1229 = vmatprep.subr.bf16.mxu0 %v12644_v10  ;;  %1315 = vmatprep.subr.bf16.mxu1 %v12647_v11  ;;  %v12734_v10 = vld [vmem:[%s18189_s2 + $0x564] ss:$16 sps:$4 sm:$0xff]   ;;  %v12737_v11 = vld [vmem:[%s18189_s2 + $0x56c] ss:$16 sps:$4 sm:$0xff]  }
 0x133   :  { %1230 = vmatpush1.bf16.msra.mxu0 %v12642_v12  ;;  %1316 = vmatpush1.bf16.msra.mxu1 %v12645_v13  ;;  %v12732_v12 = vld [vmem:[%s18189_s2 + $0x560] ss:$16 sps:$4 sm:$0xff]   ;;  %v12735_v13 = vld [vmem:[%s18189_s2 + $0x568] ss:$16 sps:$4 sm:$0xff]  }
 0x134   :  { %1231 = vmatprep.subr.bf16.mxu0 %v12650_v14  ;;  %1317 = vmatprep.subr.bf16.mxu1 %v12653_v15  ;;  %v12740_v14 = vld [vmem:[%s18189_s2 + $0x584] ss:$16 sps:$4 sm:$0xff]   ;;  %v12743_v15 = vld [vmem:[%s18189_s2 + $0x58c] ss:$16 sps:$4 sm:$0xff]  }
 0x137   :  { %1232 = vmatpush1.bf16.msra.mxu0 %v12648_v16  ;;  %1318 = vmatpush1.bf16.msra.mxu1 %v12651_v17  ;;  %v12738_v16 = vld [vmem:[%s18189_s2 + $0x580] ss:$16 sps:$4 sm:$0xff]   ;;  %v12741_v17 = vld [vmem:[%s18189_s2 + $0x588] ss:$16 sps:$4 sm:$0xff]  }
 0x138   :  { %1233 = vmatprep.subr.bf16.mxu0 %v12656_v18  ;;  %1319 = vmatprep.subr.bf16.mxu1 %v12659_v19  ;;  %v12746_v18 = vld [vmem:[%s18189_s2 + $0x5a4] ss:$16 sps:$4 sm:$0xff]   ;;  %v12749_v19 = vld [vmem:[%s18189_s2 + $0x5ac] ss:$16 sps:$4 sm:$0xff]  }
 0x13b   :  { %1234 = vmatpush1.bf16.msra.mxu0 %v12654_v20  ;;  %1320 = vmatpush1.bf16.msra.mxu1 %v12657_v21  ;;  %v12744_v20 = vld [vmem:[%s18189_s2 + $0x5a0] ss:$16 sps:$4 sm:$0xff]   ;;  %v12747_v21 = vld [vmem:[%s18189_s2 + $0x5a8] ss:$16 sps:$4 sm:$0xff]  }
 0x13c   :  { %1235 = vmatprep.subr.bf16.mxu0 %v12662_v22  ;;  %1321 = vmatprep.subr.bf16.mxu1 %v12665_v23  ;;  %v12752_v22 = vld [vmem:[%s18189_s2 + $0x5c4] ss:$16 sps:$4 sm:$0xff]   ;;  %v12755_v23 = vld [vmem:[%s18189_s2 + $0x5cc] ss:$16 sps:$4 sm:$0xff]  }
 0x13f   :  { %1236 = vmatpush1.bf16.msra.mxu0 %v12660_v24  ;;  %1322 = vmatpush1.bf16.msra.mxu1 %v12663_v25  ;;  %v12750_v24 = vld [vmem:[%s18189_s2 + $0x5c0] ss:$16 sps:$4 sm:$0xff]   ;;  %v12753_v25 = vld [vmem:[%s18189_s2 + $0x5c8] ss:$16 sps:$4 sm:$0xff]  }
 0x140   :  { %2177 = vmatprep.subr.bf16.mxu0 %v12668_v26  ;;  %2263 = vmatprep.subr.bf16.mxu1 %v12671_v27  ;;  %v12758_v26 = vld [vmem:[%s18189_s2 + $0x5e4] ss:$16 sps:$4 sm:$0xff]   ;;  %v12761_v27 = vld [vmem:[%s18189_s2 + $0x5ec] ss:$16 sps:$4 sm:$0xff]  }
 0x142   :  { %1238 = vmatmul.mubr.bf16.vlgmr.msra.gmra.mrb[4].mxu0 %v14671_v39  ;;  %1324 = vmatmul.mubr.bf16.vlgmr.msra.gmra.mrb[4].mxu1 %v14671_v39  ;;  %v12686_v39 = vld [vmem:[%s18189_s2 + $0x464] ss:$16 sps:$4 sm:$0xff]  }
 0x143   :  { %2178 = vmatpush1.bf16.msra.mxu0 %v12666_v28  ;;  %2264 = vmatpush1.bf16.msra.mxu1 %v12669_v29  ;;  %v12756_v28 = vld [vmem:[%s18189_s2 + $0x5e0] ss:$16 sps:$4 sm:$0xff]   ;;  %v12759_v29 = vld [vmem:[%s18189_s2 + $0x5e8] ss:$16 sps:$4 sm:$0xff]  }
 0x144   :  { %2179 = vmatprep.subr.bf16.mxu0 %v12674_v30  ;;  %2265 = vmatprep.subr.bf16.mxu1 %v12677_v31  ;;  %v12764_v30 = vld [vmem:[%s18189_s2 + $0x604] ss:$16 sps:$4 sm:$0xff]   ;;  %v12767_v31 = vld [vmem:[%s18189_s2 + $0x60c] ss:$16 sps:$4 sm:$0xff]  }
 0x147   :  { %2180 = vmatpush1.bf16.msra.mxu0 %v12672_v32  ;;  %2266 = vmatpush1.bf16.msra.mxu1 %v12675_v33  ;;  %v10168_v32 = vld [vmem:[%s18190_s5 + $0x4] sm:$0xf] }
 0x148   :  { %2181 = vmatprep.subr.bf16.mxu0 %v12680_v34  ;;  %2267 = vmatprep.subr.bf16.mxu1 %v12683_v35  ;;  %v10169_v33 = vld [vmem:[%s18191_s6 + $0x4] sm:$0xf]  ;;  %v1340_v34 = vrot.slane %v10168_v32, %v14601_v38  ;;  %v1348_v35 = vrot.slane %v10168_v32, %v14615_v57 }
 0x14b   :  { %2182 = vmatpush1.bf16.msra.mxu0 %v12678_v36  ;;  %2268 = vmatpush1.bf16.msra.mxu1 %v12681_v37  ;;  %v1344_v36 = vrot.slane %v10168_v32, %v14606_v40  ;;  %v1352_v37 = vrot.slane %v10168_v32, %v14617_v59  ;;  %v12788_v32 = vld [vmem:[%s18189_s2 + $0x684] ss:$16 sps:$4 sm:$0xff]  }
 0x14c   :  { %2183 = vmatprep.subr.bf16.mxu0 %v12686_v39  ;;  %2269 = vmatprep.subr.bf16.mxu1 %v12689_v41  ;;  %v1371_v39 = vrot.slane %v10169_v33, %v14601_v38  ;;  %v1379_v41 = vrot.slane %v10169_v33, %v14615_v57 }
 0x14f   :  { %2184 = vmatpush1.bf16.msra.mxu0 %v12684_v42  ;;  %2270 = vmatpush1.bf16.msra.mxu1 %v12687_v43 }
 0x150   :  { %2185 = vmatprep.subr.bf16.mxu0 %v12692_v44  ;;  %2271 = vmatprep.subr.bf16.mxu1 %v12695_v45  ;;  %v1375_v44 = vrot.slane %v10169_v33, %v14606_v40  ;;  %v1383_v45 = vrot.slane %v10169_v33, %v14617_v59  ;;  %v12791_v33 = vld [vmem:[%s18189_s2 + $0x68c] ss:$16 sps:$4 sm:$0xff]  }
 0x153   :  { %2186 = vmatpush1.bf16.msra.mxu0 %v12690_v46  ;;  %2272 = vmatpush1.bf16.msra.mxu1 %v12693_v47 }
 0x154   :  { %2187 = vmatprep.subr.bf16.mxu0 %v12698_v48  ;;  %2273 = vmatprep.subr.bf16.mxu1 %v12701_v49 }
 0x157   :  { %2188 = vmatpush1.bf16.msra.mxu0 %v12696_v50  ;;  %2274 = vmatpush1.bf16.msra.mxu1 %v12699_v51 }
 0x158   :  { %2189 = vmatprep.subr.bf16.mxu0 %v12704_v52  ;;  %2275 = vmatprep.subr.bf16.mxu1 %v12707_v53 }
 0x15b   :  { %2190 = vmatpush1.bf16.msra.mxu0 %v12702_v54  ;;  %2276 = vmatpush1.bf16.msra.mxu1 %v12705_v55 }
 0x15c   :  { %2191 = vmatprep.subr.bf16.mxu0 %v12710_v56  ;;  %2277 = vmatprep.subr.bf16.mxu1 %v12713_v58 }
 0x15f   :  { %2192 = vmatpush1.bf16.msra.mxu0 %v12708_v60  ;;  %2278 = vmatpush1.bf16.msra.mxu1 %v12711_v61 }
 0x160   :  { %2193 = vmatprep.subr.bf16.mxu0 %v12716_v62  ;;  %2279 = vmatprep.subr.bf16.mxu1 %v12719_v63 }
 0x163   :  { %2194 = vmatpush1.bf16.msra.mxu0 %v12714_v0  ;;  %2280 = vmatpush1.bf16.msra.mxu1 %v12717_v1 }
 0x164   :  { %2195 = vmatprep.subr.bf16.mxu0 %v12722_v2  ;;  %2281 = vmatprep.subr.bf16.mxu1 %v12725_v3 }
 0x167   :  { %2196 = vmatpush1.bf16.msra.mxu0 %v12720_v4  ;;  %2282 = vmatpush1.bf16.msra.mxu1 %v12723_v5 }
 0x168   :  { %2197 = vmatprep.subr.bf16.mxu0 %v12728_v6  ;;  %2283 = vmatprep.subr.bf16.mxu1 %v12731_v7 }
 0x16b   :  { %2198 = vmatpush1.bf16.msra.mxu0 %v12726_v8  ;;  %2284 = vmatpush1.bf16.msra.mxu1 %v12729_v9 }
 0x16c   :  { %2199 = vmatprep.subr.bf16.mxu0 %v12734_v10  ;;  %2285 = vmatprep.subr.bf16.mxu1 %v12737_v11 }
 0x16f   :  { %2200 = vmatpush1.bf16.msra.mxu0 %v12732_v12  ;;  %2286 = vmatpush1.bf16.msra.mxu1 %v12735_v13 }
 0x170   :  { %2201 = vmatprep.subr.bf16.mxu0 %v12740_v14  ;;  %2287 = vmatprep.subr.bf16.mxu1 %v12743_v15 }
 0x173   :  { %2202 = vmatpush1.bf16.msra.mxu0 %v12738_v16  ;;  %2288 = vmatpush1.bf16.msra.mxu1 %v12741_v17  ;;  %v12762_v17 = vld [vmem:[%s18189_s2 + $0x600] ss:$16 sps:$4 sm:$0xff]  }
 0x174   :  { %2203 = vmatprep.subr.bf16.mxu0 %v12746_v18  ;;  %2289 = vmatprep.subr.bf16.mxu1 %v12749_v19  ;;  %v12765_v18 = vld [vmem:[%s18189_s2 + $0x608] ss:$16 sps:$4 sm:$0xff]  }
 0x177   :  { %2204 = vmatpush1.bf16.msra.mxu0 %v12744_v20  ;;  %2290 = vmatpush1.bf16.msra.mxu1 %v12747_v21  ;;  %v12770_v20 = vld [vmem:[%s18189_s2 + $0x624] ss:$16 sps:$4 sm:$0xff]   ;;  %v12773_v21 = vld [vmem:[%s18189_s2 + $0x62c] ss:$16 sps:$4 sm:$0xff]  }
 0x178   :  { %2205 = vmatprep.subr.bf16.mxu0 %v12752_v22  ;;  %2291 = vmatprep.subr.bf16.mxu1 %v12755_v23  ;;  %v12768_v22 = vld [vmem:[%s18189_s2 + $0x620] ss:$16 sps:$4 sm:$0xff]   ;;  %v12771_v23 = vld [vmem:[%s18189_s2 + $0x628] ss:$16 sps:$4 sm:$0xff]  }
 0x17b   :  { %2206 = vmatpush1.bf16.msra.mxu0 %v12750_v24  ;;  %2292 = vmatpush1.bf16.msra.mxu1 %v12753_v25  ;;  %v12776_v24 = vld [vmem:[%s18189_s2 + $0x644] ss:$16 sps:$4 sm:$0xff]   ;;  %v12779_v25 = vld [vmem:[%s18189_s2 + $0x64c] ss:$16 sps:$4 sm:$0xff]  }
 0x17c   :  { %2207 = vmatprep.subr.bf16.mxu0 %v12758_v26  ;;  %2293 = vmatprep.subr.bf16.mxu1 %v12761_v27  ;;  %v12774_v26 = vld [vmem:[%s18189_s2 + $0x640] ss:$16 sps:$4 sm:$0xff]   ;;  %v12777_v27 = vld [vmem:[%s18189_s2 + $0x648] ss:$16 sps:$4 sm:$0xff]  }
 0x17f   :  { %2208 = vmatpush1.bf16.msra.mxu0 %v12756_v28  ;;  %2294 = vmatpush1.bf16.msra.mxu1 %v12759_v29  ;;  %v12782_v28 = vld [vmem:[%s18189_s2 + $0x664] ss:$16 sps:$4 sm:$0xff]   ;;  %v12785_v29 = vld [vmem:[%s18189_s2 + $0x66c] ss:$16 sps:$4 sm:$0xff]  }
 0x180   :  { %2220 = vmatprep.subr.bf16.mxu0 %v12764_v30  ;;  %2306 = vmatprep.subr.bf16.mxu1 %v12767_v31  ;;  %v12780_v30 = vld [vmem:[%s18189_s2 + $0x660] ss:$16 sps:$4 sm:$0xff]   ;;  %v12783_v31 = vld [vmem:[%s18189_s2 + $0x668] ss:$16 sps:$4 sm:$0xff]  }
 0x215   :  { %v1239_v42 = vpop.f32.mrb[4].mxu0  ;;  %v1325_v43 = vpop.f32.mrb[4].mxu1 }
 0x216   :  { %v1357_v46 = vmul.f32 %v1340_v34, %v1239_v42  ;;  %v1359_v47 = vmul.f32 %v1348_v35, %v1325_v43  ;;  %v1241_v48 = vpop.f32.mrb[5].mxu0  ;;  %v1327_v49 = vpop.f32.mrb[5].mxu1  ;;  %v12800_v42 = vld [vmem:[%s18189_s2 + $0x6c4] ss:$16 sps:$4 sm:$0xff]   ;;  %v12803_v43 = vld [vmem:[%s18189_s2 + $0x6cc] ss:$16 sps:$4 sm:$0xff]  }
 0x217   :  { %v1358_v50 = vmul.f32 %v1344_v36, %v1241_v48  ;;  %v1360_v51 = vmul.f32 %v1352_v37, %v1327_v49  ;;  %v1243_v52 = vpop.f32.mrb[6].mxu0  ;;  %v1329_v53 = vpop.f32.mrb[6].mxu1  ;;  %v12804_v48 = vld [vmem:[%s18189_s2 + $0x6e0] ss:$16 sps:$4 sm:$0xff]   ;;  %v12807_v49 = vld [vmem:[%s18189_s2 + $0x6e8] ss:$16 sps:$4 sm:$0xff]  }
 0x218   :  { %v1388_v54 = vadd.f32 %v1371_v39, %v1357_v46  ;;  %v1390_v55 = vadd.f32 %v1379_v41, %v1359_v47  ;;  %v1361_v56 = vmul.f32 %v1340_v34, %v1243_v52  ;;  %v1363_v58 = vmul.f32 %v1348_v35, %v1329_v53  ;;  %v1245_v60 = vpop.f32.mrb[7].mxu0  ;;  %v1331_v61 = vpop.f32.mrb[7].mxu1  ;;  %v12786_v34 = vld [vmem:[%s18189_s2 + $0x680] ss:$16 sps:$4 sm:$0xff]   ;;  %v12789_v35 = vld [vmem:[%s18189_s2 + $0x688] ss:$16 sps:$4 sm:$0xff]  }
 0x219   :  { %v1389_v62 = vadd.f32 %v1375_v44, %v1358_v50  ;;  %v1391_v63 = vadd.f32 %v1383_v45, %v1360_v51  ;;  %v1362_v0 = vmul.f32 %v1344_v36, %v1245_v60  ;;  %v1364_v1 = vmul.f32 %v1352_v37, %v1331_v61  ;;  %v12794_v36 = vld [vmem:[%s18189_s2 + $0x6a4] ss:$16 sps:$4 sm:$0xff]   ;;  %v12797_v37 = vld [vmem:[%s18189_s2 + $0x6ac] ss:$16 sps:$4 sm:$0xff]   ;;  %v12810_v52 = vld [vmem:[%s18189_s2 + $0x700] ss:$16 sps:$4 sm:$0xff]  }
 0x21a   :  { %v1392_v2 = vadd.f32 %v1371_v39, %v1361_v56  ;;  %v1394_v3 = vadd.f32 %v1379_v41, %v1363_v58  ;;  %v1396_v6 = vmax.f32 %v1388_v54, 0.0  ;;  %v1398_v7 = vmax.f32 %v1390_v55, 0.0  ;;  %v12792_v39 = vld [vmem:[%s18189_s2 + $0x6a0] ss:$16 sps:$4 sm:$0xff]   ;;  %v12795_v41 = vld [vmem:[%s18189_s2 + $0x6a8] ss:$16 sps:$4 sm:$0xff]  }
 0x21b   :  { %v1393_v4 = vadd.f32 %v1375_v44, %v1362_v0  ;;  %v1395_v5 = vadd.f32 %v1383_v45, %v1364_v1  ;;  %v1397_v10 = vmax.f32 %v1389_v62, 0.0  ;;  %v1399_v11 = vmax.f32 %v1391_v63, 0.0  ;;  %v12798_v44 = vld [vmem:[%s18189_s2 + $0x6c0] ss:$16 sps:$4 sm:$0xff]   ;;  %v12801_v45 = vld [vmem:[%s18189_s2 + $0x6c8] ss:$16 sps:$4 sm:$0xff]  }
 0x21c   :  { %v1400_v8 = vmax.f32 %v1392_v2, 0.0  ;;  %v1402_v9 = vmax.f32 %v1394_v3, 0.0  ;;  %v12806_v46 = vld [vmem:[%s18189_s2 + $0x6e4] ss:$16 sps:$4 sm:$0xff]   ;;  %v12809_v47 = vld [vmem:[%s18189_s2 + $0x6ec] ss:$16 sps:$4 sm:$0xff]  }
 0x21d   :  { %v1401_v12 = vmax.f32 %v1393_v4, 0.0  ;;  %v1403_v13 = vmax.f32 %v1395_v5, 0.0  ;;  %v12812_v50 = vld [vmem:[%s18189_s2 + $0x704] ss:$16 sps:$4 sm:$0xff]   ;;  %v12815_v51 = vld [vmem:[%s18189_s2 + $0x70c] ss:$16 sps:$4 sm:$0xff]  }
 0x21e   :  { %v1404_v14 = vpack.c.bf16 %v1400_v8, %v1396_v6  ;;  %v15025_v15 = vpack.c.bf16 %v1402_v9, %v1398_v7  ;;  %v12813_v53 = vld [vmem:[%s18189_s2 + $0x708] ss:$16 sps:$4 sm:$0xff]   ;;  %v12818_v54 = vld [vmem:[%s18189_s2 + $0x724] ss:$16 sps:$4 sm:$0xff]   ;;  %v12821_v55 = vld [vmem:[%s18189_s2 + $0x72c] ss:$16 sps:$4 sm:$0xff]  }
 0x21f   :  { %v1405_v16 = vpack.c.bf16 %v1401_v12, %v1397_v10  ;;  %v1407_v19 = vpack.c.bf16 %v1403_v13, %v1399_v11  ;;  %v12816_v56 = vld [vmem:[%s18189_s2 + $0x720] ss:$16 sps:$4 sm:$0xff]   ;;  %v12819_v58 = vld [vmem:[%s18189_s2 + $0x728] ss:$16 sps:$4 sm:$0xff]   ;;  %v12824_v60 = vld [vmem:[%s18189_s2 + $0x744] ss:$16 sps:$4 sm:$0xff]  }
 0x220   :  { %v12827_v61 = vld [vmem:[%s18189_s2 + $0x74c] ss:$16 sps:$4 sm:$0xff]   ;;  %v12822_v62 = vld [vmem:[%s18189_s2 + $0x740] ss:$16 sps:$4 sm:$0xff]   ;;  %v12825_v63 = vld [vmem:[%s18189_s2 + $0x748] ss:$16 sps:$4 sm:$0xff]  }
 0x221   :  { %2209 = vmatprep.mubr.bf16.mxu0 %v1405_v16  ;;  %2295 = vmatprep.mubr.bf16.mxu1 %v1405_v16  ;;  %v12830_v0 = vld [vmem:[%s18189_s2 + $0x764] ss:$16 sps:$4 sm:$0xff]   ;;  %v12833_v1 = vld [vmem:[%s18189_s2 + $0x76c] ss:$16 sps:$4 sm:$0xff]   ;;  %v12828_v2 = vld [vmem:[%s18189_s2 + $0x760] ss:$16 sps:$4 sm:$0xff]  }
 0x222   :  { %2210 = vmatmul.mubr.bf16.vlgmr.msra.gmra.mrb[8].mxu0 %v1404_v14  ;;  %2296 = vmatmul.mubr.bf16.vlgmr.msra.gmra.mrb[8].mxu1 %v1404_v14  ;;  %v12831_v3 = vld [vmem:[%s18189_s2 + $0x768] ss:$16 sps:$4 sm:$0xff]   ;;  %v12836_v4 = vld [vmem:[%s18189_s2 + $0x784] ss:$16 sps:$4 sm:$0xff]   ;;  %v12839_v5 = vld [vmem:[%s18189_s2 + $0x78c] ss:$16 sps:$4 sm:$0xff]  }
 0x223   :  { %2221 = vmatpush1.bf16.msra.mxu0 %v12762_v17  ;;  %2307 = vmatpush1.bf16.msra.mxu1 %v12765_v18  ;;  %v12834_v6 = vld [vmem:[%s18189_s2 + $0x780] ss:$16 sps:$4 sm:$0xff]   ;;  %v12837_v7 = vld [vmem:[%s18189_s2 + $0x788] ss:$16 sps:$4 sm:$0xff]   ;;  %v12842_v8 = vld [vmem:[%s18189_s2 + $0x7a4] ss:$16 sps:$4 sm:$0xff]  }
 0x224   :  { %2252 = vmatprep.mubr.bf16.mxu0 %v1407_v19  ;;  %2338 = vmatprep.mubr.bf16.mxu1 %v1407_v19  ;;  %v12845_v9 = vld [vmem:[%s18189_s2 + $0x7ac] ss:$16 sps:$4 sm:$0xff]   ;;  %v12840_v10 = vld [vmem:[%s18189_s2 + $0x7a0] ss:$16 sps:$4 sm:$0xff]   ;;  %v12843_v11 = vld [vmem:[%s18189_s2 + $0x7a8] ss:$16 sps:$4 sm:$0xff]  }
 0x225   :  { %2222 = vmatprep.subr.bf16.mxu0 %v12770_v20  ;;  %2308 = vmatprep.subr.bf16.mxu1 %v12773_v21  ;;  %v12848_v12 = vld [vmem:[%s18189_s2 + $0x7c4] ss:$16 sps:$4 sm:$0xff]   ;;  %v12851_v13 = vld [vmem:[%s18189_s2 + $0x7cc] ss:$16 sps:$4 sm:$0xff]   ;;  %v12846_v14 = vld [vmem:[%s18189_s2 + $0x7c0] ss:$16 sps:$4 sm:$0xff]  }
 0x226   :  { %v12849_v16 = vld [vmem:[%s18189_s2 + $0x7c8] ss:$16 sps:$4 sm:$0xff]   ;;  %v12854_v17 = vld [vmem:[%s18189_s2 + $0x7e4] ss:$16 sps:$4 sm:$0xff]   ;;  %v12857_v18 = vld [vmem:[%s18189_s2 + $0x7ec] ss:$16 sps:$4 sm:$0xff]  }
 0x227   :  { %2223 = vmatpush1.bf16.msra.mxu0 %v12768_v22  ;;  %2309 = vmatpush1.bf16.msra.mxu1 %v12771_v23  ;;  %v12852_v19 = vld [vmem:[%s18189_s2 + $0x7e0] ss:$16 sps:$4 sm:$0xff]   ;;  %v12855_v20 = vld [vmem:[%s18189_s2 + $0x7e8] ss:$16 sps:$4 sm:$0xff]   ;;  %v12860_v21 = vld [vmem:[%s18189_s2 + $0x804] ss:$16 sps:$4 sm:$0xff]  }
 0x228   :  { %2224 = vmatprep.subr.bf16.mxu0 %v12776_v24  ;;  %2310 = vmatprep.subr.bf16.mxu1 %v12779_v25  ;;  %v12863_v22 = vld [vmem:[%s18189_s2 + $0x80c] ss:$16 sps:$4 sm:$0xff]   ;;  %v12858_v23 = vld [vmem:[%s18189_s2 + $0x800] ss:$16 sps:$4 sm:$0xff]   ;;  %v12861_v24 = vld [vmem:[%s18189_s2 + $0x808] ss:$16 sps:$4 sm:$0xff]  }
 0x229   :  { %v12866_v25 = vld [vmem:[%s18189_s2 + $0x824] ss:$16 sps:$4 sm:$0xff]  }
 0x22b   :  { %2225 = vmatpush1.bf16.msra.mxu0 %v12774_v26  ;;  %2311 = vmatpush1.bf16.msra.mxu1 %v12777_v27  ;;  %v12869_v26 = vld [vmem:[%s18189_s2 + $0x82c] ss:$16 sps:$4 sm:$0xff]   ;;  %v12864_v27 = vld [vmem:[%s18189_s2 + $0x820] ss:$16 sps:$4 sm:$0xff]  }
 0x22c   :  { %2226 = vmatprep.subr.bf16.mxu0 %v12782_v28  ;;  %2312 = vmatprep.subr.bf16.mxu1 %v12785_v29  ;;  %v12867_v28 = vld [vmem:[%s18189_s2 + $0x828] ss:$16 sps:$4 sm:$0xff]   ;;  %v12872_v29 = vld [vmem:[%s18189_s2 + $0x844] ss:$16 sps:$4 sm:$0xff]  }
 0x22f   :  { %2227 = vmatpush1.bf16.msra.mxu0 %v12780_v30  ;;  %2313 = vmatpush1.bf16.msra.mxu1 %v12783_v31  ;;  %v12870_v30 = vld [vmem:[%s18189_s2 + $0x840] ss:$16 sps:$4 sm:$0xff]   ;;  %v12873_v31 = vld [vmem:[%s18189_s2 + $0x848] ss:$16 sps:$4 sm:$0xff]  }
 0x230   :  { %2228 = vmatprep.subr.bf16.mxu0 %v12788_v32  ;;  %2314 = vmatprep.subr.bf16.mxu1 %v12791_v33  ;;  %v12878_v32 = vld [vmem:[%s18189_s2 + $0x864] ss:$16 sps:$4 sm:$0xff]   ;;  %v12881_v33 = vld [vmem:[%s18189_s2 + $0x86c] ss:$16 sps:$4 sm:$0xff]  }
 0x233   :  { %2229 = vmatpush1.bf16.msra.mxu0 %v12786_v34  ;;  %2315 = vmatpush1.bf16.msra.mxu1 %v12789_v35  ;;  %v12876_v34 = vld [vmem:[%s18189_s2 + $0x860] ss:$16 sps:$4 sm:$0xff]   ;;  %v12879_v35 = vld [vmem:[%s18189_s2 + $0x868] ss:$16 sps:$4 sm:$0xff]  }
 0x234   :  { %2230 = vmatprep.subr.bf16.mxu0 %v12794_v36  ;;  %2316 = vmatprep.subr.bf16.mxu1 %v12797_v37  ;;  %v12884_v36 = vld [vmem:[%s18189_s2 + $0x884] ss:$16 sps:$4 sm:$0xff]   ;;  %v12887_v37 = vld [vmem:[%s18189_s2 + $0x88c] ss:$16 sps:$4 sm:$0xff]  }
 0x237   :  { %2231 = vmatpush1.bf16.msra.mxu0 %v12792_v39  ;;  %2317 = vmatpush1.bf16.msra.mxu1 %v12795_v41  ;;  %v12882_v39 = vld [vmem:[%s18189_s2 + $0x880] ss:$16 sps:$4 sm:$0xff]   ;;  %v12885_v41 = vld [vmem:[%s18189_s2 + $0x888] ss:$16 sps:$4 sm:$0xff]  }
 0x238   :  { %2232 = vmatprep.subr.bf16.mxu0 %v12800_v42  ;;  %2318 = vmatprep.subr.bf16.mxu1 %v12803_v43  ;;  %v12890_v42 = vld [vmem:[%s18189_s2 + $0x8a4] ss:$16 sps:$4 sm:$0xff]   ;;  %v12893_v43 = vld [vmem:[%s18189_s2 + $0x8ac] ss:$16 sps:$4 sm:$0xff]  }
 0x23b   :  { %2233 = vmatpush1.bf16.msra.mxu0 %v12798_v44  ;;  %2319 = vmatpush1.bf16.msra.mxu1 %v12801_v45  ;;  %v12888_v44 = vld [vmem:[%s18189_s2 + $0x8a0] ss:$16 sps:$4 sm:$0xff]   ;;  %v12891_v45 = vld [vmem:[%s18189_s2 + $0x8a8] ss:$16 sps:$4 sm:$0xff]  }
 0x23c   :  { %2234 = vmatprep.subr.bf16.mxu0 %v12806_v46  ;;  %2320 = vmatprep.subr.bf16.mxu1 %v12809_v47  ;;  %v12896_v46 = vld [vmem:[%s18189_s2 + $0x8c4] ss:$16 sps:$4 sm:$0xff]   ;;  %v12899_v47 = vld [vmem:[%s18189_s2 + $0x8cc] ss:$16 sps:$4 sm:$0xff]  }
 0x23f   :  { %2235 = vmatpush1.bf16.msra.mxu0 %v12804_v48  ;;  %2321 = vmatpush1.bf16.msra.mxu1 %v12807_v49  ;;  %v12894_v48 = vld [vmem:[%s18189_s2 + $0x8c0] ss:$16 sps:$4 sm:$0xff]   ;;  %v12897_v49 = vld [vmem:[%s18189_s2 + $0x8c8] ss:$16 sps:$4 sm:$0xff]  }
 0x240   :  { %2236 = vmatprep.subr.bf16.mxu0 %v12812_v50  ;;  %2322 = vmatprep.subr.bf16.mxu1 %v12815_v51  ;;  %v12902_v50 = vld [vmem:[%s18189_s2 + $0x8e4] ss:$16 sps:$4 sm:$0xff]   ;;  %v12905_v51 = vld [vmem:[%s18189_s2 + $0x8ec] ss:$16 sps:$4 sm:$0xff]  }
 0x243   :  { %2237 = vmatpush1.bf16.msra.mxu0 %v12810_v52  ;;  %2323 = vmatpush1.bf16.msra.mxu1 %v12813_v53  ;;  %v12900_v52 = vld [vmem:[%s18189_s2 + $0x8e0] ss:$16 sps:$4 sm:$0xff]   ;;  %v12903_v53 = vld [vmem:[%s18189_s2 + $0x8e8] ss:$16 sps:$4 sm:$0xff]  }
 0x244   :  { %2238 = vmatprep.subr.bf16.mxu0 %v12818_v54  ;;  %2324 = vmatprep.subr.bf16.mxu1 %v12821_v55  ;;  %v12908_v54 = vld [vmem:[%s18189_s2 + $0x904] ss:$16 sps:$4 sm:$0xff]   ;;  %v12911_v55 = vld [vmem:[%s18189_s2 + $0x90c] ss:$16 sps:$4 sm:$0xff]  }
 0x247   :  { %2239 = vmatpush1.bf16.msra.mxu0 %v12816_v56  ;;  %2325 = vmatpush1.bf16.msra.mxu1 %v12819_v58  ;;  %v12906_v56 = vld [vmem:[%s18189_s2 + $0x900] ss:$16 sps:$4 sm:$0xff]   ;;  %v12909_v58 = vld [vmem:[%s18189_s2 + $0x908] ss:$16 sps:$4 sm:$0xff]  }
 0x248   :  { %2240 = vmatprep.subr.bf16.mxu0 %v12824_v60  ;;  %2326 = vmatprep.subr.bf16.mxu1 %v12827_v61  ;;  %v12914_v60 = vld [vmem:[%s18189_s2 + $0x924] ss:$16 sps:$4 sm:$0xff]   ;;  %v12917_v61 = vld [vmem:[%s18189_s2 + $0x92c] ss:$16 sps:$4 sm:$0xff]  }
 0x24b   :  { %2241 = vmatpush1.bf16.msra.mxu0 %v12822_v62  ;;  %2327 = vmatpush1.bf16.msra.mxu1 %v12825_v63  ;;  %v12912_v62 = vld [vmem:[%s18189_s2 + $0x920] ss:$16 sps:$4 sm:$0xff]   ;;  %v12915_v63 = vld [vmem:[%s18189_s2 + $0x928] ss:$16 sps:$4 sm:$0xff]  }
 0x24c   :  { %2242 = vmatprep.subr.bf16.mxu0 %v12830_v0  ;;  %2328 = vmatprep.subr.bf16.mxu1 %v12833_v1  ;;  %v12920_v0 = vld [vmem:[%s18189_s2 + $0x944] ss:$16 sps:$4 sm:$0xff]   ;;  %v12923_v1 = vld [vmem:[%s18189_s2 + $0x94c] ss:$16 sps:$4 sm:$0xff]  }
 0x24f   :  { %2243 = vmatpush1.bf16.msra.mxu0 %v12828_v2  ;;  %2329 = vmatpush1.bf16.msra.mxu1 %v12831_v3  ;;  %v12918_v2 = vld [vmem:[%s18189_s2 + $0x940] ss:$16 sps:$4 sm:$0xff]   ;;  %v12921_v3 = vld [vmem:[%s18189_s2 + $0x948] ss:$16 sps:$4 sm:$0xff]  }
 0x250   :  { %2244 = vmatprep.subr.bf16.mxu0 %v12836_v4  ;;  %2330 = vmatprep.subr.bf16.mxu1 %v12839_v5  ;;  %v12926_v4 = vld [vmem:[%s18189_s2 + $0x964] ss:$16 sps:$4 sm:$0xff]   ;;  %v12929_v5 = vld [vmem:[%s18189_s2 + $0x96c] ss:$16 sps:$4 sm:$0xff]  }
 0x253   :  { %2245 = vmatpush1.bf16.msra.mxu0 %v12834_v6  ;;  %2331 = vmatpush1.bf16.msra.mxu1 %v12837_v7  ;;  %v12924_v6 = vld [vmem:[%s18189_s2 + $0x960] ss:$16 sps:$4 sm:$0xff]   ;;  %v12927_v7 = vld [vmem:[%s18189_s2 + $0x968] ss:$16 sps:$4 sm:$0xff]  }
 0x254   :  { %2246 = vmatprep.subr.bf16.mxu0 %v12842_v8  ;;  %2332 = vmatprep.subr.bf16.mxu1 %v12845_v9  ;;  %v12932_v8 = vld [vmem:[%s18189_s2 + $0x984] ss:$16 sps:$4 sm:$0xff]   ;;  %v12935_v9 = vld [vmem:[%s18189_s2 + $0x98c] ss:$16 sps:$4 sm:$0xff]  }
 0x257   :  { %2247 = vmatpush1.bf16.msra.mxu0 %v12840_v10  ;;  %2333 = vmatpush1.bf16.msra.mxu1 %v12843_v11  ;;  %v12930_v10 = vld [vmem:[%s18189_s2 + $0x980] ss:$16 sps:$4 sm:$0xff]   ;;  %v12933_v11 = vld [vmem:[%s18189_s2 + $0x988] ss:$16 sps:$4 sm:$0xff]  }
 0x258   :  { %2248 = vmatprep.subr.bf16.mxu0 %v12848_v12  ;;  %2334 = vmatprep.subr.bf16.mxu1 %v12851_v13  ;;  %v12938_v12 = vld [vmem:[%s18189_s2 + $0x9a4] ss:$16 sps:$4 sm:$0xff]   ;;  %v12941_v13 = vld [vmem:[%s18189_s2 + $0x9ac] ss:$16 sps:$4 sm:$0xff]  }
 0x25b   :  { %2249 = vmatpush1.bf16.msra.mxu0 %v12846_v14  ;;  %2335 = vmatpush1.bf16.msra.mxu1 %v12849_v16  ;;  %v12936_v14 = vld [vmem:[%s18189_s2 + $0x9a0] ss:$16 sps:$4 sm:$0xff]   ;;  %v12939_v16 = vld [vmem:[%s18189_s2 + $0x9a8] ss:$16 sps:$4 sm:$0xff]  }
 0x25c   :  { %2250 = vmatprep.subr.bf16.mxu0 %v12854_v17  ;;  %2336 = vmatprep.subr.bf16.mxu1 %v12857_v18  ;;  %v12944_v17 = vld [vmem:[%s18189_s2 + $0x9c4] ss:$16 sps:$4 sm:$0xff]   ;;  %v12947_v18 = vld [vmem:[%s18189_s2 + $0x9cc] ss:$16 sps:$4 sm:$0xff]  }
 0x25f   :  { %2251 = vmatpush1.bf16.msra.mxu0 %v12852_v19  ;;  %2337 = vmatpush1.bf16.msra.mxu1 %v12855_v20  ;;  %v12942_v19 = vld [vmem:[%s18189_s2 + $0x9c0] ss:$16 sps:$4 sm:$0xff]   ;;  %v12945_v20 = vld [vmem:[%s18189_s2 + $0x9c8] ss:$16 sps:$4 sm:$0xff]  }
 0x260   :  { %3192 = vmatprep.subr.bf16.mxu0 %v12860_v21  ;;  %3278 = vmatprep.subr.bf16.mxu1 %v12863_v22  ;;  %v12950_v21 = vld [vmem:[%s18189_s2 + $0x9e4] ss:$16 sps:$4 sm:$0xff]   ;;  %v12953_v22 = vld [vmem:[%s18189_s2 + $0x9ec] ss:$16 sps:$4 sm:$0xff]  }
 0x262   :  { %2253 = vmatmul.mubr.bf16.vlgmr.msra.gmra.mrb[8].mxu0 %v15025_v15  ;;  %2339 = vmatmul.mubr.bf16.vlgmr.msra.gmra.mrb[8].mxu1 %v15025_v15  ;;  %v12875_v15 = vld [vmem:[%s18189_s2 + $0x84c] ss:$16 sps:$4 sm:$0xff]  }
 0x263   :  { %3193 = vmatpush1.bf16.msra.mxu0 %v12858_v23  ;;  %3279 = vmatpush1.bf16.msra.mxu1 %v12861_v24  ;;  %v12948_v23 = vld [vmem:[%s18189_s2 + $0x9e0] ss:$16 sps:$4 sm:$0xff]   ;;  %v12951_v24 = vld [vmem:[%s18189_s2 + $0x9e8] ss:$16 sps:$4 sm:$0xff]  }
 0x264   :  { %3194 = vmatprep.subr.bf16.mxu0 %v12866_v25  ;;  %3280 = vmatprep.subr.bf16.mxu1 %v12869_v26  ;;  %v12956_v25 = vld [vmem:[%s18189_s2 + $0xa04] ss:$16 sps:$4 sm:$0xff]   ;;  %v12959_v26 = vld [vmem:[%s18189_s2 + $0xa0c] ss:$16 sps:$4 sm:$0xff]  }
 0x267   :  { %3195 = vmatpush1.bf16.msra.mxu0 %v12864_v27  ;;  %3281 = vmatpush1.bf16.msra.mxu1 %v12867_v28  ;;  %v10426_v27 = vld [vmem:[%s18190_s5 + $0x8] sm:$0xf] }
 0x268   :  { %3196 = vmatprep.subr.bf16.mxu0 %v12872_v29  ;;  %3282 = vmatprep.subr.bf16.mxu1 %v12875_v15  ;;  %v10427_v28 = vld [vmem:[%s18191_s6 + $0x8] sm:$0xf]  ;;  %v2355_v29 = vrot.slane %v10426_v27, %v14601_v38  ;;  %v2363_v15 = vrot.slane %v10426_v27, %v14615_v57 }
 0x26b   :  { %3197 = vmatpush1.bf16.msra.mxu0 %v12870_v30  ;;  %3283 = vmatpush1.bf16.msra.mxu1 %v12873_v31  ;;  %v2359_v30 = vrot.slane %v10426_v27, %v14606_v40  ;;  %v2367_v31 = vrot.slane %v10426_v27, %v14617_v59  ;;  %v12980_v27 = vld [vmem:[%s18189_s2 + $0xa84] ss:$16 sps:$4 sm:$0xff]  }
 0x26c   :  { %3198 = vmatprep.subr.bf16.mxu0 %v12878_v32  ;;  %3284 = vmatprep.subr.bf16.mxu1 %v12881_v33  ;;  %v2386_v32 = vrot.slane %v10427_v28, %v14601_v38  ;;  %v2394_v33 = vrot.slane %v10427_v28, %v14615_v57 }
 0x26f   :  { %3199 = vmatpush1.bf16.msra.mxu0 %v12876_v34  ;;  %3285 = vmatpush1.bf16.msra.mxu1 %v12879_v35 }
 0x270   :  { %3200 = vmatprep.subr.bf16.mxu0 %v12884_v36  ;;  %3286 = vmatprep.subr.bf16.mxu1 %v12887_v37  ;;  %v2390_v36 = vrot.slane %v10427_v28, %v14606_v40  ;;  %v2398_v37 = vrot.slane %v10427_v28, %v14617_v59  ;;  %v12983_v28 = vld [vmem:[%s18189_s2 + $0xa8c] ss:$16 sps:$4 sm:$0xff]  }
 0x273   :  { %3201 = vmatpush1.bf16.msra.mxu0 %v12882_v39  ;;  %3287 = vmatpush1.bf16.msra.mxu1 %v12885_v41 }
 0x274   :  { %3202 = vmatprep.subr.bf16.mxu0 %v12890_v42  ;;  %3288 = vmatprep.subr.bf16.mxu1 %v12893_v43 }
 0x277   :  { %3203 = vmatpush1.bf16.msra.mxu0 %v12888_v44  ;;  %3289 = vmatpush1.bf16.msra.mxu1 %v12891_v45 }
 0x278   :  { %3204 = vmatprep.subr.bf16.mxu0 %v12896_v46  ;;  %3290 = vmatprep.subr.bf16.mxu1 %v12899_v47 }
 0x27b   :  { %3205 = vmatpush1.bf16.msra.mxu0 %v12894_v48  ;;  %3291 = vmatpush1.bf16.msra.mxu1 %v12897_v49 }
 0x27c   :  { %3206 = vmatprep.subr.bf16.mxu0 %v12902_v50  ;;  %3292 = vmatprep.subr.bf16.mxu1 %v12905_v51 }
 0x27f   :  { %3207 = vmatpush1.bf16.msra.mxu0 %v12900_v52  ;;  %3293 = vmatpush1.bf16.msra.mxu1 %v12903_v53 }
 0x280   :  { %3208 = vmatprep.subr.bf16.mxu0 %v12908_v54  ;;  %3294 = vmatprep.subr.bf16.mxu1 %v12911_v55 }
 0x283   :  { %3209 = vmatpush1.bf16.msra.mxu0 %v12906_v56  ;;  %3295 = vmatpush1.bf16.msra.mxu1 %v12909_v58 }
 0x284   :  { %3210 = vmatprep.subr.bf16.mxu0 %v12914_v60  ;;  %3296 = vmatprep.subr.bf16.mxu1 %v12917_v61 }
 0x287   :  { %3211 = vmatpush1.bf16.msra.mxu0 %v12912_v62  ;;  %3297 = vmatpush1.bf16.msra.mxu1 %v12915_v63 }
 0x288   :  { %3212 = vmatprep.subr.bf16.mxu0 %v12920_v0  ;;  %3298 = vmatprep.subr.bf16.mxu1 %v12923_v1 }
 0x28b   :  { %3213 = vmatpush1.bf16.msra.mxu0 %v12918_v2  ;;  %3299 = vmatpush1.bf16.msra.mxu1 %v12921_v3 }
 0x28c   :  { %3214 = vmatprep.subr.bf16.mxu0 %v12926_v4  ;;  %3300 = vmatprep.subr.bf16.mxu1 %v12929_v5 }
 0x28f   :  { %3215 = vmatpush1.bf16.msra.mxu0 %v12924_v6  ;;  %3301 = vmatpush1.bf16.msra.mxu1 %v12927_v7 }
 0x290   :  { %3216 = vmatprep.subr.bf16.mxu0 %v12932_v8  ;;  %3302 = vmatprep.subr.bf16.mxu1 %v12935_v9 }
 0x293   :  { %3217 = vmatpush1.bf16.msra.mxu0 %v12930_v10  ;;  %3303 = vmatpush1.bf16.msra.mxu1 %v12933_v11  ;;  %v12954_v11 = vld [vmem:[%s18189_s2 + $0xa00] ss:$16 sps:$4 sm:$0xff]  }
 0x294   :  { %3218 = vmatprep.subr.bf16.mxu0 %v12938_v12  ;;  %3304 = vmatprep.subr.bf16.mxu1 %v12941_v13  ;;  %v12957_v12 = vld [vmem:[%s18189_s2 + $0xa08] ss:$16 sps:$4 sm:$0xff]  }
 0x297   :  { %3219 = vmatpush1.bf16.msra.mxu0 %v12936_v14  ;;  %3305 = vmatpush1.bf16.msra.mxu1 %v12939_v16  ;;  %v12962_v14 = vld [vmem:[%s18189_s2 + $0xa24] ss:$16 sps:$4 sm:$0xff]   ;;  %v12965_v16 = vld [vmem:[%s18189_s2 + $0xa2c] ss:$16 sps:$4 sm:$0xff]  }
 0x298   :  { %3220 = vmatprep.subr.bf16.mxu0 %v12944_v17  ;;  %3306 = vmatprep.subr.bf16.mxu1 %v12947_v18  ;;  %v12960_v17 = vld [vmem:[%s18189_s2 + $0xa20] ss:$16 sps:$4 sm:$0xff]   ;;  %v12963_v18 = vld [vmem:[%s18189_s2 + $0xa28] ss:$16 sps:$4 sm:$0xff]  }
 0x29b   :  { %3221 = vmatpush1.bf16.msra.mxu0 %v12942_v19  ;;  %3307 = vmatpush1.bf16.msra.mxu1 %v12945_v20  ;;  %v12968_v19 = vld [vmem:[%s18189_s2 + $0xa44] ss:$16 sps:$4 sm:$0xff]   ;;  %v12971_v20 = vld [vmem:[%s18189_s2 + $0xa4c] ss:$16 sps:$4 sm:$0xff]  }
 0x29c   :  { %3222 = vmatprep.subr.bf16.mxu0 %v12950_v21  ;;  %3308 = vmatprep.subr.bf16.mxu1 %v12953_v22  ;;  %v12966_v21 = vld [vmem:[%s18189_s2 + $0xa40] ss:$16 sps:$4 sm:$0xff]   ;;  %v12969_v22 = vld [vmem:[%s18189_s2 + $0xa48] ss:$16 sps:$4 sm:$0xff]  }
 0x29f   :  { %3223 = vmatpush1.bf16.msra.mxu0 %v12948_v23  ;;  %3309 = vmatpush1.bf16.msra.mxu1 %v12951_v24  ;;  %v12974_v23 = vld [vmem:[%s18189_s2 + $0xa64] ss:$16 sps:$4 sm:$0xff]   ;;  %v12977_v24 = vld [vmem:[%s18189_s2 + $0xa6c] ss:$16 sps:$4 sm:$0xff]  }
 0x2a0   :  { %3235 = vmatprep.subr.bf16.mxu0 %v12956_v25  ;;  %3321 = vmatprep.subr.bf16.mxu1 %v12959_v26  ;;  %v12972_v25 = vld [vmem:[%s18189_s2 + $0xa60] ss:$16 sps:$4 sm:$0xff]   ;;  %v12975_v26 = vld [vmem:[%s18189_s2 + $0xa68] ss:$16 sps:$4 sm:$0xff]  }
 0x335   :  { %v2254_v34 = vpop.f32.mrb[8].mxu0  ;;  %v2340_v35 = vpop.f32.mrb[8].mxu1 }
 0x336   :  { %v2372_v39 = vmul.f32 %v2355_v29, %v2254_v34  ;;  %v2374_v41 = vmul.f32 %v2363_v15, %v2340_v35  ;;  %v2256_v42 = vpop.f32.mrb[9].mxu0  ;;  %v2342_v43 = vpop.f32.mrb[9].mxu1  ;;  %v12992_v34 = vld [vmem:[%s18189_s2 + $0xac4] ss:$16 sps:$4 sm:$0xff]   ;;  %v12995_v35 = vld [vmem:[%s18189_s2 + $0xacc] ss:$16 sps:$4 sm:$0xff]  }
 0x337   :  { %v2373_v44 = vmul.f32 %v2359_v30, %v2256_v42  ;;  %v2375_v45 = vmul.f32 %v2367_v31, %v2342_v43  ;;  %v2258_v46 = vpop.f32.mrb[10].mxu0  ;;  %v2344_v47 = vpop.f32.mrb[10].mxu1  ;;  %v12996_v42 = vld [vmem:[%s18189_s2 + $0xae0] ss:$16 sps:$4 sm:$0xff]   ;;  %v12999_v43 = vld [vmem:[%s18189_s2 + $0xae8] ss:$16 sps:$4 sm:$0xff]  }
 0x338   :  { %v2403_v48 = vadd.f32 %v2386_v32, %v2372_v39  ;;  %v2405_v49 = vadd.f32 %v2394_v33, %v2374_v41  ;;  %v2376_v50 = vmul.f32 %v2355_v29, %v2258_v46  ;;  %v2378_v51 = vmul.f32 %v2363_v15, %v2344_v47  ;;  %v2260_v52 = vpop.f32.mrb[11].mxu0  ;;  %v2346_v53 = vpop.f32.mrb[11].mxu1  ;;  %v12978_v29 = vld [vmem:[%s18189_s2 + $0xa80] ss:$16 sps:$4 sm:$0xff]   ;;  %v12981_v15 = vld [vmem:[%s18189_s2 + $0xa88] ss:$16 sps:$4 sm:$0xff]  }
 0x339   :  { %v2404_v54 = vadd.f32 %v2390_v36, %v2373_v44  ;;  %v2406_v55 = vadd.f32 %v2398_v37, %v2375_v45  ;;  %v2377_v56 = vmul.f32 %v2359_v30, %v2260_v52  ;;  %v2379_v58 = vmul.f32 %v2367_v31, %v2346_v53  ;;  %v12986_v30 = vld [vmem:[%s18189_s2 + $0xaa4] ss:$16 sps:$4 sm:$0xff]   ;;  %v12989_v31 = vld [vmem:[%s18189_s2 + $0xaac] ss:$16 sps:$4 sm:$0xff]   ;;  %v13002_v46 = vld [vmem:[%s18189_s2 + $0xb00] ss:$16 sps:$4 sm:$0xff]  }
 0x33a   :  { %v2407_v60 = vadd.f32 %v2386_v32, %v2376_v50  ;;  %v2409_v61 = vadd.f32 %v2394_v33, %v2378_v51  ;;  %v2411_v0 = vmax.f32 %v2403_v48, 0.0  ;;  %v2413_v1 = vmax.f32 %v2405_v49, 0.0  ;;  %v12984_v32 = vld [vmem:[%s18189_s2 + $0xaa0] ss:$16 sps:$4 sm:$0xff]   ;;  %v12987_v33 = vld [vmem:[%s18189_s2 + $0xaa8] ss:$16 sps:$4 sm:$0xff]  }
 0x33b   :  { %v2408_v62 = vadd.f32 %v2390_v36, %v2377_v56  ;;  %v2410_v63 = vadd.f32 %v2398_v37, %v2379_v58  ;;  %v2412_v4 = vmax.f32 %v2404_v54, 0.0  ;;  %v2414_v5 = vmax.f32 %v2406_v55, 0.0  ;;  %v12990_v36 = vld [vmem:[%s18189_s2 + $0xac0] ss:$16 sps:$4 sm:$0xff]   ;;  %v12993_v37 = vld [vmem:[%s18189_s2 + $0xac8] ss:$16 sps:$4 sm:$0xff]  }
 0x33c   :  { %v2415_v2 = vmax.f32 %v2407_v60, 0.0  ;;  %v2417_v3 = vmax.f32 %v2409_v61, 0.0  ;;  %v12998_v39 = vld [vmem:[%s18189_s2 + $0xae4] ss:$16 sps:$4 sm:$0xff]   ;;  %v13001_v41 = vld [vmem:[%s18189_s2 + $0xaec] ss:$16 sps:$4 sm:$0xff]  }
 0x33d   :  { %v2416_v6 = vmax.f32 %v2408_v62, 0.0  ;;  %v2418_v7 = vmax.f32 %v2410_v63, 0.0  ;;  %v13004_v44 = vld [vmem:[%s18189_s2 + $0xb04] ss:$16 sps:$4 sm:$0xff]   ;;  %v13007_v45 = vld [vmem:[%s18189_s2 + $0xb0c] ss:$16 sps:$4 sm:$0xff]  }
 0x33e   :  { %v2419_v8 = vpack.c.bf16 %v2415_v2, %v2411_v0  ;;  %v15427_v9 = vpack.c.bf16 %v2417_v3, %v2413_v1  ;;  %v13005_v47 = vld [vmem:[%s18189_s2 + $0xb08] ss:$16 sps:$4 sm:$0xff]   ;;  %v13010_v48 = vld [vmem:[%s18189_s2 + $0xb24] ss:$16 sps:$4 sm:$0xff]   ;;  %v13013_v49 = vld [vmem:[%s18189_s2 + $0xb2c] ss:$16 sps:$4 sm:$0xff]  }
 0x33f   :  { %v2420_v10 = vpack.c.bf16 %v2416_v6, %v2412_v4  ;;  %v2422_v13 = vpack.c.bf16 %v2418_v7, %v2414_v5  ;;  %v13008_v50 = vld [vmem:[%s18189_s2 + $0xb20] ss:$16 sps:$4 sm:$0xff]   ;;  %v13011_v51 = vld [vmem:[%s18189_s2 + $0xb28] ss:$16 sps:$4 sm:$0xff]   ;;  %v13016_v52 = vld [vmem:[%s18189_s2 + $0xb44] ss:$16 sps:$4 sm:$0xff]  }
 0x340   :  { %v13019_v53 = vld [vmem:[%s18189_s2 + $0xb4c] ss:$16 sps:$4 sm:$0xff]   ;;  %v13014_v54 = vld [vmem:[%s18189_s2 + $0xb40] ss:$16 sps:$4 sm:$0xff]   ;;  %v13017_v55 = vld [vmem:[%s18189_s2 + $0xb48] ss:$16 sps:$4 sm:$0xff]  }
 0x341   :  { %3224 = vmatprep.mubr.bf16.mxu0 %v2420_v10  ;;  %3310 = vmatprep.mubr.bf16.mxu1 %v2420_v10  ;;  %v13022_v56 = vld [vmem:[%s18189_s2 + $0xb64] ss:$16 sps:$4 sm:$0xff]   ;;  %v13025_v58 = vld [vmem:[%s18189_s2 + $0xb6c] ss:$16 sps:$4 sm:$0xff]   ;;  %v13020_v60 = vld [vmem:[%s18189_s2 + $0xb60] ss:$16 sps:$4 sm:$0xff]  }
 0x342   :  { %3225 = vmatmul.mubr.bf16.vlgmr.msra.gmra.mrb[12].mxu0 %v2419_v8  ;;  %3311 = vmatmul.mubr.bf16.vlgmr.msra.gmra.mrb[12].mxu1 %v2419_v8  ;;  %v13023_v61 = vld [vmem:[%s18189_s2 + $0xb68] ss:$16 sps:$4 sm:$0xff]   ;;  %v13028_v62 = vld [vmem:[%s18189_s2 + $0xb84] ss:$16 sps:$4 sm:$0xff]   ;;  %v13031_v63 = vld [vmem:[%s18189_s2 + $0xb8c] ss:$16 sps:$4 sm:$0xff]  }
 0x343   :  { %3236 = vmatpush1.bf16.msra.mxu0 %v12954_v11  ;;  %3322 = vmatpush1.bf16.msra.mxu1 %v12957_v12  ;;  %v13026_v0 = vld [vmem:[%s18189_s2 + $0xb80] ss:$16 sps:$4 sm:$0xff]   ;;  %v13029_v1 = vld [vmem:[%s18189_s2 + $0xb88] ss:$16 sps:$4 sm:$0xff]   ;;  %v13034_v2 = vld [vmem:[%s18189_s2 + $0xba4] ss:$16 sps:$4 sm:$0xff]  }
 0x344   :  { %3267 = vmatprep.mubr.bf16.mxu0 %v2422_v13  ;;  %3353 = vmatprep.mubr.bf16.mxu1 %v2422_v13  ;;  %v13037_v3 = vld [vmem:[%s18189_s2 + $0xbac] ss:$16 sps:$4 sm:$0xff]   ;;  %v13032_v4 = vld [vmem:[%s18189_s2 + $0xba0] ss:$16 sps:$4 sm:$0xff]   ;;  %v13035_v5 = vld [vmem:[%s18189_s2 + $0xba8] ss:$16 sps:$4 sm:$0xff]  }
 0x345   :  { %3237 = vmatprep.subr.bf16.mxu0 %v12962_v14  ;;  %3323 = vmatprep.subr.bf16.mxu1 %v12965_v16  ;;  %v13040_v6 = vld [vmem:[%s18189_s2 + $0xbc4] ss:$16 sps:$4 sm:$0xff]   ;;  %v13043_v7 = vld [vmem:[%s18189_s2 + $0xbcc] ss:$16 sps:$4 sm:$0xff]   ;;  %v13038_v8 = vld [vmem:[%s18189_s2 + $0xbc0] ss:$16 sps:$4 sm:$0xff]  }
 0x346   :  { %v13041_v10 = vld [vmem:[%s18189_s2 + $0xbc8] ss:$16 sps:$4 sm:$0xff]   ;;  %v13046_v11 = vld [vmem:[%s18189_s2 + $0xbe4] ss:$16 sps:$4 sm:$0xff]   ;;  %v13049_v12 = vld [vmem:[%s18189_s2 + $0xbec] ss:$16 sps:$4 sm:$0xff]  }
 0x347   :  { %3238 = vmatpush1.bf16.msra.mxu0 %v12960_v17  ;;  %3324 = vmatpush1.bf16.msra.mxu1 %v12963_v18  ;;  %v13044_v13 = vld [vmem:[%s18189_s2 + $0xbe0] ss:$16 sps:$4 sm:$0xff]   ;;  %v13047_v14 = vld [vmem:[%s18189_s2 + $0xbe8] ss:$16 sps:$4 sm:$0xff]   ;;  %v13052_v16 = vld [vmem:[%s18189_s2 + $0xc04] ss:$16 sps:$4 sm:$0xff]  }
 0x348   :  { %3239 = vmatprep.subr.bf16.mxu0 %v12968_v19  ;;  %3325 = vmatprep.subr.bf16.mxu1 %v12971_v20  ;;  %v13055_v17 = vld [vmem:[%s18189_s2 + $0xc0c] ss:$16 sps:$4 sm:$0xff]   ;;  %v13050_v18 = vld [vmem:[%s18189_s2 + $0xc00] ss:$16 sps:$4 sm:$0xff]   ;;  %v13053_v19 = vld [vmem:[%s18189_s2 + $0xc08] ss:$16 sps:$4 sm:$0xff]  }
 0x349   :  { %v13058_v20 = vld [vmem:[%s18189_s2 + $0xc24] ss:$16 sps:$4 sm:$0xff]  }
 0x34b   :  { %3240 = vmatpush1.bf16.msra.mxu0 %v12966_v21  ;;  %3326 = vmatpush1.bf16.msra.mxu1 %v12969_v22  ;;  %v13061_v21 = vld [vmem:[%s18189_s2 + $0xc2c] ss:$16 sps:$4 sm:$0xff]   ;;  %v13056_v22 = vld [vmem:[%s18189_s2 + $0xc20] ss:$16 sps:$4 sm:$0xff]  }
 0x34c   :  { %3241 = vmatprep.subr.bf16.mxu0 %v12974_v23  ;;  %3327 = vmatprep.subr.bf16.mxu1 %v12977_v24  ;;  %v13059_v23 = vld [vmem:[%s18189_s2 + $0xc28] ss:$16 sps:$4 sm:$0xff]   ;;  %v13064_v24 = vld [vmem:[%s18189_s2 + $0xc44] ss:$16 sps:$4 sm:$0xff]  }
 0x34f   :  { %3242 = vmatpush1.bf16.msra.mxu0 %v12972_v25  ;;  %3328 = vmatpush1.bf16.msra.mxu1 %v12975_v26  ;;  %v13062_v25 = vld [vmem:[%s18189_s2 + $0xc40] ss:$16 sps:$4 sm:$0xff]   ;;  %v13065_v26 = vld [vmem:[%s18189_s2 + $0xc48] ss:$16 sps:$4 sm:$0xff]  }
 0x350   :  { %3243 = vmatprep.subr.bf16.mxu0 %v12980_v27  ;;  %3329 = vmatprep.subr.bf16.mxu1 %v12983_v28  ;;  %v13070_v27 = vld [vmem:[%s18189_s2 + $0xc64] ss:$16 sps:$4 sm:$0xff]   ;;  %v13073_v28 = vld [vmem:[%s18189_s2 + $0xc6c] ss:$16 sps:$4 sm:$0xff]  }
 0x353   :  { %3244 = vmatpush1.bf16.msra.mxu0 %v12978_v29  ;;  %3330 = vmatpush1.bf16.msra.mxu1 %v12981_v15  ;;  %v13068_v29 = vld [vmem:[%s18189_s2 + $0xc60] ss:$16 sps:$4 sm:$0xff]   ;;  %v13071_v15 = vld [vmem:[%s18189_s2 + $0xc68] ss:$16 sps:$4 sm:$0xff]  }
 0x354   :  { %3245 = vmatprep.subr.bf16.mxu0 %v12986_v30  ;;  %3331 = vmatprep.subr.bf16.mxu1 %v12989_v31  ;;  %v13076_v30 = vld [vmem:[%s18189_s2 + $0xc84] ss:$16 sps:$4 sm:$0xff]   ;;  %v13079_v31 = vld [vmem:[%s18189_s2 + $0xc8c] ss:$16 sps:$4 sm:$0xff]  }
 0x357   :  { %3246 = vmatpush1.bf16.msra.mxu0 %v12984_v32  ;;  %3332 = vmatpush1.bf16.msra.mxu1 %v12987_v33  ;;  %v13074_v32 = vld [vmem:[%s18189_s2 + $0xc80] ss:$16 sps:$4 sm:$0xff]   ;;  %v13077_v33 = vld [vmem:[%s18189_s2 + $0xc88] ss:$16 sps:$4 sm:$0xff]  }
 0x358   :  { %3247 = vmatprep.subr.bf16.mxu0 %v12992_v34  ;;  %3333 = vmatprep.subr.bf16.mxu1 %v12995_v35  ;;  %v13082_v34 = vld [vmem:[%s18189_s2 + $0xca4] ss:$16 sps:$4 sm:$0xff]   ;;  %v13085_v35 = vld [vmem:[%s18189_s2 + $0xcac] ss:$16 sps:$4 sm:$0xff]  }
 0x35b   :  { %3248 = vmatpush1.bf16.msra.mxu0 %v12990_v36  ;;  %3334 = vmatpush1.bf16.msra.mxu1 %v12993_v37  ;;  %v13080_v36 = vld [vmem:[%s18189_s2 + $0xca0] ss:$16 sps:$4 sm:$0xff]   ;;  %v13083_v37 = vld [vmem:[%s18189_s2 + $0xca8] ss:$16 sps:$4 sm:$0xff]  }
 0x35c   :  { %3249 = vmatprep.subr.bf16.mxu0 %v12998_v39  ;;  %3335 = vmatprep.subr.bf16.mxu1 %v13001_v41  ;;  %v13088_v39 = vld [vmem:[%s18189_s2 + $0xcc4] ss:$16 sps:$4 sm:$0xff]   ;;  %v13091_v41 = vld [vmem:[%s18189_s2 + $0xccc] ss:$16 sps:$4 sm:$0xff]  }
 0x35f   :  { %3250 = vmatpush1.bf16.msra.mxu0 %v12996_v42  ;;  %3336 = vmatpush1.bf16.msra.mxu1 %v12999_v43  ;;  %v13086_v42 = vld [vmem:[%s18189_s2 + $0xcc0] ss:$16 sps:$4 sm:$0xff]   ;;  %v13089_v43 = vld [vmem:[%s18189_s2 + $0xcc8] ss:$16 sps:$4 sm:$0xff]  }
 0x360   :  { %3251 = vmatprep.subr.bf16.mxu0 %v13004_v44  ;;  %3337 = vmatprep.subr.bf16.mxu1 %v13007_v45  ;;  %v13094_v44 = vld [vmem:[%s18189_s2 + $0xce4] ss:$16 sps:$4 sm:$0xff]   ;;  %v13097_v45 = vld [vmem:[%s18189_s2 + $0xcec] ss:$16 sps:$4 sm:$0xff]  }
 0x363   :  { %3252 = vmatpush1.bf16.msra.mxu0 %v13002_v46  ;;  %3338 = vmatpush1.bf16.msra.mxu1 %v13005_v47  ;;  %v13092_v46 = vld [vmem:[%s18189_s2 + $0xce0] ss:$16 sps:$4 sm:$0xff]   ;;  %v13095_v47 = vld [vmem:[%s18189_s2 + $0xce8] ss:$16 sps:$4 sm:$0xff]  }
 0x364   :  { %3253 = vmatprep.subr.bf16.mxu0 %v13010_v48  ;;  %3339 = vmatprep.subr.bf16.mxu1 %v13013_v49  ;;  %v13100_v48 = vld [vmem:[%s18189_s2 + $0xd04] ss:$16 sps:$4 sm:$0xff]   ;;  %v13103_v49 = vld [vmem:[%s18189_s2 + $0xd0c] ss:$16 sps:$4 sm:$0xff]  }
 0x367   :  { %3254 = vmatpush1.bf16.msra.mxu0 %v13008_v50  ;;  %3340 = vmatpush1.bf16.msra.mxu1 %v13011_v51  ;;  %v13098_v50 = vld [vmem:[%s18189_s2 + $0xd00] ss:$16 sps:$4 sm:$0xff]   ;;  %v13101_v51 = vld [vmem:[%s18189_s2 + $0xd08] ss:$16 sps:$4 sm:$0xff]  }
 0x368   :  { %3255 = vmatprep.subr.bf16.mxu0 %v13016_v52  ;;  %3341 = vmatprep.subr.bf16.mxu1 %v13019_v53  ;;  %v13106_v52 = vld [vmem:[%s18189_s2 + $0xd24] ss:$16 sps:$4 sm:$0xff]   ;;  %v13109_v53 = vld [vmem:[%s18189_s2 + $0xd2c] ss:$16 sps:$4 sm:$0xff]  }
 0x36b   :  { %3256 = vmatpush1.bf16.msra.mxu0 %v13014_v54  ;;  %3342 = vmatpush1.bf16.msra.mxu1 %v13017_v55  ;;  %v13104_v54 = vld [vmem:[%s18189_s2 + $0xd20] ss:$16 sps:$4 sm:$0xff]   ;;  %v13107_v55 = vld [vmem:[%s18189_s2 + $0xd28] ss:$16 sps:$4 sm:$0xff]  }
 0x36c   :  { %3257 = vmatprep.subr.bf16.mxu0 %v13022_v56  ;;  %3343 = vmatprep.subr.bf16.mxu1 %v13025_v58  ;;  %v13112_v56 = vld [vmem:[%s18189_s2 + $0xd44] ss:$16 sps:$4 sm:$0xff]   ;;  %v13115_v58 = vld [vmem:[%s18189_s2 + $0xd4c] ss:$16 sps:$4 sm:$0xff]  }
 0x36f   :  { %3258 = vmatpush1.bf16.msra.mxu0 %v13020_v60  ;;  %3344 = vmatpush1.bf16.msra.mxu1 %v13023_v61  ;;  %v13110_v60 = vld [vmem:[%s18189_s2 + $0xd40] ss:$16 sps:$4 sm:$0xff]   ;;  %v13113_v61 = vld [vmem:[%s18189_s2 + $0xd48] ss:$16 sps:$4 sm:$0xff]  }
 0x370   :  { %3259 = vmatprep.subr.bf16.mxu0 %v13028_v62  ;;  %3345 = vmatprep.subr.bf16.mxu1 %v13031_v63  ;;  %v13118_v62 = vld [vmem:[%s18189_s2 + $0xd64] ss:$16 sps:$4 sm:$0xff]   ;;  %v13121_v63 = vld [vmem:[%s18189_s2 + $0xd6c] ss:$16 sps:$4 sm:$0xff]  }
 0x373   :  { %3260 = vmatpush1.bf16.msra.mxu0 %v13026_v0  ;;  %3346 = vmatpush1.bf16.msra.mxu1 %v13029_v1  ;;  %v13116_v0 = vld [vmem:[%s18189_s2 + $0xd60] ss:$16 sps:$4 sm:$0xff]   ;;  %v13119_v1 = vld [vmem:[%s18189_s2 + $0xd68] ss:$16 sps:$4 sm:$0xff]  }
 0x374   :  { %3261 = vmatprep.subr.bf16.mxu0 %v13034_v2  ;;  %3347 = vmatprep.subr.bf16.mxu1 %v13037_v3  ;;  %v13124_v2 = vld [vmem:[%s18189_s2 + $0xd84] ss:$16 sps:$4 sm:$0xff]   ;;  %v13127_v3 = vld [vmem:[%s18189_s2 + $0xd8c] ss:$16 sps:$4 sm:$0xff]  }
 0x377   :  { %3262 = vmatpush1.bf16.msra.mxu0 %v13032_v4  ;;  %3348 = vmatpush1.bf16.msra.mxu1 %v13035_v5  ;;  %v13122_v4 = vld [vmem:[%s18189_s2 + $0xd80] ss:$16 sps:$4 sm:$0xff]   ;;  %v13125_v5 = vld [vmem:[%s18189_s2 + $0xd88] ss:$16 sps:$4 sm:$0xff]  }
 0x378   :  { %3263 = vmatprep.subr.bf16.mxu0 %v13040_v6  ;;  %3349 = vmatprep.subr.bf16.mxu1 %v13043_v7  ;;  %v13130_v6 = vld [vmem:[%s18189_s2 + $0xda4] ss:$16 sps:$4 sm:$0xff]   ;;  %v13133_v7 = vld [vmem:[%s18189_s2 + $0xdac] ss:$16 sps:$4 sm:$0xff]  }
 0x37b   :  { %3264 = vmatpush1.bf16.msra.mxu0 %v13038_v8  ;;  %3350 = vmatpush1.bf16.msra.mxu1 %v13041_v10  ;;  %v13128_v8 = vld [vmem:[%s18189_s2 + $0xda0] ss:$16 sps:$4 sm:$0xff]   ;;  %v13131_v10 = vld [vmem:[%s18189_s2 + $0xda8] ss:$16 sps:$4 sm:$0xff]  }
 0x37c   :  { %3265 = vmatprep.subr.bf16.mxu0 %v13046_v11  ;;  %3351 = vmatprep.subr.bf16.mxu1 %v13049_v12  ;;  %v13136_v11 = vld [vmem:[%s18189_s2 + $0xdc4] ss:$16 sps:$4 sm:$0xff]   ;;  %v13139_v12 = vld [vmem:[%s18189_s2 + $0xdcc] ss:$16 sps:$4 sm:$0xff]  }
 0x37f   :  { %3266 = vmatpush1.bf16.msra.mxu0 %v13044_v13  ;;  %3352 = vmatpush1.bf16.msra.mxu1 %v13047_v14  ;;  %v13134_v13 = vld [vmem:[%s18189_s2 + $0xdc0] ss:$16 sps:$4 sm:$0xff]   ;;  %v13137_v14 = vld [vmem:[%s18189_s2 + $0xdc8] ss:$16 sps:$4 sm:$0xff]  }
 0x380   :  { %4207 = vmatprep.subr.bf16.mxu0 %v13052_v16  ;;  %4293 = vmatprep.subr.bf16.mxu1 %v13055_v17  ;;  %v13142_v16 = vld [vmem:[%s18189_s2 + $0xde4] ss:$16 sps:$4 sm:$0xff]   ;;  %v13145_v17 = vld [vmem:[%s18189_s2 + $0xdec] ss:$16 sps:$4 sm:$0xff]  }
 0x382   :  { %3268 = vmatmul.mubr.bf16.vlgmr.msra.gmra.mrb[12].mxu0 %v15427_v9  ;;  %3354 = vmatmul.mubr.bf16.vlgmr.msra.gmra.mrb[12].mxu1 %v15427_v9  ;;  %v13067_v9 = vld [vmem:[%s18189_s2 + $0xc4c] ss:$16 sps:$4 sm:$0xff]  }
 0x383   :  { %4208 = vmatpush1.bf16.msra.mxu0 %v13050_v18  ;;  %4294 = vmatpush1.bf16.msra.mxu1 %v13053_v19  ;;  %v13140_v18 = vld [vmem:[%s18189_s2 + $0xde0] ss:$16 sps:$4 sm:$0xff]   ;;  %v13143_v19 = vld [vmem:[%s18189_s2 + $0xde8] ss:$16 sps:$4 sm:$0xff]  }
 0x384   :  { %4209 = vmatprep.subr.bf16.mxu0 %v13058_v20  ;;  %4295 = vmatprep.subr.bf16.mxu1 %v13061_v21  ;;  %v13148_v20 = vld [vmem:[%s18189_s2 + $0xe04] ss:$16 sps:$4 sm:$0xff]   ;;  %v13151_v21 = vld [vmem:[%s18189_s2 + $0xe0c] ss:$16 sps:$4 sm:$0xff]  }
 0x387   :  { %4210 = vmatpush1.bf16.msra.mxu0 %v13056_v22  ;;  %4296 = vmatpush1.bf16.msra.mxu1 %v13059_v23  ;;  %v10684_v22 = vld [vmem:[%s18190_s5 + $0xc] sm:$0xf] }
 0x388   :  { %4211 = vmatprep.subr.bf16.mxu0 %v13064_v24  ;;  %4297 = vmatprep.subr.bf16.mxu1 %v13067_v9  ;;  %v10685_v23 = vld [vmem:[%s18191_s6 + $0xc] sm:$0xf]  ;;  %v3370_v24 = vrot.slane %v10684_v22, %v14601_v38  ;;  %v3378_v9 = vrot.slane %v10684_v22, %v14615_v57 }
 0x38b   :  { %4212 = vmatpush1.bf16.msra.mxu0 %v13062_v25  ;;  %4298 = vmatpush1.bf16.msra.mxu1 %v13065_v26  ;;  %v3374_v25 = vrot.slane %v10684_v22, %v14606_v40  ;;  %v3382_v26 = vrot.slane %v10684_v22, %v14617_v59  ;;  %v13172_v22 = vld [vmem:[%s18189_s2 + $0xe84] ss:$16 sps:$4 sm:$0xff]  }
 0x38c   :  { %4213 = vmatprep.subr.bf16.mxu0 %v13070_v27  ;;  %4299 = vmatprep.subr.bf16.mxu1 %v13073_v28  ;;  %v3401_v27 = vrot.slane %v10685_v23, %v14601_v38  ;;  %v3409_v28 = vrot.slane %v10685_v23, %v14615_v57 }
 0x38f   :  { %4214 = vmatpush1.bf16.msra.mxu0 %v13068_v29  ;;  %4300 = vmatpush1.bf16.msra.mxu1 %v13071_v15 }
 0x390   :  { %4215 = vmatprep.subr.bf16.mxu0 %v13076_v30  ;;  %4301 = vmatprep.subr.bf16.mxu1 %v13079_v31  ;;  %v3405_v30 = vrot.slane %v10685_v23, %v14606_v40  ;;  %v3413_v31 = vrot.slane %v10685_v23, %v14617_v59  ;;  %v13175_v23 = vld [vmem:[%s18189_s2 + $0xe8c] ss:$16 sps:$4 sm:$0xff]  }
 0x393   :  { %4216 = vmatpush1.bf16.msra.mxu0 %v13074_v32  ;;  %4302 = vmatpush1.bf16.msra.mxu1 %v13077_v33 }
 0x394   :  { %4217 = vmatprep.subr.bf16.mxu0 %v13082_v34  ;;  %4303 = vmatprep.subr.bf16.mxu1 %v13085_v35 }
 0x397   :  { %4218 = vmatpush1.bf16.msra.mxu0 %v13080_v36  ;;  %4304 = vmatpush1.bf16.msra.mxu1 %v13083_v37 }
 0x398   :  { %4219 = vmatprep.subr.bf16.mxu0 %v13088_v39  ;;  %4305 = vmatprep.subr.bf16.mxu1 %v13091_v41 }
 0x39b   :  { %4220 = vmatpush1.bf16.msra.mxu0 %v13086_v42  ;;  %4306 = vmatpush1.bf16.msra.mxu1 %v13089_v43 }
 0x39c   :  { %4221 = vmatprep.subr.bf16.mxu0 %v13094_v44  ;;  %4307 = vmatprep.subr.bf16.mxu1 %v13097_v45 }
 0x39f   :  { %4222 = vmatpush1.bf16.msra.mxu0 %v13092_v46  ;;  %4308 = vmatpush1.bf16.msra.mxu1 %v13095_v47 }
 0x3a0   :  { %4223 = vmatprep.subr.bf16.mxu0 %v13100_v48  ;;  %4309 = vmatprep.subr.bf16.mxu1 %v13103_v49 }
 0x3a3   :  { %4224 = vmatpush1.bf16.msra.mxu0 %v13098_v50  ;;  %4310 = vmatpush1.bf16.msra.mxu1 %v13101_v51 }
 0x3a4   :  { %4225 = vmatprep.subr.bf16.mxu0 %v13106_v52  ;;  %4311 = vmatprep.subr.bf16.mxu1 %v13109_v53 }
 0x3a7   :  { %4226 = vmatpush1.bf16.msra.mxu0 %v13104_v54  ;;  %4312 = vmatpush1.bf16.msra.mxu1 %v13107_v55 }
 0x3a8   :  { %4227 = vmatprep.subr.bf16.mxu0 %v13112_v56  ;;  %4313 = vmatprep.subr.bf16.mxu1 %v13115_v58 }
 0x3ab   :  { %4228 = vmatpush1.bf16.msra.mxu0 %v13110_v60  ;;  %4314 = vmatpush1.bf16.msra.mxu1 %v13113_v61 }
 0x3ac   :  { %4229 = vmatprep.subr.bf16.mxu0 %v13118_v62  ;;  %4315 = vmatprep.subr.bf16.mxu1 %v13121_v63 }
 0x3af   :  { %4230 = vmatpush1.bf16.msra.mxu0 %v13116_v0  ;;  %4316 = vmatpush1.bf16.msra.mxu1 %v13119_v1 }
 0x3b0   :  { %4231 = vmatprep.subr.bf16.mxu0 %v13124_v2  ;;  %4317 = vmatprep.subr.bf16.mxu1 %v13127_v3 }
 0x3b3   :  { %4232 = vmatpush1.bf16.msra.mxu0 %v13122_v4  ;;  %4318 = vmatpush1.bf16.msra.mxu1 %v13125_v5  ;;  %v13146_v5 = vld [vmem:[%s18189_s2 + $0xe00] ss:$16 sps:$4 sm:$0xff]  }
 0x3b4   :  { %4233 = vmatprep.subr.bf16.mxu0 %v13130_v6  ;;  %4319 = vmatprep.subr.bf16.mxu1 %v13133_v7  ;;  %v13149_v6 = vld [vmem:[%s18189_s2 + $0xe08] ss:$16 sps:$4 sm:$0xff]  }
 0x3b7   :  { %4234 = vmatpush1.bf16.msra.mxu0 %v13128_v8  ;;  %4320 = vmatpush1.bf16.msra.mxu1 %v13131_v10  ;;  %v13154_v8 = vld [vmem:[%s18189_s2 + $0xe24] ss:$16 sps:$4 sm:$0xff]   ;;  %v13157_v10 = vld [vmem:[%s18189_s2 + $0xe2c] ss:$16 sps:$4 sm:$0xff]  }
 0x3b8   :  { %4235 = vmatprep.subr.bf16.mxu0 %v13136_v11  ;;  %4321 = vmatprep.subr.bf16.mxu1 %v13139_v12  ;;  %v13152_v11 = vld [vmem:[%s18189_s2 + $0xe20] ss:$16 sps:$4 sm:$0xff]   ;;  %v13155_v12 = vld [vmem:[%s18189_s2 + $0xe28] ss:$16 sps:$4 sm:$0xff]  }
 0x3bb   :  { %4236 = vmatpush1.bf16.msra.mxu0 %v13134_v13  ;;  %4322 = vmatpush1.bf16.msra.mxu1 %v13137_v14  ;;  %v13160_v13 = vld [vmem:[%s18189_s2 + $0xe44] ss:$16 sps:$4 sm:$0xff]   ;;  %v13163_v14 = vld [vmem:[%s18189_s2 + $0xe4c] ss:$16 sps:$4 sm:$0xff]  }
 0x3bc   :  { %4237 = vmatprep.subr.bf16.mxu0 %v13142_v16  ;;  %4323 = vmatprep.subr.bf16.mxu1 %v13145_v17  ;;  %v13158_v16 = vld [vmem:[%s18189_s2 + $0xe40] ss:$16 sps:$4 sm:$0xff]   ;;  %v13161_v17 = vld [vmem:[%s18189_s2 + $0xe48] ss:$16 sps:$4 sm:$0xff]  }
 0x3bf   :  { %4238 = vmatpush1.bf16.msra.mxu0 %v13140_v18  ;;  %4324 = vmatpush1.bf16.msra.mxu1 %v13143_v19  ;;  %v13166_v18 = vld [vmem:[%s18189_s2 + $0xe64] ss:$16 sps:$4 sm:$0xff]   ;;  %v13169_v19 = vld [vmem:[%s18189_s2 + $0xe6c] ss:$16 sps:$4 sm:$0xff]  }
 0x3c0   :  { %4250 = vmatprep.subr.bf16.mxu0 %v13148_v20  ;;  %4336 = vmatprep.subr.bf16.mxu1 %v13151_v21  ;;  %v13164_v20 = vld [vmem:[%s18189_s2 + $0xe60] ss:$16 sps:$4 sm:$0xff]   ;;  %v13167_v21 = vld [vmem:[%s18189_s2 + $0xe68] ss:$16 sps:$4 sm:$0xff]  }
 0x455   :  { %v3269_v29 = vpop.f32.mrb[12].mxu0  ;;  %v3355_v15 = vpop.f32.mrb[12].mxu1 }
 0x456   :  { %v3387_v32 = vmul.f32 %v3370_v24, %v3269_v29  ;;  %v3389_v33 = vmul.f32 %v3378_v9, %v3355_v15  ;;  %v3271_v34 = vpop.f32.mrb[13].mxu0  ;;  %v3357_v35 = vpop.f32.mrb[13].mxu1  ;;  %v13184_v29 = vld [vmem:[%s18189_s2 + $0xec4] ss:$16 sps:$4 sm:$0xff]   ;;  %v13187_v15 = vld [vmem:[%s18189_s2 + $0xecc] ss:$16 sps:$4 sm:$0xff]  }
 0x457   :  { %v3388_v36 = vmul.f32 %v3374_v25, %v3271_v34  ;;  %v3390_v37 = vmul.f32 %v3382_v26, %v3357_v35  ;;  %v3273_v39 = vpop.f32.mrb[14].mxu0  ;;  %v3359_v41 = vpop.f32.mrb[14].mxu1  ;;  %v13188_v34 = vld [vmem:[%s18189_s2 + $0xee0] ss:$16 sps:$4 sm:$0xff]   ;;  %v13191_v35 = vld [vmem:[%s18189_s2 + $0xee8] ss:$16 sps:$4 sm:$0xff]  }
 0x458   :  { %v3418_v42 = vadd.f32 %v3401_v27, %v3387_v32  ;;  %v3420_v43 = vadd.f32 %v3409_v28, %v3389_v33  ;;  %v3391_v44 = vmul.f32 %v3370_v24, %v3273_v39  ;;  %v3393_v45 = vmul.f32 %v3378_v9, %v3359_v41  ;;  %v3275_v46 = vpop.f32.mrb[15].mxu0  ;;  %v3361_v47 = vpop.f32.mrb[15].mxu1  ;;  %v13170_v24 = vld [vmem:[%s18189_s2 + $0xe80] ss:$16 sps:$4 sm:$0xff]   ;;  %v13173_v9 = vld [vmem:[%s18189_s2 + $0xe88] ss:$16 sps:$4 sm:$0xff]  }
 0x459   :  { %v3419_v48 = vadd.f32 %v3405_v30, %v3388_v36  ;;  %v3421_v49 = vadd.f32 %v3413_v31, %v3390_v37  ;;  %v3392_v50 = vmul.f32 %v3374_v25, %v3275_v46  ;;  %v3394_v51 = vmul.f32 %v3382_v26, %v3361_v47  ;;  %v13178_v25 = vld [vmem:[%s18189_s2 + $0xea4] ss:$16 sps:$4 sm:$0xff]   ;;  %v13181_v26 = vld [vmem:[%s18189_s2 + $0xeac] ss:$16 sps:$4 sm:$0xff]   ;;  %v13194_v39 = vld [vmem:[%s18189_s2 + $0xf00] ss:$16 sps:$4 sm:$0xff]  }
 0x45a   :  { %v3422_v52 = vadd.f32 %v3401_v27, %v3391_v44  ;;  %v3424_v53 = vadd.f32 %v3409_v28, %v3393_v45  ;;  %v3426_v56 = vmax.f32 %v3418_v42, 0.0  ;;  %v3428_v58 = vmax.f32 %v3420_v43, 0.0  ;;  %v13176_v27 = vld [vmem:[%s18189_s2 + $0xea0] ss:$16 sps:$4 sm:$0xff]   ;;  %v13179_v28 = vld [vmem:[%s18189_s2 + $0xea8] ss:$16 sps:$4 sm:$0xff]  }
 0x45b   :  { %v3423_v54 = vadd.f32 %v3405_v30, %v3392_v50  ;;  %v3425_v55 = vadd.f32 %v3413_v31, %v3394_v51  ;;  %v3427_v62 = vmax.f32 %v3419_v48, 0.0  ;;  %v3429_v63 = vmax.f32 %v3421_v49, 0.0  ;;  %v13182_v30 = vld [vmem:[%s18189_s2 + $0xec0] ss:$16 sps:$4 sm:$0xff]   ;;  %v13185_v31 = vld [vmem:[%s18189_s2 + $0xec8] ss:$16 sps:$4 sm:$0xff]  }
 0x45c   :  { %v3430_v60 = vmax.f32 %v3422_v52, 0.0  ;;  %v3432_v61 = vmax.f32 %v3424_v53, 0.0  ;;  %v13190_v32 = vld [vmem:[%s18189_s2 + $0xee4] ss:$16 sps:$4 sm:$0xff]   ;;  %v13193_v33 = vld [vmem:[%s18189_s2 + $0xeec] ss:$16 sps:$4 sm:$0xff]  }
 0x45d   :  { %v3431_v0 = vmax.f32 %v3423_v54, 0.0  ;;  %v3433_v1 = vmax.f32 %v3425_v55, 0.0  ;;  %v13196_v36 = vld [vmem:[%s18189_s2 + $0xf04] ss:$16 sps:$4 sm:$0xff]   ;;  %v13199_v37 = vld [vmem:[%s18189_s2 + $0xf0c] ss:$16 sps:$4 sm:$0xff]  }
 0x45e   :  { %v3434_v2 = vpack.c.bf16 %v3430_v60, %v3426_v56  ;;  %v15829_v3 = vpack.c.bf16 %v3432_v61, %v3428_v58  ;;  %v13197_v41 = vld [vmem:[%s18189_s2 + $0xf08] ss:$16 sps:$4 sm:$0xff]   ;;  %v13202_v42 = vld [vmem:[%s18189_s2 + $0xf24] ss:$16 sps:$4 sm:$0xff]   ;;  %v13205_v43 = vld [vmem:[%s18189_s2 + $0xf2c] ss:$16 sps:$4 sm:$0xff]  }
 0x45f   :  { %v3435_v4 = vpack.c.bf16 %v3431_v0, %v3427_v62  ;;  %v3437_v7 = vpack.c.bf16 %v3433_v1, %v3429_v63  ;;  %v13200_v44 = vld [vmem:[%s18189_s2 + $0xf20] ss:$16 sps:$4 sm:$0xff]   ;;  %v13203_v45 = vld [vmem:[%s18189_s2 + $0xf28] ss:$16 sps:$4 sm:$0xff]   ;;  %v13208_v46 = vld [vmem:[%s18189_s2 + $0xf44] ss:$16 sps:$4 sm:$0xff]  }
 0x460   :  { %v13211_v47 = vld [vmem:[%s18189_s2 + $0xf4c] ss:$16 sps:$4 sm:$0xff]   ;;  %v13206_v48 = vld [vmem:[%s18189_s2 + $0xf40] ss:$16 sps:$4 sm:$0xff]   ;;  %v13209_v49 = vld [vmem:[%s18189_s2 + $0xf48] ss:$16 sps:$4 sm:$0xff]  }
 0x461   :  { %4239 = vmatprep.mubr.bf16.mxu0 %v3435_v4  ;;  %4325 = vmatprep.mubr.bf16.mxu1 %v3435_v4  ;;  %v13214_v50 = vld [vmem:[%s18189_s2 + $0xf64] ss:$16 sps:$4 sm:$0xff]   ;;  %v13217_v51 = vld [vmem:[%s18189_s2 + $0xf6c] ss:$16 sps:$4 sm:$0xff]   ;;  %v13212_v52 = vld [vmem:[%s18189_s2 + $0xf60] ss:$16 sps:$4 sm:$0xff]  }
 0x462   :  { %4240 = vmatmul.mubr.bf16.vlgmr.msra.gmra.mrb[16].mxu0 %v3434_v2  ;;  %4326 = vmatmul.mubr.bf16.vlgmr.msra.gmra.mrb[16].mxu1 %v3434_v2  ;;  %v13215_v53 = vld [vmem:[%s18189_s2 + $0xf68] ss:$16 sps:$4 sm:$0xff]   ;;  %v13220_v54 = vld [vmem:[%s18189_s2 + $0xf84] ss:$16 sps:$4 sm:$0xff]   ;;  %v13223_v55 = vld [vmem:[%s18189_s2 + $0xf8c] ss:$16 sps:$4 sm:$0xff]  }
 0x463   :  { %4251 = vmatpush1.bf16.msra.mxu0 %v13146_v5  ;;  %4337 = vmatpush1.bf16.msra.mxu1 %v13149_v6  ;;  %v13218_v56 = vld [vmem:[%s18189_s2 + $0xf80] ss:$16 sps:$4 sm:$0xff]   ;;  %v13221_v58 = vld [vmem:[%s18189_s2 + $0xf88] ss:$16 sps:$4 sm:$0xff]   ;;  %v13226_v60 = vld [vmem:[%s18189_s2 + $0xfa4] ss:$16 sps:$4 sm:$0xff]  }
 0x464   :  { %4282 = vmatprep.mubr.bf16.mxu0 %v3437_v7  ;;  %4368 = vmatprep.mubr.bf16.mxu1 %v3437_v7  ;;  %v13229_v61 = vld [vmem:[%s18189_s2 + $0xfac] ss:$16 sps:$4 sm:$0xff]   ;;  %v13224_v62 = vld [vmem:[%s18189_s2 + $0xfa0] ss:$16 sps:$4 sm:$0xff]   ;;  %v13227_v63 = vld [vmem:[%s18189_s2 + $0xfa8] ss:$16 sps:$4 sm:$0xff]  }
 0x465   :  { %4252 = vmatprep.subr.bf16.mxu0 %v13154_v8  ;;  %4338 = vmatprep.subr.bf16.mxu1 %v13157_v10  ;;  %v13232_v0 = vld [vmem:[%s18189_s2 + $0xfc4] ss:$16 sps:$4 sm:$0xff]   ;;  %v13235_v1 = vld [vmem:[%s18189_s2 + $0xfcc] ss:$16 sps:$4 sm:$0xff]   ;;  %v13230_v2 = vld [vmem:[%s18189_s2 + $0xfc0] ss:$16 sps:$4 sm:$0xff]  }
 0x466   :  { %v13233_v4 = vld [vmem:[%s18189_s2 + $0xfc8] ss:$16 sps:$4 sm:$0xff]   ;;  %v13238_v5 = vld [vmem:[%s18189_s2 + $0xfe4] ss:$16 sps:$4 sm:$0xff]   ;;  %v13241_v6 = vld [vmem:[%s18189_s2 + $0xfec] ss:$16 sps:$4 sm:$0xff]  }
 0x467   :  { %4253 = vmatpush1.bf16.msra.mxu0 %v13152_v11  ;;  %4339 = vmatpush1.bf16.msra.mxu1 %v13155_v12  ;;  %v13236_v7 = vld [vmem:[%s18189_s2 + $0xfe0] ss:$16 sps:$4 sm:$0xff]   ;;  %v13239_v8 = vld [vmem:[%s18189_s2 + $0xfe8] ss:$16 sps:$4 sm:$0xff]   ;;  %v13244_v10 = vld [vmem:[%s18189_s2 + $0x1004] ss:$16 sps:$4 sm:$0xff]  }
 0x468   :  { %4254 = vmatprep.subr.bf16.mxu0 %v13160_v13  ;;  %4340 = vmatprep.subr.bf16.mxu1 %v13163_v14  ;;  %v13247_v11 = vld [vmem:[%s18189_s2 + $0x100c] ss:$16 sps:$4 sm:$0xff]   ;;  %v13242_v12 = vld [vmem:[%s18189_s2 + $0x1000] ss:$16 sps:$4 sm:$0xff]   ;;  %v13245_v13 = vld [vmem:[%s18189_s2 + $0x1008] ss:$16 sps:$4 sm:$0xff]  }
 0x469   :  { %v13250_v14 = vld [vmem:[%s18189_s2 + $0x1024] ss:$16 sps:$4 sm:$0xff]  }
 0x46b   :  { %4255 = vmatpush1.bf16.msra.mxu0 %v13158_v16  ;;  %4341 = vmatpush1.bf16.msra.mxu1 %v13161_v17  ;;  %v13253_v16 = vld [vmem:[%s18189_s2 + $0x102c] ss:$16 sps:$4 sm:$0xff]   ;;  %v13248_v17 = vld [vmem:[%s18189_s2 + $0x1020] ss:$16 sps:$4 sm:$0xff]  }
 0x46c   :  { %4256 = vmatprep.subr.bf16.mxu0 %v13166_v18  ;;  %4342 = vmatprep.subr.bf16.mxu1 %v13169_v19  ;;  %v13251_v18 = vld [vmem:[%s18189_s2 + $0x1028] ss:$16 sps:$4 sm:$0xff]   ;;  %v13256_v19 = vld [vmem:[%s18189_s2 + $0x1044] ss:$16 sps:$4 sm:$0xff]  }
 0x46f   :  { %4257 = vmatpush1.bf16.msra.mxu0 %v13164_v20  ;;  %4343 = vmatpush1.bf16.msra.mxu1 %v13167_v21  ;;  %v13254_v20 = vld [vmem:[%s18189_s2 + $0x1040] ss:$16 sps:$4 sm:$0xff]   ;;  %v13257_v21 = vld [vmem:[%s18189_s2 + $0x1048] ss:$16 sps:$4 sm:$0xff]  }
 0x470   :  { %4258 = vmatprep.subr.bf16.mxu0 %v13172_v22  ;;  %4344 = vmatprep.subr.bf16.mxu1 %v13175_v23  ;;  %v13262_v22 = vld [vmem:[%s18189_s2 + $0x1064] ss:$16 sps:$4 sm:$0xff]   ;;  %v13265_v23 = vld [vmem:[%s18189_s2 + $0x106c] ss:$16 sps:$4 sm:$0xff]  }
 0x473   :  { %4259 = vmatpush1.bf16.msra.mxu0 %v13170_v24  ;;  %4345 = vmatpush1.bf16.msra.mxu1 %v13173_v9  ;;  %v13260_v24 = vld [vmem:[%s18189_s2 + $0x1060] ss:$16 sps:$4 sm:$0xff]   ;;  %v13263_v9 = vld [vmem:[%s18189_s2 + $0x1068] ss:$16 sps:$4 sm:$0xff]  }
 0x474   :  { %4260 = vmatprep.subr.bf16.mxu0 %v13178_v25  ;;  %4346 = vmatprep.subr.bf16.mxu1 %v13181_v26  ;;  %v13268_v25 = vld [vmem:[%s18189_s2 + $0x1084] ss:$16 sps:$4 sm:$0xff]   ;;  %v13271_v26 = vld [vmem:[%s18189_s2 + $0x108c] ss:$16 sps:$4 sm:$0xff]  }
 0x477   :  { %4261 = vmatpush1.bf16.msra.mxu0 %v13176_v27  ;;  %4347 = vmatpush1.bf16.msra.mxu1 %v13179_v28  ;;  %v13266_v27 = vld [vmem:[%s18189_s2 + $0x1080] ss:$16 sps:$4 sm:$0xff]   ;;  %v13269_v28 = vld [vmem:[%s18189_s2 + $0x1088] ss:$16 sps:$4 sm:$0xff]  }
 0x478   :  { %4262 = vmatprep.subr.bf16.mxu0 %v13184_v29  ;;  %4348 = vmatprep.subr.bf16.mxu1 %v13187_v15  ;;  %v13274_v29 = vld [vmem:[%s18189_s2 + $0x10a4] ss:$16 sps:$4 sm:$0xff]   ;;  %v13277_v15 = vld [vmem:[%s18189_s2 + $0x10ac] ss:$16 sps:$4 sm:$0xff]  }
 0x47b   :  { %4263 = vmatpush1.bf16.msra.mxu0 %v13182_v30  ;;  %4349 = vmatpush1.bf16.msra.mxu1 %v13185_v31  ;;  %v13272_v30 = vld [vmem:[%s18189_s2 + $0x10a0] ss:$16 sps:$4 sm:$0xff]   ;;  %v13275_v31 = vld [vmem:[%s18189_s2 + $0x10a8] ss:$16 sps:$4 sm:$0xff]  }
 0x47c   :  { %4264 = vmatprep.subr.bf16.mxu0 %v13190_v32  ;;  %4350 = vmatprep.subr.bf16.mxu1 %v13193_v33  ;;  %v13280_v32 = vld [vmem:[%s18189_s2 + $0x10c4] ss:$16 sps:$4 sm:$0xff]   ;;  %v13283_v33 = vld [vmem:[%s18189_s2 + $0x10cc] ss:$16 sps:$4 sm:$0xff]  }
 0x47f   :  { %4265 = vmatpush1.bf16.msra.mxu0 %v13188_v34  ;;  %4351 = vmatpush1.bf16.msra.mxu1 %v13191_v35  ;;  %v13278_v34 = vld [vmem:[%s18189_s2 + $0x10c0] ss:$16 sps:$4 sm:$0xff]   ;;  %v13281_v35 = vld [vmem:[%s18189_s2 + $0x10c8] ss:$16 sps:$4 sm:$0xff]  }
 0x480   :  { %4266 = vmatprep.subr.bf16.mxu0 %v13196_v36  ;;  %4352 = vmatprep.subr.bf16.mxu1 %v13199_v37  ;;  %v13286_v36 = vld [vmem:[%s18189_s2 + $0x10e4] ss:$16 sps:$4 sm:$0xff]   ;;  %v13289_v37 = vld [vmem:[%s18189_s2 + $0x10ec] ss:$16 sps:$4 sm:$0xff]  }
 0x483   :  { %4267 = vmatpush1.bf16.msra.mxu0 %v13194_v39  ;;  %4353 = vmatpush1.bf16.msra.mxu1 %v13197_v41  ;;  %v13284_v39 = vld [vmem:[%s18189_s2 + $0x10e0] ss:$16 sps:$4 sm:$0xff]   ;;  %v13287_v41 = vld [vmem:[%s18189_s2 + $0x10e8] ss:$16 sps:$4 sm:$0xff]  }
 0x484   :  { %4268 = vmatprep.subr.bf16.mxu0 %v13202_v42  ;;  %4354 = vmatprep.subr.bf16.mxu1 %v13205_v43  ;;  %v13292_v42 = vld [vmem:[%s18189_s2 + $0x1104] ss:$16 sps:$4 sm:$0xff]   ;;  %v13295_v43 = vld [vmem:[%s18189_s2 + $0x110c] ss:$16 sps:$4 sm:$0xff]  }
 0x487   :  { %4269 = vmatpush1.bf16.msra.mxu0 %v13200_v44  ;;  %4355 = vmatpush1.bf16.msra.mxu1 %v13203_v45  ;;  %v13290_v44 = vld [vmem:[%s18189_s2 + $0x1100] ss:$16 sps:$4 sm:$0xff]   ;;  %v13293_v45 = vld [vmem:[%s18189_s2 + $0x1108] ss:$16 sps:$4 sm:$0xff]  }
 0x488   :  { %4270 = vmatprep.subr.bf16.mxu0 %v13208_v46  ;;  %4356 = vmatprep.subr.bf16.mxu1 %v13211_v47  ;;  %v13298_v46 = vld [vmem:[%s18189_s2 + $0x1124] ss:$16 sps:$4 sm:$0xff]   ;;  %v13301_v47 = vld [vmem:[%s18189_s2 + $0x112c] ss:$16 sps:$4 sm:$0xff]  }
 0x48b   :  { %4271 = vmatpush1.bf16.msra.mxu0 %v13206_v48  ;;  %4357 = vmatpush1.bf16.msra.mxu1 %v13209_v49  ;;  %v13296_v48 = vld [vmem:[%s18189_s2 + $0x1120] ss:$16 sps:$4 sm:$0xff]   ;;  %v13299_v49 = vld [vmem:[%s18189_s2 + $0x1128] ss:$16 sps:$4 sm:$0xff]  }
 0x48c   :  { %4272 = vmatprep.subr.bf16.mxu0 %v13214_v50  ;;  %4358 = vmatprep.subr.bf16.mxu1 %v13217_v51  ;;  %v13304_v50 = vld [vmem:[%s18189_s2 + $0x1144] ss:$16 sps:$4 sm:$0xff]   ;;  %v13307_v51 = vld [vmem:[%s18189_s2 + $0x114c] ss:$16 sps:$4 sm:$0xff]  }
 0x48f   :  { %4273 = vmatpush1.bf16.msra.mxu0 %v13212_v52  ;;  %4359 = vmatpush1.bf16.msra.mxu1 %v13215_v53  ;;  %v13302_v52 = vld [vmem:[%s18189_s2 + $0x1140] ss:$16 sps:$4 sm:$0xff]   ;;  %v13305_v53 = vld [vmem:[%s18189_s2 + $0x1148] ss:$16 sps:$4 sm:$0xff]  }
 0x490   :  { %4274 = vmatprep.subr.bf16.mxu0 %v13220_v54  ;;  %4360 = vmatprep.subr.bf16.mxu1 %v13223_v55  ;;  %v13310_v54 = vld [vmem:[%s18189_s2 + $0x1164] ss:$16 sps:$4 sm:$0xff]   ;;  %v13313_v55 = vld [vmem:[%s18189_s2 + $0x116c] ss:$16 sps:$4 sm:$0xff]  }
 0x493   :  { %4275 = vmatpush1.bf16.msra.mxu0 %v13218_v56  ;;  %4361 = vmatpush1.bf16.msra.mxu1 %v13221_v58  ;;  %v13308_v56 = vld [vmem:[%s18189_s2 + $0x1160] ss:$16 sps:$4 sm:$0xff]   ;;  %v13311_v58 = vld [vmem:[%s18189_s2 + $0x1168] ss:$16 sps:$4 sm:$0xff]  }
 0x494   :  { %4276 = vmatprep.subr.bf16.mxu0 %v13226_v60  ;;  %4362 = vmatprep.subr.bf16.mxu1 %v13229_v61  ;;  %v13316_v60 = vld [vmem:[%s18189_s2 + $0x1184] ss:$16 sps:$4 sm:$0xff]   ;;  %v13319_v61 = vld [vmem:[%s18189_s2 + $0x118c] ss:$16 sps:$4 sm:$0xff]  }
 0x497   :  { %4277 = vmatpush1.bf16.msra.mxu0 %v13224_v62  ;;  %4363 = vmatpush1.bf16.msra.mxu1 %v13227_v63  ;;  %v13314_v62 = vld [vmem:[%s18189_s2 + $0x1180] ss:$16 sps:$4 sm:$0xff]   ;;  %v13317_v63 = vld [vmem:[%s18189_s2 + $0x1188] ss:$16 sps:$4 sm:$0xff]  }
 0x498   :  { %4278 = vmatprep.subr.bf16.mxu0 %v13232_v0  ;;  %4364 = vmatprep.subr.bf16.mxu1 %v13235_v1  ;;  %v13322_v0 = vld [vmem:[%s18189_s2 + $0x11a4] ss:$16 sps:$4 sm:$0xff]   ;;  %v13325_v1 = vld [vmem:[%s18189_s2 + $0x11ac] ss:$16 sps:$4 sm:$0xff]  }
 0x49b   :  { %4279 = vmatpush1.bf16.msra.mxu0 %v13230_v2  ;;  %4365 = vmatpush1.bf16.msra.mxu1 %v13233_v4  ;;  %v13320_v2 = vld [vmem:[%s18189_s2 + $0x11a0] ss:$16 sps:$4 sm:$0xff]   ;;  %v13323_v4 = vld [vmem:[%s18189_s2 + $0x11a8] ss:$16 sps:$4 sm:$0xff]  }
 0x49c   :  { %4280 = vmatprep.subr.bf16.mxu0 %v13238_v5  ;;  %4366 = vmatprep.subr.bf16.mxu1 %v13241_v6  ;;  %v13328_v5 = vld [vmem:[%s18189_s2 + $0x11c4] ss:$16 sps:$4 sm:$0xff]   ;;  %v13331_v6 = vld [vmem:[%s18189_s2 + $0x11cc] ss:$16 sps:$4 sm:$0xff]  }
 0x49f   :  { %4281 = vmatpush1.bf16.msra.mxu0 %v13236_v7  ;;  %4367 = vmatpush1.bf16.msra.mxu1 %v13239_v8  ;;  %v13326_v7 = vld [vmem:[%s18189_s2 + $0x11c0] ss:$16 sps:$4 sm:$0xff]   ;;  %v13329_v8 = vld [vmem:[%s18189_s2 + $0x11c8] ss:$16 sps:$4 sm:$0xff]  }
 0x4a0   :  { %5222 = vmatprep.subr.bf16.mxu0 %v13244_v10  ;;  %5308 = vmatprep.subr.bf16.mxu1 %v13247_v11  ;;  %v13334_v10 = vld [vmem:[%s18189_s2 + $0x11e4] ss:$16 sps:$4 sm:$0xff]   ;;  %v13337_v11 = vld [vmem:[%s18189_s2 + $0x11ec] ss:$16 sps:$4 sm:$0xff]  }
 0x4a2   :  { %4283 = vmatmul.mubr.bf16.vlgmr.msra.gmra.mrb[16].mxu0 %v15829_v3  ;;  %4369 = vmatmul.mubr.bf16.vlgmr.msra.gmra.mrb[16].mxu1 %v15829_v3  ;;  %v13259_v3 = vld [vmem:[%s18189_s2 + $0x104c] ss:$16 sps:$4 sm:$0xff]  }
 0x4a3   :  { %5223 = vmatpush1.bf16.msra.mxu0 %v13242_v12  ;;  %5309 = vmatpush1.bf16.msra.mxu1 %v13245_v13  ;;  %v13332_v12 = vld [vmem:[%s18189_s2 + $0x11e0] ss:$16 sps:$4 sm:$0xff]   ;;  %v13335_v13 = vld [vmem:[%s18189_s2 + $0x11e8] ss:$16 sps:$4 sm:$0xff]  }
 0x4a4   :  { %5224 = vmatprep.subr.bf16.mxu0 %v13250_v14  ;;  %5310 = vmatprep.subr.bf16.mxu1 %v13253_v16  ;;  %v13340_v14 = vld [vmem:[%s18189_s2 + $0x1204] ss:$16 sps:$4 sm:$0xff]   ;;  %v13343_v16 = vld [vmem:[%s18189_s2 + $0x120c] ss:$16 sps:$4 sm:$0xff]  }
 0x4a7   :  { %5225 = vmatpush1.bf16.msra.mxu0 %v13248_v17  ;;  %5311 = vmatpush1.bf16.msra.mxu1 %v13251_v18  ;;  %v10942_v17 = vld [vmem:[%s18190_s5 + $0x10] sm:$0xf] }
 0x4a8   :  { %5226 = vmatprep.subr.bf16.mxu0 %v13256_v19  ;;  %5312 = vmatprep.subr.bf16.mxu1 %v13259_v3  ;;  %v10943_v18 = vld [vmem:[%s18191_s6 + $0x10] sm:$0xf]  ;;  %v4385_v19 = vrot.slane %v10942_v17, %v14601_v38  ;;  %v4393_v3 = vrot.slane %v10942_v17, %v14615_v57 }
 0x4ab   :  { %5227 = vmatpush1.bf16.msra.mxu0 %v13254_v20  ;;  %5313 = vmatpush1.bf16.msra.mxu1 %v13257_v21  ;;  %v4389_v20 = vrot.slane %v10942_v17, %v14606_v40  ;;  %v4397_v21 = vrot.slane %v10942_v17, %v14617_v59  ;;  %v13364_v17 = vld [vmem:[%s18189_s2 + $0x1284] ss:$16 sps:$4 sm:$0xff]  }
 0x4ac   :  { %5228 = vmatprep.subr.bf16.mxu0 %v13262_v22  ;;  %5314 = vmatprep.subr.bf16.mxu1 %v13265_v23  ;;  %v4416_v22 = vrot.slane %v10943_v18, %v14601_v38  ;;  %v4424_v23 = vrot.slane %v10943_v18, %v14615_v57 }
 0x4af   :  { %5229 = vmatpush1.bf16.msra.mxu0 %v13260_v24  ;;  %5315 = vmatpush1.bf16.msra.mxu1 %v13263_v9 }
 0x4b0   :  { %5230 = vmatprep.subr.bf16.mxu0 %v13268_v25  ;;  %5316 = vmatprep.subr.bf16.mxu1 %v13271_v26  ;;  %v4420_v25 = vrot.slane %v10943_v18, %v14606_v40  ;;  %v4428_v26 = vrot.slane %v10943_v18, %v14617_v59  ;;  %v13367_v18 = vld [vmem:[%s18189_s2 + $0x128c] ss:$16 sps:$4 sm:$0xff]  }
 0x4b3   :  { %5231 = vmatpush1.bf16.msra.mxu0 %v13266_v27  ;;  %5317 = vmatpush1.bf16.msra.mxu1 %v13269_v28 }
 0x4b4   :  { %5232 = vmatprep.subr.bf16.mxu0 %v13274_v29  ;;  %5318 = vmatprep.subr.bf16.mxu1 %v13277_v15 }
 0x4b7   :  { %5233 = vmatpush1.bf16.msra.mxu0 %v13272_v30  ;;  %5319 = vmatpush1.bf16.msra.mxu1 %v13275_v31 }
 0x4b8   :  { %5234 = vmatprep.subr.bf16.mxu0 %v13280_v32  ;;  %5320 = vmatprep.subr.bf16.mxu1 %v13283_v33 }
 0x4bb   :  { %5235 = vmatpush1.bf16.msra.mxu0 %v13278_v34  ;;  %5321 = vmatpush1.bf16.msra.mxu1 %v13281_v35 }
 0x4bc   :  { %5236 = vmatprep.subr.bf16.mxu0 %v13286_v36  ;;  %5322 = vmatprep.subr.bf16.mxu1 %v13289_v37 }
 0x4bf   :  { %5237 = vmatpush1.bf16.msra.mxu0 %v13284_v39  ;;  %5323 = vmatpush1.bf16.msra.mxu1 %v13287_v41 }
 0x4c0   :  { %5238 = vmatprep.subr.bf16.mxu0 %v13292_v42  ;;  %5324 = vmatprep.subr.bf16.mxu1 %v13295_v43 }
 0x4c3   :  { %5239 = vmatpush1.bf16.msra.mxu0 %v13290_v44  ;;  %5325 = vmatpush1.bf16.msra.mxu1 %v13293_v45 }
 0x4c4   :  { %5240 = vmatprep.subr.bf16.mxu0 %v13298_v46  ;;  %5326 = vmatprep.subr.bf16.mxu1 %v13301_v47 }
 0x4c7   :  { %5241 = vmatpush1.bf16.msra.mxu0 %v13296_v48  ;;  %5327 = vmatpush1.bf16.msra.mxu1 %v13299_v49 }
 0x4c8   :  { %5242 = vmatprep.subr.bf16.mxu0 %v13304_v50  ;;  %5328 = vmatprep.subr.bf16.mxu1 %v13307_v51 }
 0x4cb   :  { %5243 = vmatpush1.bf16.msra.mxu0 %v13302_v52  ;;  %5329 = vmatpush1.bf16.msra.mxu1 %v13305_v53 }
 0x4cc   :  { %5244 = vmatprep.subr.bf16.mxu0 %v13310_v54  ;;  %5330 = vmatprep.subr.bf16.mxu1 %v13313_v55 }
 0x4cf   :  { %5245 = vmatpush1.bf16.msra.mxu0 %v13308_v56  ;;  %5331 = vmatpush1.bf16.msra.mxu1 %v13311_v58 }
 0x4d0   :  { %5246 = vmatprep.subr.bf16.mxu0 %v13316_v60  ;;  %5332 = vmatprep.subr.bf16.mxu1 %v13319_v61 }
 0x4d3   :  { %5247 = vmatpush1.bf16.msra.mxu0 %v13314_v62  ;;  %5333 = vmatpush1.bf16.msra.mxu1 %v13317_v63  ;;  %v13338_v63 = vld [vmem:[%s18189_s2 + $0x1200] ss:$16 sps:$4 sm:$0xff]  }
 0x4d4   :  { %5248 = vmatprep.subr.bf16.mxu0 %v13322_v0  ;;  %5334 = vmatprep.subr.bf16.mxu1 %v13325_v1  ;;  %v13341_v0 = vld [vmem:[%s18189_s2 + $0x1208] ss:$16 sps:$4 sm:$0xff]  }
 0x4d7   :  { %5249 = vmatpush1.bf16.msra.mxu0 %v13320_v2  ;;  %5335 = vmatpush1.bf16.msra.mxu1 %v13323_v4  ;;  %v13346_v2 = vld [vmem:[%s18189_s2 + $0x1224] ss:$16 sps:$4 sm:$0xff]   ;;  %v13349_v4 = vld [vmem:[%s18189_s2 + $0x122c] ss:$16 sps:$4 sm:$0xff]  }
 0x4d8   :  { %5250 = vmatprep.subr.bf16.mxu0 %v13328_v5  ;;  %5336 = vmatprep.subr.bf16.mxu1 %v13331_v6  ;;  %v13344_v5 = vld [vmem:[%s18189_s2 + $0x1220] ss:$16 sps:$4 sm:$0xff]   ;;  %v13347_v6 = vld [vmem:[%s18189_s2 + $0x1228] ss:$16 sps:$4 sm:$0xff]  }
 0x4db   :  { %5251 = vmatpush1.bf16.msra.mxu0 %v13326_v7  ;;  %5337 = vmatpush1.bf16.msra.mxu1 %v13329_v8  ;;  %v13352_v7 = vld [vmem:[%s18189_s2 + $0x1244] ss:$16 sps:$4 sm:$0xff]   ;;  %v13355_v8 = vld [vmem:[%s18189_s2 + $0x124c] ss:$16 sps:$4 sm:$0xff]  }
 0x4dc   :  { %5252 = vmatprep.subr.bf16.mxu0 %v13334_v10  ;;  %5338 = vmatprep.subr.bf16.mxu1 %v13337_v11  ;;  %v13350_v10 = vld [vmem:[%s18189_s2 + $0x1240] ss:$16 sps:$4 sm:$0xff]   ;;  %v13353_v11 = vld [vmem:[%s18189_s2 + $0x1248] ss:$16 sps:$4 sm:$0xff]  }
 0x4df   :  { %5253 = vmatpush1.bf16.msra.mxu0 %v13332_v12  ;;  %5339 = vmatpush1.bf16.msra.mxu1 %v13335_v13  ;;  %v13358_v12 = vld [vmem:[%s18189_s2 + $0x1264] ss:$16 sps:$4 sm:$0xff]   ;;  %v13361_v13 = vld [vmem:[%s18189_s2 + $0x126c] ss:$16 sps:$4 sm:$0xff]  }
 0x4e0   :  { %5265 = vmatprep.subr.bf16.mxu0 %v13340_v14  ;;  %5351 = vmatprep.subr.bf16.mxu1 %v13343_v16  ;;  %v13356_v14 = vld [vmem:[%s18189_s2 + $0x1260] ss:$16 sps:$4 sm:$0xff]   ;;  %v13359_v16 = vld [vmem:[%s18189_s2 + $0x1268] ss:$16 sps:$4 sm:$0xff]  }
 0x575   :  { %v4284_v24 = vpop.f32.mrb[16].mxu0  ;;  %v4370_v9 = vpop.f32.mrb[16].mxu1 }
 0x576   :  { %v4402_v27 = vmul.f32 %v4385_v19, %v4284_v24  ;;  %v4404_v28 = vmul.f32 %v4393_v3, %v4370_v9  ;;  %v4286_v29 = vpop.f32.mrb[17].mxu0  ;;  %v4372_v15 = vpop.f32.mrb[17].mxu1  ;;  %v13376_v24 = vld [vmem:[%s18189_s2 + $0x12c4] ss:$16 sps:$4 sm:$0xff]   ;;  %v13379_v9 = vld [vmem:[%s18189_s2 + $0x12cc] ss:$16 sps:$4 sm:$0xff]  }
 0x577   :  { %v4403_v30 = vmul.f32 %v4389_v20, %v4286_v29  ;;  %v4405_v31 = vmul.f32 %v4397_v21, %v4372_v15  ;;  %v4288_v32 = vpop.f32.mrb[18].mxu0  ;;  %v4374_v33 = vpop.f32.mrb[18].mxu1  ;;  %v13380_v29 = vld [vmem:[%s18189_s2 + $0x12e0] ss:$16 sps:$4 sm:$0xff]   ;;  %v13383_v15 = vld [vmem:[%s18189_s2 + $0x12e8] ss:$16 sps:$4 sm:$0xff]  }
 0x578   :  { %v4433_v34 = vadd.f32 %v4416_v22, %v4402_v27  ;;  %v4435_v35 = vadd.f32 %v4424_v23, %v4404_v28  ;;  %v4406_v36 = vmul.f32 %v4385_v19, %v4288_v32  ;;  %v4408_v37 = vmul.f32 %v4393_v3, %v4374_v33  ;;  %v4290_v39 = vpop.f32.mrb[19].mxu0  ;;  %v4376_v41 = vpop.f32.mrb[19].mxu1  ;;  %v13362_v19 = vld [vmem:[%s18189_s2 + $0x1280] ss:$16 sps:$4 sm:$0xff]   ;;  %v13365_v3 = vld [vmem:[%s18189_s2 + $0x1288] ss:$16 sps:$4 sm:$0xff]  }
 0x579   :  { %v4434_v42 = vadd.f32 %v4420_v25, %v4403_v30  ;;  %v4436_v43 = vadd.f32 %v4428_v26, %v4405_v31  ;;  %v4407_v44 = vmul.f32 %v4389_v20, %v4290_v39  ;;  %v4409_v45 = vmul.f32 %v4397_v21, %v4376_v41  ;;  %v13370_v20 = vld [vmem:[%s18189_s2 + $0x12a4] ss:$16 sps:$4 sm:$0xff]   ;;  %v13373_v21 = vld [vmem:[%s18189_s2 + $0x12ac] ss:$16 sps:$4 sm:$0xff]   ;;  %v13386_v32 = vld [vmem:[%s18189_s2 + $0x1300] ss:$16 sps:$4 sm:$0xff]  }
 0x57a   :  { %v4437_v46 = vadd.f32 %v4416_v22, %v4406_v36  ;;  %v4439_v47 = vadd.f32 %v4424_v23, %v4408_v37  ;;  %v4441_v50 = vmax.f32 %v4433_v34, 0.0  ;;  %v4443_v51 = vmax.f32 %v4435_v35, 0.0  ;;  %v13368_v22 = vld [vmem:[%s18189_s2 + $0x12a0] ss:$16 sps:$4 sm:$0xff]   ;;  %v13371_v23 = vld [vmem:[%s18189_s2 + $0x12a8] ss:$16 sps:$4 sm:$0xff]  }
 0x57b   :  { %v4438_v48 = vadd.f32 %v4420_v25, %v4407_v44  ;;  %v4440_v49 = vadd.f32 %v4428_v26, %v4409_v45  ;;  %v4442_v54 = vmax.f32 %v4434_v42, 0.0  ;;  %v4444_v55 = vmax.f32 %v4436_v43, 0.0  ;;  %v13374_v25 = vld [vmem:[%s18189_s2 + $0x12c0] ss:$16 sps:$4 sm:$0xff]   ;;  %v13377_v26 = vld [vmem:[%s18189_s2 + $0x12c8] ss:$16 sps:$4 sm:$0xff]  }
 0x57c   :  { %v4445_v52 = vmax.f32 %v4437_v46, 0.0  ;;  %v4447_v53 = vmax.f32 %v4439_v47, 0.0  ;;  %v13382_v27 = vld [vmem:[%s18189_s2 + $0x12e4] ss:$16 sps:$4 sm:$0xff]   ;;  %v13385_v28 = vld [vmem:[%s18189_s2 + $0x12ec] ss:$16 sps:$4 sm:$0xff]  }
 0x57d   :  { %v4446_v56 = vmax.f32 %v4438_v48, 0.0  ;;  %v4448_v58 = vmax.f32 %v4440_v49, 0.0  ;;  %v13388_v30 = vld [vmem:[%s18189_s2 + $0x1304] ss:$16 sps:$4 sm:$0xff]   ;;  %v13391_v31 = vld [vmem:[%s18189_s2 + $0x130c] ss:$16 sps:$4 sm:$0xff]  }
 0x57e   :  { %v4449_v60 = vpack.c.bf16 %v4445_v52, %v4441_v50  ;;  %v16231_v61 = vpack.c.bf16 %v4447_v53, %v4443_v51  ;;  %v13389_v33 = vld [vmem:[%s18189_s2 + $0x1308] ss:$16 sps:$4 sm:$0xff]   ;;  %v13394_v34 = vld [vmem:[%s18189_s2 + $0x1324] ss:$16 sps:$4 sm:$0xff]   ;;  %v13397_v35 = vld [vmem:[%s18189_s2 + $0x132c] ss:$16 sps:$4 sm:$0xff]  }
 0x57f   :  { %v4450_v62 = vpack.c.bf16 %v4446_v56, %v4442_v54  ;;  %v4452_v1 = vpack.c.bf16 %v4448_v58, %v4444_v55  ;;  %v13392_v36 = vld [vmem:[%s18189_s2 + $0x1320] ss:$16 sps:$4 sm:$0xff]   ;;  %v13395_v37 = vld [vmem:[%s18189_s2 + $0x1328] ss:$16 sps:$4 sm:$0xff]   ;;  %v13400_v39 = vld [vmem:[%s18189_s2 + $0x1344] ss:$16 sps:$4 sm:$0xff]  }
 0x580   :  { %v13403_v41 = vld [vmem:[%s18189_s2 + $0x134c] ss:$16 sps:$4 sm:$0xff]   ;;  %v13398_v42 = vld [vmem:[%s18189_s2 + $0x1340] ss:$16 sps:$4 sm:$0xff]   ;;  %v13401_v43 = vld [vmem:[%s18189_s2 + $0x1348] ss:$16 sps:$4 sm:$0xff]  }
 0x581   :  { %5254 = vmatprep.mubr.bf16.mxu0 %v4450_v62  ;;  %5340 = vmatprep.mubr.bf16.mxu1 %v4450_v62  ;;  %v13406_v44 = vld [vmem:[%s18189_s2 + $0x1364] ss:$16 sps:$4 sm:$0xff]   ;;  %v13409_v45 = vld [vmem:[%s18189_s2 + $0x136c] ss:$16 sps:$4 sm:$0xff]   ;;  %v13404_v46 = vld [vmem:[%s18189_s2 + $0x1360] ss:$16 sps:$4 sm:$0xff]  }
 0x582   :  { %5255 = vmatmul.mubr.bf16.vlgmr.msra.gmra.mrb[20].mxu0 %v4449_v60  ;;  %5341 = vmatmul.mubr.bf16.vlgmr.msra.gmra.mrb[20].mxu1 %v4449_v60  ;;  %v13407_v47 = vld [vmem:[%s18189_s2 + $0x1368] ss:$16 sps:$4 sm:$0xff]   ;;  %v13412_v48 = vld [vmem:[%s18189_s2 + $0x1384] ss:$16 sps:$4 sm:$0xff]   ;;  %v13415_v49 = vld [vmem:[%s18189_s2 + $0x138c] ss:$16 sps:$4 sm:$0xff]  }
 0x583   :  { %5266 = vmatpush1.bf16.msra.mxu0 %v13338_v63  ;;  %5352 = vmatpush1.bf16.msra.mxu1 %v13341_v0  ;;  %v13410_v50 = vld [vmem:[%s18189_s2 + $0x1380] ss:$16 sps:$4 sm:$0xff]   ;;  %v13413_v51 = vld [vmem:[%s18189_s2 + $0x1388] ss:$16 sps:$4 sm:$0xff]   ;;  %v13418_v52 = vld [vmem:[%s18189_s2 + $0x13a4] ss:$16 sps:$4 sm:$0xff]  }
 0x584   :  { %5297 = vmatprep.mubr.bf16.mxu0 %v4452_v1  ;;  %5383 = vmatprep.mubr.bf16.mxu1 %v4452_v1  ;;  %v13421_v53 = vld [vmem:[%s18189_s2 + $0x13ac] ss:$16 sps:$4 sm:$0xff]   ;;  %v13416_v54 = vld [vmem:[%s18189_s2 + $0x13a0] ss:$16 sps:$4 sm:$0xff]   ;;  %v13419_v55 = vld [vmem:[%s18189_s2 + $0x13a8] ss:$16 sps:$4 sm:$0xff]  }
 0x585   :  { %5267 = vmatprep.subr.bf16.mxu0 %v13346_v2  ;;  %5353 = vmatprep.subr.bf16.mxu1 %v13349_v4  ;;  %v13424_v56 = vld [vmem:[%s18189_s2 + $0x13c4] ss:$16 sps:$4 sm:$0xff]   ;;  %v13427_v58 = vld [vmem:[%s18189_s2 + $0x13cc] ss:$16 sps:$4 sm:$0xff]   ;;  %v13422_v60 = vld [vmem:[%s18189_s2 + $0x13c0] ss:$16 sps:$4 sm:$0xff]  }
 0x586   :  { %v13425_v62 = vld [vmem:[%s18189_s2 + $0x13c8] ss:$16 sps:$4 sm:$0xff]   ;;  %v13430_v63 = vld [vmem:[%s18189_s2 + $0x13e4] ss:$16 sps:$4 sm:$0xff]   ;;  %v13433_v0 = vld [vmem:[%s18189_s2 + $0x13ec] ss:$16 sps:$4 sm:$0xff]  }
 0x587   :  { %5268 = vmatpush1.bf16.msra.mxu0 %v13344_v5  ;;  %5354 = vmatpush1.bf16.msra.mxu1 %v13347_v6  ;;  %v13428_v1 = vld [vmem:[%s18189_s2 + $0x13e0] ss:$16 sps:$4 sm:$0xff]   ;;  %v13431_v2 = vld [vmem:[%s18189_s2 + $0x13e8] ss:$16 sps:$4 sm:$0xff]   ;;  %v13436_v4 = vld [vmem:[%s18189_s2 + $0x1404] ss:$16 sps:$4 sm:$0xff]  }
 0x588   :  { %5269 = vmatprep.subr.bf16.mxu0 %v13352_v7  ;;  %5355 = vmatprep.subr.bf16.mxu1 %v13355_v8  ;;  %v13439_v5 = vld [vmem:[%s18189_s2 + $0x140c] ss:$16 sps:$4 sm:$0xff]   ;;  %v13434_v6 = vld [vmem:[%s18189_s2 + $0x1400] ss:$16 sps:$4 sm:$0xff]   ;;  %v13437_v7 = vld [vmem:[%s18189_s2 + $0x1408] ss:$16 sps:$4 sm:$0xff]  }
 0x589   :  { %v13442_v8 = vld [vmem:[%s18189_s2 + $0x1424] ss:$16 sps:$4 sm:$0xff]  }
 0x58b   :  { %5270 = vmatpush1.bf16.msra.mxu0 %v13350_v10  ;;  %5356 = vmatpush1.bf16.msra.mxu1 %v13353_v11  ;;  %v13445_v10 = vld [vmem:[%s18189_s2 + $0x142c] ss:$16 sps:$4 sm:$0xff]   ;;  %v13440_v11 = vld [vmem:[%s18189_s2 + $0x1420] ss:$16 sps:$4 sm:$0xff]  }
 0x58c   :  { %5271 = vmatprep.subr.bf16.mxu0 %v13358_v12  ;;  %5357 = vmatprep.subr.bf16.mxu1 %v13361_v13  ;;  %v13443_v12 = vld [vmem:[%s18189_s2 + $0x1428] ss:$16 sps:$4 sm:$0xff]   ;;  %v13448_v13 = vld [vmem:[%s18189_s2 + $0x1444] ss:$16 sps:$4 sm:$0xff]  }
 0x58f   :  { %5272 = vmatpush1.bf16.msra.mxu0 %v13356_v14  ;;  %5358 = vmatpush1.bf16.msra.mxu1 %v13359_v16  ;;  %v13446_v14 = vld [vmem:[%s18189_s2 + $0x1440] ss:$16 sps:$4 sm:$0xff]   ;;  %v13449_v16 = vld [vmem:[%s18189_s2 + $0x1448] ss:$16 sps:$4 sm:$0xff]  }
 0x590   :  { %5273 = vmatprep.subr.bf16.mxu0 %v13364_v17  ;;  %5359 = vmatprep.subr.bf16.mxu1 %v13367_v18  ;;  %v13454_v17 = vld [vmem:[%s18189_s2 + $0x1464] ss:$16 sps:$4 sm:$0xff]   ;;  %v13457_v18 = vld [vmem:[%s18189_s2 + $0x146c] ss:$16 sps:$4 sm:$0xff]  }
 0x593   :  { %5274 = vmatpush1.bf16.msra.mxu0 %v13362_v19  ;;  %5360 = vmatpush1.bf16.msra.mxu1 %v13365_v3  ;;  %v13452_v19 = vld [vmem:[%s18189_s2 + $0x1460] ss:$16 sps:$4 sm:$0xff]   ;;  %v13455_v3 = vld [vmem:[%s18189_s2 + $0x1468] ss:$16 sps:$4 sm:$0xff]  }
 0x594   :  { %5275 = vmatprep.subr.bf16.mxu0 %v13370_v20  ;;  %5361 = vmatprep.subr.bf16.mxu1 %v13373_v21  ;;  %v13460_v20 = vld [vmem:[%s18189_s2 + $0x1484] ss:$16 sps:$4 sm:$0xff]   ;;  %v13463_v21 = vld [vmem:[%s18189_s2 + $0x148c] ss:$16 sps:$4 sm:$0xff]  }
 0x597   :  { %5276 = vmatpush1.bf16.msra.mxu0 %v13368_v22  ;;  %5362 = vmatpush1.bf16.msra.mxu1 %v13371_v23  ;;  %v13458_v22 = vld [vmem:[%s18189_s2 + $0x1480] ss:$16 sps:$4 sm:$0xff]   ;;  %v13461_v23 = vld [vmem:[%s18189_s2 + $0x1488] ss:$16 sps:$4 sm:$0xff]  }
 0x598   :  { %5277 = vmatprep.subr.bf16.mxu0 %v13376_v24  ;;  %5363 = vmatprep.subr.bf16.mxu1 %v13379_v9  ;;  %v13466_v24 = vld [vmem:[%s18189_s2 + $0x14a4] ss:$16 sps:$4 sm:$0xff]   ;;  %v13469_v9 = vld [vmem:[%s18189_s2 + $0x14ac] ss:$16 sps:$4 sm:$0xff]  }
 0x59b   :  { %5278 = vmatpush1.bf16.msra.mxu0 %v13374_v25  ;;  %5364 = vmatpush1.bf16.msra.mxu1 %v13377_v26  ;;  %v13464_v25 = vld [vmem:[%s18189_s2 + $0x14a0] ss:$16 sps:$4 sm:$0xff]   ;;  %v13467_v26 = vld [vmem:[%s18189_s2 + $0x14a8] ss:$16 sps:$4 sm:$0xff]  }
 0x59c   :  { %5279 = vmatprep.subr.bf16.mxu0 %v13382_v27  ;;  %5365 = vmatprep.subr.bf16.mxu1 %v13385_v28  ;;  %v13472_v27 = vld [vmem:[%s18189_s2 + $0x14c4] ss:$16 sps:$4 sm:$0xff]   ;;  %v13475_v28 = vld [vmem:[%s18189_s2 + $0x14cc] ss:$16 sps:$4 sm:$0xff]  }
 0x59f   :  { %5280 = vmatpush1.bf16.msra.mxu0 %v13380_v29  ;;  %5366 = vmatpush1.bf16.msra.mxu1 %v13383_v15  ;;  %v13470_v29 = vld [vmem:[%s18189_s2 + $0x14c0] ss:$16 sps:$4 sm:$0xff]   ;;  %v13473_v15 = vld [vmem:[%s18189_s2 + $0x14c8] ss:$16 sps:$4 sm:$0xff]  }
 0x5a0   :  { %5281 = vmatprep.subr.bf16.mxu0 %v13388_v30  ;;  %5367 = vmatprep.subr.bf16.mxu1 %v13391_v31  ;;  %v13478_v30 = vld [vmem:[%s18189_s2 + $0x14e4] ss:$16 sps:$4 sm:$0xff]   ;;  %v13481_v31 = vld [vmem:[%s18189_s2 + $0x14ec] ss:$16 sps:$4 sm:$0xff]  }
 0x5a3   :  { %5282 = vmatpush1.bf16.msra.mxu0 %v13386_v32  ;;  %5368 = vmatpush1.bf16.msra.mxu1 %v13389_v33  ;;  %v13476_v32 = vld [vmem:[%s18189_s2 + $0x14e0] ss:$16 sps:$4 sm:$0xff]   ;;  %v13479_v33 = vld [vmem:[%s18189_s2 + $0x14e8] ss:$16 sps:$4 sm:$0xff]  }
 0x5a4   :  { %5283 = vmatprep.subr.bf16.mxu0 %v13394_v34  ;;  %5369 = vmatprep.subr.bf16.mxu1 %v13397_v35  ;;  %v13484_v34 = vld [vmem:[%s18189_s2 + $0x1504] ss:$16 sps:$4 sm:$0xff]   ;;  %v13487_v35 = vld [vmem:[%s18189_s2 + $0x150c] ss:$16 sps:$4 sm:$0xff]  }
 0x5a7   :  { %5284 = vmatpush1.bf16.msra.mxu0 %v13392_v36  ;;  %5370 = vmatpush1.bf16.msra.mxu1 %v13395_v37  ;;  %v13482_v36 = vld [vmem:[%s18189_s2 + $0x1500] ss:$16 sps:$4 sm:$0xff]   ;;  %v13485_v37 = vld [vmem:[%s18189_s2 + $0x1508] ss:$16 sps:$4 sm:$0xff]  }
 0x5a8   :  { %5285 = vmatprep.subr.bf16.mxu0 %v13400_v39  ;;  %5371 = vmatprep.subr.bf16.mxu1 %v13403_v41  ;;  %v13490_v39 = vld [vmem:[%s18189_s2 + $0x1524] ss:$16 sps:$4 sm:$0xff]   ;;  %v13493_v41 = vld [vmem:[%s18189_s2 + $0x152c] ss:$16 sps:$4 sm:$0xff]  }
 0x5ab   :  { %5286 = vmatpush1.bf16.msra.mxu0 %v13398_v42  ;;  %5372 = vmatpush1.bf16.msra.mxu1 %v13401_v43  ;;  %v13488_v42 = vld [vmem:[%s18189_s2 + $0x1520] ss:$16 sps:$4 sm:$0xff]   ;;  %v13491_v43 = vld [vmem:[%s18189_s2 + $0x1528] ss:$16 sps:$4 sm:$0xff]  }
 0x5ac   :  { %5287 = vmatprep.subr.bf16.mxu0 %v13406_v44  ;;  %5373 = vmatprep.subr.bf16.mxu1 %v13409_v45  ;;  %v13496_v44 = vld [vmem:[%s18189_s2 + $0x1544] ss:$16 sps:$4 sm:$0xff]   ;;  %v13499_v45 = vld [vmem:[%s18189_s2 + $0x154c] ss:$16 sps:$4 sm:$0xff]  }
 0x5af   :  { %5288 = vmatpush1.bf16.msra.mxu0 %v13404_v46  ;;  %5374 = vmatpush1.bf16.msra.mxu1 %v13407_v47  ;;  %v13494_v46 = vld [vmem:[%s18189_s2 + $0x1540] ss:$16 sps:$4 sm:$0xff]   ;;  %v13497_v47 = vld [vmem:[%s18189_s2 + $0x1548] ss:$16 sps:$4 sm:$0xff]  }
 0x5b0   :  { %5289 = vmatprep.subr.bf16.mxu0 %v13412_v48  ;;  %5375 = vmatprep.subr.bf16.mxu1 %v13415_v49  ;;  %v13502_v48 = vld [vmem:[%s18189_s2 + $0x1564] ss:$16 sps:$4 sm:$0xff]   ;;  %v13505_v49 = vld [vmem:[%s18189_s2 + $0x156c] ss:$16 sps:$4 sm:$0xff]  }
 0x5b3   :  { %5290 = vmatpush1.bf16.msra.mxu0 %v13410_v50  ;;  %5376 = vmatpush1.bf16.msra.mxu1 %v13413_v51  ;;  %v13500_v50 = vld [vmem:[%s18189_s2 + $0x1560] ss:$16 sps:$4 sm:$0xff]   ;;  %v13503_v51 = vld [vmem:[%s18189_s2 + $0x1568] ss:$16 sps:$4 sm:$0xff]  }
 0x5b4   :  { %5291 = vmatprep.subr.bf16.mxu0 %v13418_v52  ;;  %5377 = vmatprep.subr.bf16.mxu1 %v13421_v53  ;;  %v13508_v52 = vld [vmem:[%s18189_s2 + $0x1584] ss:$16 sps:$4 sm:$0xff]   ;;  %v13511_v53 = vld [vmem:[%s18189_s2 + $0x158c] ss:$16 sps:$4 sm:$0xff]  }
 0x5b7   :  { %5292 = vmatpush1.bf16.msra.mxu0 %v13416_v54  ;;  %5378 = vmatpush1.bf16.msra.mxu1 %v13419_v55  ;;  %v13506_v54 = vld [vmem:[%s18189_s2 + $0x1580] ss:$16 sps:$4 sm:$0xff]   ;;  %v13509_v55 = vld [vmem:[%s18189_s2 + $0x1588] ss:$16 sps:$4 sm:$0xff]  }
 0x5b8   :  { %5293 = vmatprep.subr.bf16.mxu0 %v13424_v56  ;;  %5379 = vmatprep.subr.bf16.mxu1 %v13427_v58  ;;  %v13514_v56 = vld [vmem:[%s18189_s2 + $0x15a4] ss:$16 sps:$4 sm:$0xff]   ;;  %v13517_v58 = vld [vmem:[%s18189_s2 + $0x15ac] ss:$16 sps:$4 sm:$0xff]  }
 0x5bb   :  { %5294 = vmatpush1.bf16.msra.mxu0 %v13422_v60  ;;  %5380 = vmatpush1.bf16.msra.mxu1 %v13425_v62  ;;  %v13512_v60 = vld [vmem:[%s18189_s2 + $0x15a0] ss:$16 sps:$4 sm:$0xff]   ;;  %v13515_v62 = vld [vmem:[%s18189_s2 + $0x15a8] ss:$16 sps:$4 sm:$0xff]  }
 0x5bc   :  { %5295 = vmatprep.subr.bf16.mxu0 %v13430_v63  ;;  %5381 = vmatprep.subr.bf16.mxu1 %v13433_v0  ;;  %v13520_v63 = vld [vmem:[%s18189_s2 + $0x15c4] ss:$16 sps:$4 sm:$0xff]   ;;  %v13523_v0 = vld [vmem:[%s18189_s2 + $0x15cc] ss:$16 sps:$4 sm:$0xff]  }
 0x5bf   :  { %5296 = vmatpush1.bf16.msra.mxu0 %v13428_v1  ;;  %5382 = vmatpush1.bf16.msra.mxu1 %v13431_v2  ;;  %v13518_v1 = vld [vmem:[%s18189_s2 + $0x15c0] ss:$16 sps:$4 sm:$0xff]   ;;  %v13521_v2 = vld [vmem:[%s18189_s2 + $0x15c8] ss:$16 sps:$4 sm:$0xff]  }
 0x5c0   :  { %6237 = vmatprep.subr.bf16.mxu0 %v13436_v4  ;;  %6323 = vmatprep.subr.bf16.mxu1 %v13439_v5  ;;  %v13526_v4 = vld [vmem:[%s18189_s2 + $0x15e4] ss:$16 sps:$4 sm:$0xff]   ;;  %v13529_v5 = vld [vmem:[%s18189_s2 + $0x15ec] ss:$16 sps:$4 sm:$0xff]  }
 0x5c2   :  { %5298 = vmatmul.mubr.bf16.vlgmr.msra.gmra.mrb[20].mxu0 %v16231_v61  ;;  %5384 = vmatmul.mubr.bf16.vlgmr.msra.gmra.mrb[20].mxu1 %v16231_v61  ;;  %v13451_v61 = vld [vmem:[%s18189_s2 + $0x144c] ss:$16 sps:$4 sm:$0xff]  }
 0x5c3   :  { %6238 = vmatpush1.bf16.msra.mxu0 %v13434_v6  ;;  %6324 = vmatpush1.bf16.msra.mxu1 %v13437_v7  ;;  %v13524_v6 = vld [vmem:[%s18189_s2 + $0x15e0] ss:$16 sps:$4 sm:$0xff]   ;;  %v13527_v7 = vld [vmem:[%s18189_s2 + $0x15e8] ss:$16 sps:$4 sm:$0xff]  }
 0x5c4   :  { %6239 = vmatprep.subr.bf16.mxu0 %v13442_v8  ;;  %6325 = vmatprep.subr.bf16.mxu1 %v13445_v10  ;;  %v13532_v8 = vld [vmem:[%s18189_s2 + $0x1604] ss:$16 sps:$4 sm:$0xff]   ;;  %v13535_v10 = vld [vmem:[%s18189_s2 + $0x160c] ss:$16 sps:$4 sm:$0xff]  }
 0x5c7   :  { %6240 = vmatpush1.bf16.msra.mxu0 %v13440_v11  ;;  %6326 = vmatpush1.bf16.msra.mxu1 %v13443_v12  ;;  %v11200_v11 = vld [vmem:[%s18190_s5 + $0x14] sm:$0xf] }
 0x5c8   :  { %6241 = vmatprep.subr.bf16.mxu0 %v13448_v13  ;;  %6327 = vmatprep.subr.bf16.mxu1 %v13451_v61  ;;  %v11201_v12 = vld [vmem:[%s18191_s6 + $0x14] sm:$0xf]  ;;  %v5400_v13 = vrot.slane %v11200_v11, %v14601_v38  ;;  %v5408_v61 = vrot.slane %v11200_v11, %v14615_v57 }
 0x5cb   :  { %6242 = vmatpush1.bf16.msra.mxu0 %v13446_v14  ;;  %6328 = vmatpush1.bf16.msra.mxu1 %v13449_v16  ;;  %v5404_v14 = vrot.slane %v11200_v11, %v14606_v40  ;;  %v5412_v16 = vrot.slane %v11200_v11, %v14617_v59  ;;  %v13556_v11 = vld [vmem:[%s18189_s2 + $0x1684] ss:$16 sps:$4 sm:$0xff]  }
 0x5cc   :  { %6243 = vmatprep.subr.bf16.mxu0 %v13454_v17  ;;  %6329 = vmatprep.subr.bf16.mxu1 %v13457_v18  ;;  %v5431_v17 = vrot.slane %v11201_v12, %v14601_v38  ;;  %v5439_v18 = vrot.slane %v11201_v12, %v14615_v57 }
 0x5cf   :  { %6244 = vmatpush1.bf16.msra.mxu0 %v13452_v19  ;;  %6330 = vmatpush1.bf16.msra.mxu1 %v13455_v3 }
 0x5d0   :  { %6245 = vmatprep.subr.bf16.mxu0 %v13460_v20  ;;  %6331 = vmatprep.subr.bf16.mxu1 %v13463_v21  ;;  %v5435_v20 = vrot.slane %v11201_v12, %v14606_v40  ;;  %v5443_v21 = vrot.slane %v11201_v12, %v14617_v59  ;;  %v13559_v12 = vld [vmem:[%s18189_s2 + $0x168c] ss:$16 sps:$4 sm:$0xff]  }
 0x5d3   :  { %6246 = vmatpush1.bf16.msra.mxu0 %v13458_v22  ;;  %6332 = vmatpush1.bf16.msra.mxu1 %v13461_v23 }
 0x5d4   :  { %6247 = vmatprep.subr.bf16.mxu0 %v13466_v24  ;;  %6333 = vmatprep.subr.bf16.mxu1 %v13469_v9 }
 0x5d7   :  { %6248 = vmatpush1.bf16.msra.mxu0 %v13464_v25  ;;  %6334 = vmatpush1.bf16.msra.mxu1 %v13467_v26 }
 0x5d8   :  { %6249 = vmatprep.subr.bf16.mxu0 %v13472_v27  ;;  %6335 = vmatprep.subr.bf16.mxu1 %v13475_v28 }
 0x5db   :  { %6250 = vmatpush1.bf16.msra.mxu0 %v13470_v29  ;;  %6336 = vmatpush1.bf16.msra.mxu1 %v13473_v15 }
 0x5dc   :  { %6251 = vmatprep.subr.bf16.mxu0 %v13478_v30  ;;  %6337 = vmatprep.subr.bf16.mxu1 %v13481_v31 }
 0x5df   :  { %6252 = vmatpush1.bf16.msra.mxu0 %v13476_v32  ;;  %6338 = vmatpush1.bf16.msra.mxu1 %v13479_v33 }
 0x5e0   :  { %6253 = vmatprep.subr.bf16.mxu0 %v13484_v34  ;;  %6339 = vmatprep.subr.bf16.mxu1 %v13487_v35 }
 0x5e3   :  { %6254 = vmatpush1.bf16.msra.mxu0 %v13482_v36  ;;  %6340 = vmatpush1.bf16.msra.mxu1 %v13485_v37 }
 0x5e4   :  { %6255 = vmatprep.subr.bf16.mxu0 %v13490_v39  ;;  %6341 = vmatprep.subr.bf16.mxu1 %v13493_v41 }
 0x5e7   :  { %6256 = vmatpush1.bf16.msra.mxu0 %v13488_v42  ;;  %6342 = vmatpush1.bf16.msra.mxu1 %v13491_v43 }
 0x5e8   :  { %6257 = vmatprep.subr.bf16.mxu0 %v13496_v44  ;;  %6343 = vmatprep.subr.bf16.mxu1 %v13499_v45 }
 0x5eb   :  { %6258 = vmatpush1.bf16.msra.mxu0 %v13494_v46  ;;  %6344 = vmatpush1.bf16.msra.mxu1 %v13497_v47 }
 0x5ec   :  { %6259 = vmatprep.subr.bf16.mxu0 %v13502_v48  ;;  %6345 = vmatprep.subr.bf16.mxu1 %v13505_v49 }
 0x5ef   :  { %6260 = vmatpush1.bf16.msra.mxu0 %v13500_v50  ;;  %6346 = vmatpush1.bf16.msra.mxu1 %v13503_v51 }
 0x5f0   :  { %6261 = vmatprep.subr.bf16.mxu0 %v13508_v52  ;;  %6347 = vmatprep.subr.bf16.mxu1 %v13511_v53 }
 0x5f3   :  { %6262 = vmatpush1.bf16.msra.mxu0 %v13506_v54  ;;  %6348 = vmatpush1.bf16.msra.mxu1 %v13509_v55  ;;  %v13530_v55 = vld [vmem:[%s18189_s2 + $0x1600] ss:$16 sps:$4 sm:$0xff]  }
 0x5f4   :  { %6263 = vmatprep.subr.bf16.mxu0 %v13514_v56  ;;  %6349 = vmatprep.subr.bf16.mxu1 %v13517_v58  ;;  %v13533_v56 = vld [vmem:[%s18189_s2 + $0x1608] ss:$16 sps:$4 sm:$0xff]  }
 0x5f7   :  { %6264 = vmatpush1.bf16.msra.mxu0 %v13512_v60  ;;  %6350 = vmatpush1.bf16.msra.mxu1 %v13515_v62  ;;  %v13538_v60 = vld [vmem:[%s18189_s2 + $0x1624] ss:$16 sps:$4 sm:$0xff]   ;;  %v13541_v62 = vld [vmem:[%s18189_s2 + $0x162c] ss:$16 sps:$4 sm:$0xff]  }
 0x5f8   :  { %6265 = vmatprep.subr.bf16.mxu0 %v13520_v63  ;;  %6351 = vmatprep.subr.bf16.mxu1 %v13523_v0  ;;  %v13536_v63 = vld [vmem:[%s18189_s2 + $0x1620] ss:$16 sps:$4 sm:$0xff]   ;;  %v13539_v0 = vld [vmem:[%s18189_s2 + $0x1628] ss:$16 sps:$4 sm:$0xff]  }
 0x5fb   :  { %6266 = vmatpush1.bf16.msra.mxu0 %v13518_v1  ;;  %6352 = vmatpush1.bf16.msra.mxu1 %v13521_v2  ;;  %v13544_v1 = vld [vmem:[%s18189_s2 + $0x1644] ss:$16 sps:$4 sm:$0xff]   ;;  %v13547_v2 = vld [vmem:[%s18189_s2 + $0x164c] ss:$16 sps:$4 sm:$0xff]  }
 0x5fc   :  { %6267 = vmatprep.subr.bf16.mxu0 %v13526_v4  ;;  %6353 = vmatprep.subr.bf16.mxu1 %v13529_v5  ;;  %v13542_v4 = vld [vmem:[%s18189_s2 + $0x1640] ss:$16 sps:$4 sm:$0xff]   ;;  %v13545_v5 = vld [vmem:[%s18189_s2 + $0x1648] ss:$16 sps:$4 sm:$0xff]  }
 0x5ff   :  { %6268 = vmatpush1.bf16.msra.mxu0 %v13524_v6  ;;  %6354 = vmatpush1.bf16.msra.mxu1 %v13527_v7  ;;  %v13550_v6 = vld [vmem:[%s18189_s2 + $0x1664] ss:$16 sps:$4 sm:$0xff]   ;;  %v13553_v7 = vld [vmem:[%s18189_s2 + $0x166c] ss:$16 sps:$4 sm:$0xff]  }
 0x600   :  { %6280 = vmatprep.subr.bf16.mxu0 %v13532_v8  ;;  %6366 = vmatprep.subr.bf16.mxu1 %v13535_v10  ;;  %v13548_v8 = vld [vmem:[%s18189_s2 + $0x1660] ss:$16 sps:$4 sm:$0xff]   ;;  %v13551_v10 = vld [vmem:[%s18189_s2 + $0x1668] ss:$16 sps:$4 sm:$0xff]  }
 0x695   :  { %v5299_v19 = vpop.f32.mrb[20].mxu0  ;;  %v5385_v3 = vpop.f32.mrb[20].mxu1 }
 0x696   :  { %v5417_v22 = vmul.f32 %v5400_v13, %v5299_v19  ;;  %v5419_v23 = vmul.f32 %v5408_v61, %v5385_v3  ;;  %v5301_v24 = vpop.f32.mrb[21].mxu0  ;;  %v5387_v9 = vpop.f32.mrb[21].mxu1  ;;  %v13568_v19 = vld [vmem:[%s18189_s2 + $0x16c4] ss:$16 sps:$4 sm:$0xff]   ;;  %v13571_v3 = vld [vmem:[%s18189_s2 + $0x16cc] ss:$16 sps:$4 sm:$0xff]  }
 0x697   :  { %v5418_v25 = vmul.f32 %v5404_v14, %v5301_v24  ;;  %v5420_v26 = vmul.f32 %v5412_v16, %v5387_v9  ;;  %v5303_v27 = vpop.f32.mrb[22].mxu0  ;;  %v5389_v28 = vpop.f32.mrb[22].mxu1  ;;  %v13572_v24 = vld [vmem:[%s18189_s2 + $0x16e0] ss:$16 sps:$4 sm:$0xff]   ;;  %v13575_v9 = vld [vmem:[%s18189_s2 + $0x16e8] ss:$16 sps:$4 sm:$0xff]  }
 0x698   :  { %v5448_v29 = vadd.f32 %v5431_v17, %v5417_v22  ;;  %v5450_v15 = vadd.f32 %v5439_v18, %v5419_v23  ;;  %v5421_v30 = vmul.f32 %v5400_v13, %v5303_v27  ;;  %v5423_v31 = vmul.f32 %v5408_v61, %v5389_v28  ;;  %v5305_v32 = vpop.f32.mrb[23].mxu0  ;;  %v5391_v33 = vpop.f32.mrb[23].mxu1  ;;  %v13554_v13 = vld [vmem:[%s18189_s2 + $0x1680] ss:$16 sps:$4 sm:$0xff]   ;;  %v13557_v61 = vld [vmem:[%s18189_s2 + $0x1688] ss:$16 sps:$4 sm:$0xff]  }
 0x699   :  { %v5449_v34 = vadd.f32 %v5435_v20, %v5418_v25  ;;  %v5451_v35 = vadd.f32 %v5443_v21, %v5420_v26  ;;  %v5422_v36 = vmul.f32 %v5404_v14, %v5305_v32  ;;  %v5424_v37 = vmul.f32 %v5412_v16, %v5391_v33  ;;  %v13562_v14 = vld [vmem:[%s18189_s2 + $0x16a4] ss:$16 sps:$4 sm:$0xff]   ;;  %v13565_v16 = vld [vmem:[%s18189_s2 + $0x16ac] ss:$16 sps:$4 sm:$0xff]   ;;  %v13578_v27 = vld [vmem:[%s18189_s2 + $0x1700] ss:$16 sps:$4 sm:$0xff]  }
 0x69a   :  { %v5452_v39 = vadd.f32 %v5431_v17, %v5421_v30  ;;  %v5454_v41 = vadd.f32 %v5439_v18, %v5423_v31  ;;  %v5456_v44 = vmax.f32 %v5448_v29, 0.0  ;;  %v5458_v45 = vmax.f32 %v5450_v15, 0.0  ;;  %v13560_v17 = vld [vmem:[%s18189_s2 + $0x16a0] ss:$16 sps:$4 sm:$0xff]   ;;  %v13563_v18 = vld [vmem:[%s18189_s2 + $0x16a8] ss:$16 sps:$4 sm:$0xff]  }
 0x69b   :  { %v5453_v42 = vadd.f32 %v5435_v20, %v5422_v36  ;;  %v5455_v43 = vadd.f32 %v5443_v21, %v5424_v37  ;;  %v5457_v48 = vmax.f32 %v5449_v34, 0.0  ;;  %v5459_v49 = vmax.f32 %v5451_v35, 0.0  ;;  %v13566_v20 = vld [vmem:[%s18189_s2 + $0x16c0] ss:$16 sps:$4 sm:$0xff]   ;;  %v13569_v21 = vld [vmem:[%s18189_s2 + $0x16c8] ss:$16 sps:$4 sm:$0xff]  }
 0x69c   :  { %v5460_v46 = vmax.f32 %v5452_v39, 0.0  ;;  %v5462_v47 = vmax.f32 %v5454_v41, 0.0  ;;  %v13574_v22 = vld [vmem:[%s18189_s2 + $0x16e4] ss:$16 sps:$4 sm:$0xff]   ;;  %v13577_v23 = vld [vmem:[%s18189_s2 + $0x16ec] ss:$16 sps:$4 sm:$0xff]  }
 0x69d   :  { %v5461_v50 = vmax.f32 %v5453_v42, 0.0  ;;  %v5463_v51 = vmax.f32 %v5455_v43, 0.0  ;;  %v13580_v25 = vld [vmem:[%s18189_s2 + $0x1704] ss:$16 sps:$4 sm:$0xff]   ;;  %v13583_v26 = vld [vmem:[%s18189_s2 + $0x170c] ss:$16 sps:$4 sm:$0xff]  }
 0x69e   :  { %v5464_v52 = vpack.c.bf16 %v5460_v46, %v5456_v44  ;;  %v16633_v53 = vpack.c.bf16 %v5462_v47, %v5458_v45  ;;  %v13581_v28 = vld [vmem:[%s18189_s2 + $0x1708] ss:$16 sps:$4 sm:$0xff]   ;;  %v13586_v29 = vld [vmem:[%s18189_s2 + $0x1724] ss:$16 sps:$4 sm:$0xff]   ;;  %v13589_v15 = vld [vmem:[%s18189_s2 + $0x172c] ss:$16 sps:$4 sm:$0xff]  }
 0x69f   :  { %v5465_v54 = vpack.c.bf16 %v5461_v50, %v5457_v48  ;;  %v5467_v58 = vpack.c.bf16 %v5463_v51, %v5459_v49  ;;  %v13584_v30 = vld [vmem:[%s18189_s2 + $0x1720] ss:$16 sps:$4 sm:$0xff]   ;;  %v13587_v31 = vld [vmem:[%s18189_s2 + $0x1728] ss:$16 sps:$4 sm:$0xff]   ;;  %v13592_v32 = vld [vmem:[%s18189_s2 + $0x1744] ss:$16 sps:$4 sm:$0xff]  }
 0x6a0   :  { %v13595_v33 = vld [vmem:[%s18189_s2 + $0x174c] ss:$16 sps:$4 sm:$0xff]   ;;  %v13590_v34 = vld [vmem:[%s18189_s2 + $0x1740] ss:$16 sps:$4 sm:$0xff]   ;;  %v13593_v35 = vld [vmem:[%s18189_s2 + $0x1748] ss:$16 sps:$4 sm:$0xff]  }
 0x6a1   :  { %6269 = vmatprep.mubr.bf16.mxu0 %v5465_v54  ;;  %6355 = vmatprep.mubr.bf16.mxu1 %v5465_v54  ;;  %v13598_v36 = vld [vmem:[%s18189_s2 + $0x1764] ss:$16 sps:$4 sm:$0xff]   ;;  %v13601_v37 = vld [vmem:[%s18189_s2 + $0x176c] ss:$16 sps:$4 sm:$0xff]   ;;  %v13596_v39 = vld [vmem:[%s18189_s2 + $0x1760] ss:$16 sps:$4 sm:$0xff]  }
 0x6a2   :  { %6270 = vmatmul.mubr.bf16.vlgmr.msra.gmra.mrb[24].mxu0 %v5464_v52  ;;  %6356 = vmatmul.mubr.bf16.vlgmr.msra.gmra.mrb[24].mxu1 %v5464_v52  ;;  %v13599_v41 = vld [vmem:[%s18189_s2 + $0x1768] ss:$16 sps:$4 sm:$0xff]   ;;  %v13604_v42 = vld [vmem:[%s18189_s2 + $0x1784] ss:$16 sps:$4 sm:$0xff]   ;;  %v13607_v43 = vld [vmem:[%s18189_s2 + $0x178c] ss:$16 sps:$4 sm:$0xff]  }
 0x6a3   :  { %6281 = vmatpush1.bf16.msra.mxu0 %v13530_v55  ;;  %6367 = vmatpush1.bf16.msra.mxu1 %v13533_v56  ;;  %v13602_v44 = vld [vmem:[%s18189_s2 + $0x1780] ss:$16 sps:$4 sm:$0xff]   ;;  %v13605_v45 = vld [vmem:[%s18189_s2 + $0x1788] ss:$16 sps:$4 sm:$0xff]   ;;  %v13610_v46 = vld [vmem:[%s18189_s2 + $0x17a4] ss:$16 sps:$4 sm:$0xff]  }
 0x6a4   :  { %6312 = vmatprep.mubr.bf16.mxu0 %v5467_v58  ;;  %6398 = vmatprep.mubr.bf16.mxu1 %v5467_v58  ;;  %v13613_v47 = vld [vmem:[%s18189_s2 + $0x17ac] ss:$16 sps:$4 sm:$0xff]   ;;  %v13608_v48 = vld [vmem:[%s18189_s2 + $0x17a0] ss:$16 sps:$4 sm:$0xff]   ;;  %v13611_v49 = vld [vmem:[%s18189_s2 + $0x17a8] ss:$16 sps:$4 sm:$0xff]  }
 0x6a5   :  { %6282 = vmatprep.subr.bf16.mxu0 %v13538_v60  ;;  %6368 = vmatprep.subr.bf16.mxu1 %v13541_v62  ;;  %v13616_v50 = vld [vmem:[%s18189_s2 + $0x17c4] ss:$16 sps:$4 sm:$0xff]   ;;  %v13619_v51 = vld [vmem:[%s18189_s2 + $0x17cc] ss:$16 sps:$4 sm:$0xff]   ;;  %v13614_v52 = vld [vmem:[%s18189_s2 + $0x17c0] ss:$16 sps:$4 sm:$0xff]  }
 0x6a6   :  { %v13617_v54 = vld [vmem:[%s18189_s2 + $0x17c8] ss:$16 sps:$4 sm:$0xff]   ;;  %v13622_v55 = vld [vmem:[%s18189_s2 + $0x17e4] ss:$16 sps:$4 sm:$0xff]   ;;  %v13625_v56 = vld [vmem:[%s18189_s2 + $0x17ec] ss:$16 sps:$4 sm:$0xff]  }
 0x6a7   :  { %6283 = vmatpush1.bf16.msra.mxu0 %v13536_v63  ;;  %6369 = vmatpush1.bf16.msra.mxu1 %v13539_v0  ;;  %v13620_v58 = vld [vmem:[%s18189_s2 + $0x17e0] ss:$16 sps:$4 sm:$0xff]   ;;  %v13623_v60 = vld [vmem:[%s18189_s2 + $0x17e8] ss:$16 sps:$4 sm:$0xff]   ;;  %v13628_v62 = vld [vmem:[%s18189_s2 + $0x1804] ss:$16 sps:$4 sm:$0xff]  }
 0x6a8   :  { %6284 = vmatprep.subr.bf16.mxu0 %v13544_v1  ;;  %6370 = vmatprep.subr.bf16.mxu1 %v13547_v2  ;;  %v13631_v63 = vld [vmem:[%s18189_s2 + $0x180c] ss:$16 sps:$4 sm:$0xff]   ;;  %v13626_v0 = vld [vmem:[%s18189_s2 + $0x1800] ss:$16 sps:$4 sm:$0xff]   ;;  %v13629_v1 = vld [vmem:[%s18189_s2 + $0x1808] ss:$16 sps:$4 sm:$0xff]  }
 0x6a9   :  { %v13634_v2 = vld [vmem:[%s18189_s2 + $0x1824] ss:$16 sps:$4 sm:$0xff]  }
 0x6ab   :  { %6285 = vmatpush1.bf16.msra.mxu0 %v13542_v4  ;;  %6371 = vmatpush1.bf16.msra.mxu1 %v13545_v5  ;;  %v13637_v4 = vld [vmem:[%s18189_s2 + $0x182c] ss:$16 sps:$4 sm:$0xff]   ;;  %v13632_v5 = vld [vmem:[%s18189_s2 + $0x1820] ss:$16 sps:$4 sm:$0xff]  }
 0x6ac   :  { %6286 = vmatprep.subr.bf16.mxu0 %v13550_v6  ;;  %6372 = vmatprep.subr.bf16.mxu1 %v13553_v7  ;;  %v13635_v6 = vld [vmem:[%s18189_s2 + $0x1828] ss:$16 sps:$4 sm:$0xff]   ;;  %v13640_v7 = vld [vmem:[%s18189_s2 + $0x1844] ss:$16 sps:$4 sm:$0xff]  }
 0x6af   :  { %6287 = vmatpush1.bf16.msra.mxu0 %v13548_v8  ;;  %6373 = vmatpush1.bf16.msra.mxu1 %v13551_v10  ;;  %v13638_v8 = vld [vmem:[%s18189_s2 + $0x1840] ss:$16 sps:$4 sm:$0xff]   ;;  %v13641_v10 = vld [vmem:[%s18189_s2 + $0x1848] ss:$16 sps:$4 sm:$0xff]  }
 0x6b0   :  { %6288 = vmatprep.subr.bf16.mxu0 %v13556_v11  ;;  %6374 = vmatprep.subr.bf16.mxu1 %v13559_v12  ;;  %v13646_v11 = vld [vmem:[%s18189_s2 + $0x1864] ss:$16 sps:$4 sm:$0xff]   ;;  %v13649_v12 = vld [vmem:[%s18189_s2 + $0x186c] ss:$16 sps:$4 sm:$0xff]  }
 0x6b3   :  { %6289 = vmatpush1.bf16.msra.mxu0 %v13554_v13  ;;  %6375 = vmatpush1.bf16.msra.mxu1 %v13557_v61  ;;  %v13644_v13 = vld [vmem:[%s18189_s2 + $0x1860] ss:$16 sps:$4 sm:$0xff]   ;;  %v13647_v61 = vld [vmem:[%s18189_s2 + $0x1868] ss:$16 sps:$4 sm:$0xff]  }
 0x6b4   :  { %6290 = vmatprep.subr.bf16.mxu0 %v13562_v14  ;;  %6376 = vmatprep.subr.bf16.mxu1 %v13565_v16  ;;  %v13652_v14 = vld [vmem:[%s18189_s2 + $0x1884] ss:$16 sps:$4 sm:$0xff]   ;;  %v13655_v16 = vld [vmem:[%s18189_s2 + $0x188c] ss:$16 sps:$4 sm:$0xff]  }
 0x6b7   :  { %6291 = vmatpush1.bf16.msra.mxu0 %v13560_v17  ;;  %6377 = vmatpush1.bf16.msra.mxu1 %v13563_v18  ;;  %v13650_v17 = vld [vmem:[%s18189_s2 + $0x1880] ss:$16 sps:$4 sm:$0xff]   ;;  %v13653_v18 = vld [vmem:[%s18189_s2 + $0x1888] ss:$16 sps:$4 sm:$0xff]  }
 0x6b8   :  { %6292 = vmatprep.subr.bf16.mxu0 %v13568_v19  ;;  %6378 = vmatprep.subr.bf16.mxu1 %v13571_v3  ;;  %v13658_v19 = vld [vmem:[%s18189_s2 + $0x18a4] ss:$16 sps:$4 sm:$0xff]   ;;  %v13661_v3 = vld [vmem:[%s18189_s2 + $0x18ac] ss:$16 sps:$4 sm:$0xff]  }
 0x6bb   :  { %6293 = vmatpush1.bf16.msra.mxu0 %v13566_v20  ;;  %6379 = vmatpush1.bf16.msra.mxu1 %v13569_v21  ;;  %v13656_v20 = vld [vmem:[%s18189_s2 + $0x18a0] ss:$16 sps:$4 sm:$0xff]   ;;  %v13659_v21 = vld [vmem:[%s18189_s2 + $0x18a8] ss:$16 sps:$4 sm:$0xff]  }
 0x6bc   :  { %6294 = vmatprep.subr.bf16.mxu0 %v13574_v22  ;;  %6380 = vmatprep.subr.bf16.mxu1 %v13577_v23  ;;  %v13664_v22 = vld [vmem:[%s18189_s2 + $0x18c4] ss:$16 sps:$4 sm:$0xff]   ;;  %v13667_v23 = vld [vmem:[%s18189_s2 + $0x18cc] ss:$16 sps:$4 sm:$0xff]  }
 0x6bf   :  { %6295 = vmatpush1.bf16.msra.mxu0 %v13572_v24  ;;  %6381 = vmatpush1.bf16.msra.mxu1 %v13575_v9  ;;  %v13662_v24 = vld [vmem:[%s18189_s2 + $0x18c0] ss:$16 sps:$4 sm:$0xff]   ;;  %v13665_v9 = vld [vmem:[%s18189_s2 + $0x18c8] ss:$16 sps:$4 sm:$0xff]  }
 0x6c0   :  { %6296 = vmatprep.subr.bf16.mxu0 %v13580_v25  ;;  %6382 = vmatprep.subr.bf16.mxu1 %v13583_v26  ;;  %v13670_v25 = vld [vmem:[%s18189_s2 + $0x18e4] ss:$16 sps:$4 sm:$0xff]   ;;  %v13673_v26 = vld [vmem:[%s18189_s2 + $0x18ec] ss:$16 sps:$4 sm:$0xff]  }
 0x6c3   :  { %6297 = vmatpush1.bf16.msra.mxu0 %v13578_v27  ;;  %6383 = vmatpush1.bf16.msra.mxu1 %v13581_v28  ;;  %v13668_v27 = vld [vmem:[%s18189_s2 + $0x18e0] ss:$16 sps:$4 sm:$0xff]   ;;  %v13671_v28 = vld [vmem:[%s18189_s2 + $0x18e8] ss:$16 sps:$4 sm:$0xff]  }
 0x6c4   :  { %6298 = vmatprep.subr.bf16.mxu0 %v13586_v29  ;;  %6384 = vmatprep.subr.bf16.mxu1 %v13589_v15  ;;  %v13676_v29 = vld [vmem:[%s18189_s2 + $0x1904] ss:$16 sps:$4 sm:$0xff]   ;;  %v13679_v15 = vld [vmem:[%s18189_s2 + $0x190c] ss:$16 sps:$4 sm:$0xff]  }
 0x6c7   :  { %6299 = vmatpush1.bf16.msra.mxu0 %v13584_v30  ;;  %6385 = vmatpush1.bf16.msra.mxu1 %v13587_v31  ;;  %v13674_v30 = vld [vmem:[%s18189_s2 + $0x1900] ss:$16 sps:$4 sm:$0xff]   ;;  %v13677_v31 = vld [vmem:[%s18189_s2 + $0x1908] ss:$16 sps:$4 sm:$0xff]  }
 0x6c8   :  { %6300 = vmatprep.subr.bf16.mxu0 %v13592_v32  ;;  %6386 = vmatprep.subr.bf16.mxu1 %v13595_v33  ;;  %v13682_v32 = vld [vmem:[%s18189_s2 + $0x1924] ss:$16 sps:$4 sm:$0xff]   ;;  %v13685_v33 = vld [vmem:[%s18189_s2 + $0x192c] ss:$16 sps:$4 sm:$0xff]  }
 0x6cb   :  { %6301 = vmatpush1.bf16.msra.mxu0 %v13590_v34  ;;  %6387 = vmatpush1.bf16.msra.mxu1 %v13593_v35  ;;  %v13680_v34 = vld [vmem:[%s18189_s2 + $0x1920] ss:$16 sps:$4 sm:$0xff]   ;;  %v13683_v35 = vld [vmem:[%s18189_s2 + $0x1928] ss:$16 sps:$4 sm:$0xff]  }
 0x6cc   :  { %6302 = vmatprep.subr.bf16.mxu0 %v13598_v36  ;;  %6388 = vmatprep.subr.bf16.mxu1 %v13601_v37  ;;  %v13688_v36 = vld [vmem:[%s18189_s2 + $0x1944] ss:$16 sps:$4 sm:$0xff]   ;;  %v13691_v37 = vld [vmem:[%s18189_s2 + $0x194c] ss:$16 sps:$4 sm:$0xff]  }
 0x6cf   :  { %6303 = vmatpush1.bf16.msra.mxu0 %v13596_v39  ;;  %6389 = vmatpush1.bf16.msra.mxu1 %v13599_v41  ;;  %v13686_v39 = vld [vmem:[%s18189_s2 + $0x1940] ss:$16 sps:$4 sm:$0xff]   ;;  %v13689_v41 = vld [vmem:[%s18189_s2 + $0x1948] ss:$16 sps:$4 sm:$0xff]  }
 0x6d0   :  { %6304 = vmatprep.subr.bf16.mxu0 %v13604_v42  ;;  %6390 = vmatprep.subr.bf16.mxu1 %v13607_v43  ;;  %v13694_v42 = vld [vmem:[%s18189_s2 + $0x1964] ss:$16 sps:$4 sm:$0xff]   ;;  %v13697_v43 = vld [vmem:[%s18189_s2 + $0x196c] ss:$16 sps:$4 sm:$0xff]  }
 0x6d3   :  { %6305 = vmatpush1.bf16.msra.mxu0 %v13602_v44  ;;  %6391 = vmatpush1.bf16.msra.mxu1 %v13605_v45  ;;  %v13692_v44 = vld [vmem:[%s18189_s2 + $0x1960] ss:$16 sps:$4 sm:$0xff]   ;;  %v13695_v45 = vld [vmem:[%s18189_s2 + $0x1968] ss:$16 sps:$4 sm:$0xff]  }
 0x6d4   :  { %6306 = vmatprep.subr.bf16.mxu0 %v13610_v46  ;;  %6392 = vmatprep.subr.bf16.mxu1 %v13613_v47  ;;  %v13700_v46 = vld [vmem:[%s18189_s2 + $0x1984] ss:$16 sps:$4 sm:$0xff]   ;;  %v13703_v47 = vld [vmem:[%s18189_s2 + $0x198c] ss:$16 sps:$4 sm:$0xff]  }
 0x6d7   :  { %6307 = vmatpush1.bf16.msra.mxu0 %v13608_v48  ;;  %6393 = vmatpush1.bf16.msra.mxu1 %v13611_v49  ;;  %v13698_v48 = vld [vmem:[%s18189_s2 + $0x1980] ss:$16 sps:$4 sm:$0xff]   ;;  %v13701_v49 = vld [vmem:[%s18189_s2 + $0x1988] ss:$16 sps:$4 sm:$0xff]  }
 0x6d8   :  { %6308 = vmatprep.subr.bf16.mxu0 %v13616_v50  ;;  %6394 = vmatprep.subr.bf16.mxu1 %v13619_v51  ;;  %v13706_v50 = vld [vmem:[%s18189_s2 + $0x19a4] ss:$16 sps:$4 sm:$0xff]   ;;  %v13709_v51 = vld [vmem:[%s18189_s2 + $0x19ac] ss:$16 sps:$4 sm:$0xff]  }
 0x6db   :  { %6309 = vmatpush1.bf16.msra.mxu0 %v13614_v52  ;;  %6395 = vmatpush1.bf16.msra.mxu1 %v13617_v54  ;;  %v13704_v52 = vld [vmem:[%s18189_s2 + $0x19a0] ss:$16 sps:$4 sm:$0xff]   ;;  %v13707_v54 = vld [vmem:[%s18189_s2 + $0x19a8] ss:$16 sps:$4 sm:$0xff]  }
 0x6dc   :  { %6310 = vmatprep.subr.bf16.mxu0 %v13622_v55  ;;  %6396 = vmatprep.subr.bf16.mxu1 %v13625_v56  ;;  %v13712_v55 = vld [vmem:[%s18189_s2 + $0x19c4] ss:$16 sps:$4 sm:$0xff]   ;;  %v13715_v56 = vld [vmem:[%s18189_s2 + $0x19cc] ss:$16 sps:$4 sm:$0xff]  }
 0x6df   :  { %6311 = vmatpush1.bf16.msra.mxu0 %v13620_v58  ;;  %6397 = vmatpush1.bf16.msra.mxu1 %v13623_v60  ;;  %v13710_v58 = vld [vmem:[%s18189_s2 + $0x19c0] ss:$16 sps:$4 sm:$0xff]   ;;  %v13713_v60 = vld [vmem:[%s18189_s2 + $0x19c8] ss:$16 sps:$4 sm:$0xff]  }
 0x6e0   :  { %7252 = vmatprep.subr.bf16.mxu0 %v13628_v62  ;;  %7338 = vmatprep.subr.bf16.mxu1 %v13631_v63  ;;  %v13718_v62 = vld [vmem:[%s18189_s2 + $0x19e4] ss:$16 sps:$4 sm:$0xff]   ;;  %v13721_v63 = vld [vmem:[%s18189_s2 + $0x19ec] ss:$16 sps:$4 sm:$0xff]  }
 0x6e2   :  { %6313 = vmatmul.mubr.bf16.vlgmr.msra.gmra.mrb[24].mxu0 %v16633_v53  ;;  %6399 = vmatmul.mubr.bf16.vlgmr.msra.gmra.mrb[24].mxu1 %v16633_v53  ;;  %v13643_v53 = vld [vmem:[%s18189_s2 + $0x184c] ss:$16 sps:$4 sm:$0xff]  }
 0x6e3   :  { %7253 = vmatpush1.bf16.msra.mxu0 %v13626_v0  ;;  %7339 = vmatpush1.bf16.msra.mxu1 %v13629_v1  ;;  %v13716_v0 = vld [vmem:[%s18189_s2 + $0x19e0] ss:$16 sps:$4 sm:$0xff]   ;;  %v13719_v1 = vld [vmem:[%s18189_s2 + $0x19e8] ss:$16 sps:$4 sm:$0xff]  }
 0x6e4   :  { %7254 = vmatprep.subr.bf16.mxu0 %v13634_v2  ;;  %7340 = vmatprep.subr.bf16.mxu1 %v13637_v4  ;;  %v13724_v2 = vld [vmem:[%s18189_s2 + $0x1a04] ss:$16 sps:$4 sm:$0xff]   ;;  %v13727_v4 = vld [vmem:[%s18189_s2 + $0x1a0c] ss:$16 sps:$4 sm:$0xff]  }
 0x6e7   :  { %7255 = vmatpush1.bf16.msra.mxu0 %v13632_v5  ;;  %7341 = vmatpush1.bf16.msra.mxu1 %v13635_v6  ;;  %v11458_v5 = vld [vmem:[%s18190_s5 + $0x18] sm:$0xf] }
 0x6e8   :  { %7256 = vmatprep.subr.bf16.mxu0 %v13640_v7  ;;  %7342 = vmatprep.subr.bf16.mxu1 %v13643_v53  ;;  %v11459_v6 = vld [vmem:[%s18191_s6 + $0x18] sm:$0xf]  ;;  %v6415_v7 = vrot.slane %v11458_v5, %v14601_v38  ;;  %v6423_v53 = vrot.slane %v11458_v5, %v14615_v57 }
 0x6eb   :  { %7257 = vmatpush1.bf16.msra.mxu0 %v13638_v8  ;;  %7343 = vmatpush1.bf16.msra.mxu1 %v13641_v10  ;;  %v6419_v8 = vrot.slane %v11458_v5, %v14606_v40  ;;  %v6427_v10 = vrot.slane %v11458_v5, %v14617_v59  ;;  %v13748_v5 = vld [vmem:[%s18189_s2 + $0x1a84] ss:$16 sps:$4 sm:$0xff]  }
 0x6ec   :  { %7258 = vmatprep.subr.bf16.mxu0 %v13646_v11  ;;  %7344 = vmatprep.subr.bf16.mxu1 %v13649_v12  ;;  %v6446_v11 = vrot.slane %v11459_v6, %v14601_v38  ;;  %v6454_v12 = vrot.slane %v11459_v6, %v14615_v57 }
 0x6ef   :  { %7259 = vmatpush1.bf16.msra.mxu0 %v13644_v13  ;;  %7345 = vmatpush1.bf16.msra.mxu1 %v13647_v61 }
 0x6f0   :  { %7260 = vmatprep.subr.bf16.mxu0 %v13652_v14  ;;  %7346 = vmatprep.subr.bf16.mxu1 %v13655_v16  ;;  %v6450_v14 = vrot.slane %v11459_v6, %v14606_v40  ;;  %v6458_v16 = vrot.slane %v11459_v6, %v14617_v59  ;;  %v13751_v6 = vld [vmem:[%s18189_s2 + $0x1a8c] ss:$16 sps:$4 sm:$0xff]  }
 0x6f3   :  { %7261 = vmatpush1.bf16.msra.mxu0 %v13650_v17  ;;  %7347 = vmatpush1.bf16.msra.mxu1 %v13653_v18 }
 0x6f4   :  { %7262 = vmatprep.subr.bf16.mxu0 %v13658_v19  ;;  %7348 = vmatprep.subr.bf16.mxu1 %v13661_v3 }
 0x6f7   :  { %7263 = vmatpush1.bf16.msra.mxu0 %v13656_v20  ;;  %7349 = vmatpush1.bf16.msra.mxu1 %v13659_v21 }
 0x6f8   :  { %7264 = vmatprep.subr.bf16.mxu0 %v13664_v22  ;;  %7350 = vmatprep.subr.bf16.mxu1 %v13667_v23 }
 0x6fb   :  { %7265 = vmatpush1.bf16.msra.mxu0 %v13662_v24  ;;  %7351 = vmatpush1.bf16.msra.mxu1 %v13665_v9 }
 0x6fc   :  { %7266 = vmatprep.subr.bf16.mxu0 %v13670_v25  ;;  %7352 = vmatprep.subr.bf16.mxu1 %v13673_v26 }
 0x6ff   :  { %7267 = vmatpush1.bf16.msra.mxu0 %v13668_v27  ;;  %7353 = vmatpush1.bf16.msra.mxu1 %v13671_v28 }
 0x700   :  { %7268 = vmatprep.subr.bf16.mxu0 %v13676_v29  ;;  %7354 = vmatprep.subr.bf16.mxu1 %v13679_v15 }
 0x703   :  { %7269 = vmatpush1.bf16.msra.mxu0 %v13674_v30  ;;  %7355 = vmatpush1.bf16.msra.mxu1 %v13677_v31 }
 0x704   :  { %7270 = vmatprep.subr.bf16.mxu0 %v13682_v32  ;;  %7356 = vmatprep.subr.bf16.mxu1 %v13685_v33 }
 0x707   :  { %7271 = vmatpush1.bf16.msra.mxu0 %v13680_v34  ;;  %7357 = vmatpush1.bf16.msra.mxu1 %v13683_v35 }
 0x708   :  { %7272 = vmatprep.subr.bf16.mxu0 %v13688_v36  ;;  %7358 = vmatprep.subr.bf16.mxu1 %v13691_v37 }
 0x70b   :  { %7273 = vmatpush1.bf16.msra.mxu0 %v13686_v39  ;;  %7359 = vmatpush1.bf16.msra.mxu1 %v13689_v41 }
 0x70c   :  { %7274 = vmatprep.subr.bf16.mxu0 %v13694_v42  ;;  %7360 = vmatprep.subr.bf16.mxu1 %v13697_v43 }
 0x70f   :  { %7275 = vmatpush1.bf16.msra.mxu0 %v13692_v44  ;;  %7361 = vmatpush1.bf16.msra.mxu1 %v13695_v45 }
 0x710   :  { %7276 = vmatprep.subr.bf16.mxu0 %v13700_v46  ;;  %7362 = vmatprep.subr.bf16.mxu1 %v13703_v47 }
 0x713   :  { %7277 = vmatpush1.bf16.msra.mxu0 %v13698_v48  ;;  %7363 = vmatpush1.bf16.msra.mxu1 %v13701_v49  ;;  %v13722_v49 = vld [vmem:[%s18189_s2 + $0x1a00] ss:$16 sps:$4 sm:$0xff]  }
 0x714   :  { %7278 = vmatprep.subr.bf16.mxu0 %v13706_v50  ;;  %7364 = vmatprep.subr.bf16.mxu1 %v13709_v51  ;;  %v13725_v50 = vld [vmem:[%s18189_s2 + $0x1a08] ss:$16 sps:$4 sm:$0xff]  }
 0x717   :  { %7279 = vmatpush1.bf16.msra.mxu0 %v13704_v52  ;;  %7365 = vmatpush1.bf16.msra.mxu1 %v13707_v54  ;;  %v13730_v52 = vld [vmem:[%s18189_s2 + $0x1a24] ss:$16 sps:$4 sm:$0xff]   ;;  %v13733_v54 = vld [vmem:[%s18189_s2 + $0x1a2c] ss:$16 sps:$4 sm:$0xff]  }
 0x718   :  { %7280 = vmatprep.subr.bf16.mxu0 %v13712_v55  ;;  %7366 = vmatprep.subr.bf16.mxu1 %v13715_v56  ;;  %v13728_v55 = vld [vmem:[%s18189_s2 + $0x1a20] ss:$16 sps:$4 sm:$0xff]   ;;  %v13731_v56 = vld [vmem:[%s18189_s2 + $0x1a28] ss:$16 sps:$4 sm:$0xff]  }
 0x71b   :  { %7281 = vmatpush1.bf16.msra.mxu0 %v13710_v58  ;;  %7367 = vmatpush1.bf16.msra.mxu1 %v13713_v60  ;;  %v13736_v58 = vld [vmem:[%s18189_s2 + $0x1a44] ss:$16 sps:$4 sm:$0xff]   ;;  %v13739_v60 = vld [vmem:[%s18189_s2 + $0x1a4c] ss:$16 sps:$4 sm:$0xff]  }
 0x71c   :  { %7282 = vmatprep.subr.bf16.mxu0 %v13718_v62  ;;  %7368 = vmatprep.subr.bf16.mxu1 %v13721_v63  ;;  %v13734_v62 = vld [vmem:[%s18189_s2 + $0x1a40] ss:$16 sps:$4 sm:$0xff]   ;;  %v13737_v63 = vld [vmem:[%s18189_s2 + $0x1a48] ss:$16 sps:$4 sm:$0xff]  }
 0x71f   :  { %7283 = vmatpush1.bf16.msra.mxu0 %v13716_v0  ;;  %7369 = vmatpush1.bf16.msra.mxu1 %v13719_v1  ;;  %v13742_v0 = vld [vmem:[%s18189_s2 + $0x1a64] ss:$16 sps:$4 sm:$0xff]   ;;  %v13745_v1 = vld [vmem:[%s18189_s2 + $0x1a6c] ss:$16 sps:$4 sm:$0xff]  }
 0x720   :  { %7295 = vmatprep.subr.bf16.mxu0 %v13724_v2  ;;  %7381 = vmatprep.subr.bf16.mxu1 %v13727_v4  ;;  %v13740_v2 = vld [vmem:[%s18189_s2 + $0x1a60] ss:$16 sps:$4 sm:$0xff]   ;;  %v13743_v4 = vld [vmem:[%s18189_s2 + $0x1a68] ss:$16 sps:$4 sm:$0xff]  }
 0x7b5   :  { %v6314_v13 = vpop.f32.mrb[24].mxu0  ;;  %v6400_v61 = vpop.f32.mrb[24].mxu1 }
 0x7b6   :  { %v6432_v17 = vmul.f32 %v6415_v7, %v6314_v13  ;;  %v6434_v18 = vmul.f32 %v6423_v53, %v6400_v61  ;;  %v6316_v19 = vpop.f32.mrb[25].mxu0  ;;  %v6402_v3 = vpop.f32.mrb[25].mxu1  ;;  %v13760_v13 = vld [vmem:[%s18189_s2 + $0x1ac4] ss:$16 sps:$4 sm:$0xff]   ;;  %v13763_v61 = vld [vmem:[%s18189_s2 + $0x1acc] ss:$16 sps:$4 sm:$0xff]  }
 0x7b7   :  { %v6433_v20 = vmul.f32 %v6419_v8, %v6316_v19  ;;  %v6435_v21 = vmul.f32 %v6427_v10, %v6402_v3  ;;  %v6318_v22 = vpop.f32.mrb[26].mxu0  ;;  %v6404_v23 = vpop.f32.mrb[26].mxu1  ;;  %v13764_v19 = vld [vmem:[%s18189_s2 + $0x1ae0] ss:$16 sps:$4 sm:$0xff]   ;;  %v13767_v3 = vld [vmem:[%s18189_s2 + $0x1ae8] ss:$16 sps:$4 sm:$0xff]  }
 0x7b8   :  { %v6463_v24 = vadd.f32 %v6446_v11, %v6432_v17  ;;  %v6465_v9 = vadd.f32 %v6454_v12, %v6434_v18  ;;  %v6436_v25 = vmul.f32 %v6415_v7, %v6318_v22  ;;  %v6438_v26 = vmul.f32 %v6423_v53, %v6404_v23  ;;  %v6320_v27 = vpop.f32.mrb[27].mxu0  ;;  %v6406_v28 = vpop.f32.mrb[27].mxu1  ;;  %v13746_v7 = vld [vmem:[%s18189_s2 + $0x1a80] ss:$16 sps:$4 sm:$0xff]   ;;  %v13749_v53 = vld [vmem:[%s18189_s2 + $0x1a88] ss:$16 sps:$4 sm:$0xff]  }
 0x7b9   :  { %v6464_v29 = vadd.f32 %v6450_v14, %v6433_v20  ;;  %v6466_v15 = vadd.f32 %v6458_v16, %v6435_v21  ;;  %v6437_v30 = vmul.f32 %v6419_v8, %v6320_v27  ;;  %v6439_v31 = vmul.f32 %v6427_v10, %v6406_v28  ;;  %v13754_v8 = vld [vmem:[%s18189_s2 + $0x1aa4] ss:$16 sps:$4 sm:$0xff]   ;;  %v13757_v10 = vld [vmem:[%s18189_s2 + $0x1aac] ss:$16 sps:$4 sm:$0xff]   ;;  %v13770_v22 = vld [vmem:[%s18189_s2 + $0x1b00] ss:$16 sps:$4 sm:$0xff]  }
 0x7ba   :  { %v6467_v32 = vadd.f32 %v6446_v11, %v6436_v25  ;;  %v6469_v33 = vadd.f32 %v6454_v12, %v6438_v26  ;;  %v6471_v36 = vmax.f32 %v6463_v24, 0.0  ;;  %v6473_v37 = vmax.f32 %v6465_v9, 0.0  ;;  %v13752_v11 = vld [vmem:[%s18189_s2 + $0x1aa0] ss:$16 sps:$4 sm:$0xff]   ;;  %v13755_v12 = vld [vmem:[%s18189_s2 + $0x1aa8] ss:$16 sps:$4 sm:$0xff]  }
 0x7bb   :  { %v6468_v34 = vadd.f32 %v6450_v14, %v6437_v30  ;;  %v6470_v35 = vadd.f32 %v6458_v16, %v6439_v31  ;;  %v6472_v42 = vmax.f32 %v6464_v29, 0.0  ;;  %v6474_v43 = vmax.f32 %v6466_v15, 0.0  ;;  %v13758_v14 = vld [vmem:[%s18189_s2 + $0x1ac0] ss:$16 sps:$4 sm:$0xff]   ;;  %v13761_v16 = vld [vmem:[%s18189_s2 + $0x1ac8] ss:$16 sps:$4 sm:$0xff]  }
 0x7bc   :  { %v6475_v39 = vmax.f32 %v6467_v32, 0.0  ;;  %v6477_v41 = vmax.f32 %v6469_v33, 0.0  ;;  %v13766_v17 = vld [vmem:[%s18189_s2 + $0x1ae4] ss:$16 sps:$4 sm:$0xff]   ;;  %v13769_v18 = vld [vmem:[%s18189_s2 + $0x1aec] ss:$16 sps:$4 sm:$0xff]  }
 0x7bd   :  { %v6476_v44 = vmax.f32 %v6468_v34, 0.0  ;;  %v6478_v45 = vmax.f32 %v6470_v35, 0.0  ;;  %v13772_v20 = vld [vmem:[%s18189_s2 + $0x1b04] ss:$16 sps:$4 sm:$0xff]   ;;  %v13775_v21 = vld [vmem:[%s18189_s2 + $0x1b0c] ss:$16 sps:$4 sm:$0xff]  }
 0x7be   :  { %v6479_v46 = vpack.c.bf16 %v6475_v39, %v6471_v36  ;;  %v17035_v47 = vpack.c.bf16 %v6477_v41, %v6473_v37  ;;  %v13773_v23 = vld [vmem:[%s18189_s2 + $0x1b08] ss:$16 sps:$4 sm:$0xff]   ;;  %v13778_v24 = vld [vmem:[%s18189_s2 + $0x1b24] ss:$16 sps:$4 sm:$0xff]   ;;  %v13781_v9 = vld [vmem:[%s18189_s2 + $0x1b2c] ss:$16 sps:$4 sm:$0xff]  }
 0x7bf   :  { %v6480_v48 = vpack.c.bf16 %v6476_v44, %v6472_v42  ;;  %v6482_v51 = vpack.c.bf16 %v6478_v45, %v6474_v43  ;;  %v13776_v25 = vld [vmem:[%s18189_s2 + $0x1b20] ss:$16 sps:$4 sm:$0xff]   ;;  %v13779_v26 = vld [vmem:[%s18189_s2 + $0x1b28] ss:$16 sps:$4 sm:$0xff]   ;;  %v13784_v27 = vld [vmem:[%s18189_s2 + $0x1b44] ss:$16 sps:$4 sm:$0xff]  }
 0x7c0   :  { %v13787_v28 = vld [vmem:[%s18189_s2 + $0x1b4c] ss:$16 sps:$4 sm:$0xff]   ;;  %v13782_v29 = vld [vmem:[%s18189_s2 + $0x1b40] ss:$16 sps:$4 sm:$0xff]   ;;  %v13785_v15 = vld [vmem:[%s18189_s2 + $0x1b48] ss:$16 sps:$4 sm:$0xff]  }
 0x7c1   :  { %7284 = vmatprep.mubr.bf16.mxu0 %v6480_v48  ;;  %7370 = vmatprep.mubr.bf16.mxu1 %v6480_v48  ;;  %v13790_v30 = vld [vmem:[%s18189_s2 + $0x1b64] ss:$16 sps:$4 sm:$0xff]   ;;  %v13793_v31 = vld [vmem:[%s18189_s2 + $0x1b6c] ss:$16 sps:$4 sm:$0xff]   ;;  %v13788_v32 = vld [vmem:[%s18189_s2 + $0x1b60] ss:$16 sps:$4 sm:$0xff]  }
 0x7c2   :  { %7285 = vmatmul.mubr.bf16.vlgmr.msra.gmra.mrb[28].mxu0 %v6479_v46  ;;  %7371 = vmatmul.mubr.bf16.vlgmr.msra.gmra.mrb[28].mxu1 %v6479_v46  ;;  %v13791_v33 = vld [vmem:[%s18189_s2 + $0x1b68] ss:$16 sps:$4 sm:$0xff]   ;;  %v13796_v34 = vld [vmem:[%s18189_s2 + $0x1b84] ss:$16 sps:$4 sm:$0xff]   ;;  %v13799_v35 = vld [vmem:[%s18189_s2 + $0x1b8c] ss:$16 sps:$4 sm:$0xff]  }
 0x7c3   :  { %7296 = vmatpush1.bf16.msra.mxu0 %v13722_v49  ;;  %7382 = vmatpush1.bf16.msra.mxu1 %v13725_v50  ;;  %v13794_v36 = vld [vmem:[%s18189_s2 + $0x1b80] ss:$16 sps:$4 sm:$0xff]   ;;  %v13797_v37 = vld [vmem:[%s18189_s2 + $0x1b88] ss:$16 sps:$4 sm:$0xff]   ;;  %v13802_v39 = vld [vmem:[%s18189_s2 + $0x1ba4] ss:$16 sps:$4 sm:$0xff]  }
 0x7c4   :  { %7327 = vmatprep.mubr.bf16.mxu0 %v6482_v51  ;;  %7413 = vmatprep.mubr.bf16.mxu1 %v6482_v51  ;;  %v13805_v41 = vld [vmem:[%s18189_s2 + $0x1bac] ss:$16 sps:$4 sm:$0xff]   ;;  %v13800_v42 = vld [vmem:[%s18189_s2 + $0x1ba0] ss:$16 sps:$4 sm:$0xff]   ;;  %v13803_v43 = vld [vmem:[%s18189_s2 + $0x1ba8] ss:$16 sps:$4 sm:$0xff]  }
 0x7c5   :  { %7297 = vmatprep.subr.bf16.mxu0 %v13730_v52  ;;  %7383 = vmatprep.subr.bf16.mxu1 %v13733_v54  ;;  %v13808_v44 = vld [vmem:[%s18189_s2 + $0x1bc4] ss:$16 sps:$4 sm:$0xff]   ;;  %v13811_v45 = vld [vmem:[%s18189_s2 + $0x1bcc] ss:$16 sps:$4 sm:$0xff]   ;;  %v13806_v46 = vld [vmem:[%s18189_s2 + $0x1bc0] ss:$16 sps:$4 sm:$0xff]  }
 0x7c6   :  { %v13809_v48 = vld [vmem:[%s18189_s2 + $0x1bc8] ss:$16 sps:$4 sm:$0xff]   ;;  %v13814_v49 = vld [vmem:[%s18189_s2 + $0x1be4] ss:$16 sps:$4 sm:$0xff]   ;;  %v13817_v50 = vld [vmem:[%s18189_s2 + $0x1bec] ss:$16 sps:$4 sm:$0xff]  }
 0x7c7   :  { %7298 = vmatpush1.bf16.msra.mxu0 %v13728_v55  ;;  %7384 = vmatpush1.bf16.msra.mxu1 %v13731_v56  ;;  %v13812_v51 = vld [vmem:[%s18189_s2 + $0x1be0] ss:$16 sps:$4 sm:$0xff]   ;;  %v13815_v52 = vld [vmem:[%s18189_s2 + $0x1be8] ss:$16 sps:$4 sm:$0xff]   ;;  %v13820_v54 = vld [vmem:[%s18189_s2 + $0x1c04] ss:$16 sps:$4 sm:$0xff]  }
 0x7c8   :  { %7299 = vmatprep.subr.bf16.mxu0 %v13736_v58  ;;  %7385 = vmatprep.subr.bf16.mxu1 %v13739_v60  ;;  %v13823_v55 = vld [vmem:[%s18189_s2 + $0x1c0c] ss:$16 sps:$4 sm:$0xff]   ;;  %v13818_v56 = vld [vmem:[%s18189_s2 + $0x1c00] ss:$16 sps:$4 sm:$0xff]   ;;  %v13821_v58 = vld [vmem:[%s18189_s2 + $0x1c08] ss:$16 sps:$4 sm:$0xff]  }
 0x7c9   :  { %v13826_v60 = vld [vmem:[%s18189_s2 + $0x1c24] ss:$16 sps:$4 sm:$0xff]  }
 0x7cb   :  { %7300 = vmatpush1.bf16.msra.mxu0 %v13734_v62  ;;  %7386 = vmatpush1.bf16.msra.mxu1 %v13737_v63  ;;  %v13829_v62 = vld [vmem:[%s18189_s2 + $0x1c2c] ss:$16 sps:$4 sm:$0xff]   ;;  %v13824_v63 = vld [vmem:[%s18189_s2 + $0x1c20] ss:$16 sps:$4 sm:$0xff]  }
 0x7cc   :  { %7301 = vmatprep.subr.bf16.mxu0 %v13742_v0  ;;  %7387 = vmatprep.subr.bf16.mxu1 %v13745_v1  ;;  %v13827_v0 = vld [vmem:[%s18189_s2 + $0x1c28] ss:$16 sps:$4 sm:$0xff]   ;;  %v13832_v1 = vld [vmem:[%s18189_s2 + $0x1c44] ss:$16 sps:$4 sm:$0xff]  }
 0x7cf   :  { %7302 = vmatpush1.bf16.msra.mxu0 %v13740_v2  ;;  %7388 = vmatpush1.bf16.msra.mxu1 %v13743_v4  ;;  %v13830_v2 = vld [vmem:[%s18189_s2 + $0x1c40] ss:$16 sps:$4 sm:$0xff]   ;;  %v13833_v4 = vld [vmem:[%s18189_s2 + $0x1c48] ss:$16 sps:$4 sm:$0xff]  }
 0x7d0   :  { %7303 = vmatprep.subr.bf16.mxu0 %v13748_v5  ;;  %7389 = vmatprep.subr.bf16.mxu1 %v13751_v6  ;;  %v13838_v5 = vld [vmem:[%s18189_s2 + $0x1c64] ss:$16 sps:$4 sm:$0xff]   ;;  %v13841_v6 = vld [vmem:[%s18189_s2 + $0x1c6c] ss:$16 sps:$4 sm:$0xff]  }
 0x7d3   :  { %7304 = vmatpush1.bf16.msra.mxu0 %v13746_v7  ;;  %7390 = vmatpush1.bf16.msra.mxu1 %v13749_v53  ;;  %v13836_v7 = vld [vmem:[%s18189_s2 + $0x1c60] ss:$16 sps:$4 sm:$0xff]   ;;  %v13839_v53 = vld [vmem:[%s18189_s2 + $0x1c68] ss:$16 sps:$4 sm:$0xff]  }
 0x7d4   :  { %7305 = vmatprep.subr.bf16.mxu0 %v13754_v8  ;;  %7391 = vmatprep.subr.bf16.mxu1 %v13757_v10  ;;  %v13844_v8 = vld [vmem:[%s18189_s2 + $0x1c84] ss:$16 sps:$4 sm:$0xff]   ;;  %v13847_v10 = vld [vmem:[%s18189_s2 + $0x1c8c] ss:$16 sps:$4 sm:$0xff]  }
 0x7d7   :  { %7306 = vmatpush1.bf16.msra.mxu0 %v13752_v11  ;;  %7392 = vmatpush1.bf16.msra.mxu1 %v13755_v12  ;;  %v13842_v11 = vld [vmem:[%s18189_s2 + $0x1c80] ss:$16 sps:$4 sm:$0xff]   ;;  %v13845_v12 = vld [vmem:[%s18189_s2 + $0x1c88] ss:$16 sps:$4 sm:$0xff]  }
 0x7d8   :  { %7307 = vmatprep.subr.bf16.mxu0 %v13760_v13  ;;  %7393 = vmatprep.subr.bf16.mxu1 %v13763_v61  ;;  %v13850_v13 = vld [vmem:[%s18189_s2 + $0x1ca4] ss:$16 sps:$4 sm:$0xff]   ;;  %v13853_v61 = vld [vmem:[%s18189_s2 + $0x1cac] ss:$16 sps:$4 sm:$0xff]  }
 0x7db   :  { %7308 = vmatpush1.bf16.msra.mxu0 %v13758_v14  ;;  %7394 = vmatpush1.bf16.msra.mxu1 %v13761_v16  ;;  %v13848_v14 = vld [vmem:[%s18189_s2 + $0x1ca0] ss:$16 sps:$4 sm:$0xff]   ;;  %v13851_v16 = vld [vmem:[%s18189_s2 + $0x1ca8] ss:$16 sps:$4 sm:$0xff]  }
 0x7dc   :  { %7309 = vmatprep.subr.bf16.mxu0 %v13766_v17  ;;  %7395 = vmatprep.subr.bf16.mxu1 %v13769_v18  ;;  %v13856_v17 = vld [vmem:[%s18189_s2 + $0x1cc4] ss:$16 sps:$4 sm:$0xff]   ;;  %v13859_v18 = vld [vmem:[%s18189_s2 + $0x1ccc] ss:$16 sps:$4 sm:$0xff]  }
 0x7df   :  { %7310 = vmatpush1.bf16.msra.mxu0 %v13764_v19  ;;  %7396 = vmatpush1.bf16.msra.mxu1 %v13767_v3  ;;  %v13854_v19 = vld [vmem:[%s18189_s2 + $0x1cc0] ss:$16 sps:$4 sm:$0xff]   ;;  %v13857_v3 = vld [vmem:[%s18189_s2 + $0x1cc8] ss:$16 sps:$4 sm:$0xff]  }
 0x7e0   :  { %7311 = vmatprep.subr.bf16.mxu0 %v13772_v20  ;;  %7397 = vmatprep.subr.bf16.mxu1 %v13775_v21  ;;  %v13862_v20 = vld [vmem:[%s18189_s2 + $0x1ce4] ss:$16 sps:$4 sm:$0xff]   ;;  %v13865_v21 = vld [vmem:[%s18189_s2 + $0x1cec] ss:$16 sps:$4 sm:$0xff]  }
 0x7e3   :  { %7312 = vmatpush1.bf16.msra.mxu0 %v13770_v22  ;;  %7398 = vmatpush1.bf16.msra.mxu1 %v13773_v23  ;;  %v13860_v22 = vld [vmem:[%s18189_s2 + $0x1ce0] ss:$16 sps:$4 sm:$0xff]   ;;  %v13863_v23 = vld [vmem:[%s18189_s2 + $0x1ce8] ss:$16 sps:$4 sm:$0xff]  }
 0x7e4   :  { %7313 = vmatprep.subr.bf16.mxu0 %v13778_v24  ;;  %7399 = vmatprep.subr.bf16.mxu1 %v13781_v9  ;;  %v13868_v24 = vld [vmem:[%s18189_s2 + $0x1d04] ss:$16 sps:$4 sm:$0xff]   ;;  %v13871_v9 = vld [vmem:[%s18189_s2 + $0x1d0c] ss:$16 sps:$4 sm:$0xff]  }
 0x7e7   :  { %7314 = vmatpush1.bf16.msra.mxu0 %v13776_v25  ;;  %7400 = vmatpush1.bf16.msra.mxu1 %v13779_v26  ;;  %v13866_v25 = vld [vmem:[%s18189_s2 + $0x1d00] ss:$16 sps:$4 sm:$0xff]   ;;  %v13869_v26 = vld [vmem:[%s18189_s2 + $0x1d08] ss:$16 sps:$4 sm:$0xff]  }
 0x7e8   :  { %7315 = vmatprep.subr.bf16.mxu0 %v13784_v27  ;;  %7401 = vmatprep.subr.bf16.mxu1 %v13787_v28  ;;  %v13874_v27 = vld [vmem:[%s18189_s2 + $0x1d24] ss:$16 sps:$4 sm:$0xff]   ;;  %v13877_v28 = vld [vmem:[%s18189_s2 + $0x1d2c] ss:$16 sps:$4 sm:$0xff]  }
 0x7eb   :  { %7316 = vmatpush1.bf16.msra.mxu0 %v13782_v29  ;;  %7402 = vmatpush1.bf16.msra.mxu1 %v13785_v15  ;;  %v13872_v29 = vld [vmem:[%s18189_s2 + $0x1d20] ss:$16 sps:$4 sm:$0xff]   ;;  %v13875_v15 = vld [vmem:[%s18189_s2 + $0x1d28] ss:$16 sps:$4 sm:$0xff]  }
 0x7ec   :  { %7317 = vmatprep.subr.bf16.mxu0 %v13790_v30  ;;  %7403 = vmatprep.subr.bf16.mxu1 %v13793_v31  ;;  %v13880_v30 = vld [vmem:[%s18189_s2 + $0x1d44] ss:$16 sps:$4 sm:$0xff]   ;;  %v13883_v31 = vld [vmem:[%s18189_s2 + $0x1d4c] ss:$16 sps:$4 sm:$0xff]  }
 0x7ef   :  { %7318 = vmatpush1.bf16.msra.mxu0 %v13788_v32  ;;  %7404 = vmatpush1.bf16.msra.mxu1 %v13791_v33  ;;  %v13878_v32 = vld [vmem:[%s18189_s2 + $0x1d40] ss:$16 sps:$4 sm:$0xff]   ;;  %v13881_v33 = vld [vmem:[%s18189_s2 + $0x1d48] ss:$16 sps:$4 sm:$0xff]  }
 0x7f0   :  { %7319 = vmatprep.subr.bf16.mxu0 %v13796_v34  ;;  %7405 = vmatprep.subr.bf16.mxu1 %v13799_v35  ;;  %v13886_v34 = vld [vmem:[%s18189_s2 + $0x1d64] ss:$16 sps:$4 sm:$0xff]   ;;  %v13889_v35 = vld [vmem:[%s18189_s2 + $0x1d6c] ss:$16 sps:$4 sm:$0xff]  }
 0x7f3   :  { %7320 = vmatpush1.bf16.msra.mxu0 %v13794_v36  ;;  %7406 = vmatpush1.bf16.msra.mxu1 %v13797_v37  ;;  %v13884_v36 = vld [vmem:[%s18189_s2 + $0x1d60] ss:$16 sps:$4 sm:$0xff]   ;;  %v13887_v37 = vld [vmem:[%s18189_s2 + $0x1d68] ss:$16 sps:$4 sm:$0xff]  }
 0x7f4   :  { %7321 = vmatprep.subr.bf16.mxu0 %v13802_v39  ;;  %7407 = vmatprep.subr.bf16.mxu1 %v13805_v41  ;;  %v13892_v39 = vld [vmem:[%s18189_s2 + $0x1d84] ss:$16 sps:$4 sm:$0xff]   ;;  %v13895_v41 = vld [vmem:[%s18189_s2 + $0x1d8c] ss:$16 sps:$4 sm:$0xff]  }
 0x7f7   :  { %7322 = vmatpush1.bf16.msra.mxu0 %v13800_v42  ;;  %7408 = vmatpush1.bf16.msra.mxu1 %v13803_v43  ;;  %v13890_v42 = vld [vmem:[%s18189_s2 + $0x1d80] ss:$16 sps:$4 sm:$0xff]   ;;  %v13893_v43 = vld [vmem:[%s18189_s2 + $0x1d88] ss:$16 sps:$4 sm:$0xff]  }
 0x7f8   :  { %7323 = vmatprep.subr.bf16.mxu0 %v13808_v44  ;;  %7409 = vmatprep.subr.bf16.mxu1 %v13811_v45  ;;  %v13898_v44 = vld [vmem:[%s18189_s2 + $0x1da4] ss:$16 sps:$4 sm:$0xff]   ;;  %v13901_v45 = vld [vmem:[%s18189_s2 + $0x1dac] ss:$16 sps:$4 sm:$0xff]  }
 0x7fb   :  { %7324 = vmatpush1.bf16.msra.mxu0 %v13806_v46  ;;  %7410 = vmatpush1.bf16.msra.mxu1 %v13809_v48  ;;  %v13896_v46 = vld [vmem:[%s18189_s2 + $0x1da0] ss:$16 sps:$4 sm:$0xff]   ;;  %v13899_v48 = vld [vmem:[%s18189_s2 + $0x1da8] ss:$16 sps:$4 sm:$0xff]  }
 0x7fc   :  { %7325 = vmatprep.subr.bf16.mxu0 %v13814_v49  ;;  %7411 = vmatprep.subr.bf16.mxu1 %v13817_v50  ;;  %v13904_v49 = vld [vmem:[%s18189_s2 + $0x1dc4] ss:$16 sps:$4 sm:$0xff]   ;;  %v13907_v50 = vld [vmem:[%s18189_s2 + $0x1dcc] ss:$16 sps:$4 sm:$0xff]  }
 0x7ff   :  { %7326 = vmatpush1.bf16.msra.mxu0 %v13812_v51  ;;  %7412 = vmatpush1.bf16.msra.mxu1 %v13815_v52  ;;  %v13902_v51 = vld [vmem:[%s18189_s2 + $0x1dc0] ss:$16 sps:$4 sm:$0xff]   ;;  %v13905_v52 = vld [vmem:[%s18189_s2 + $0x1dc8] ss:$16 sps:$4 sm:$0xff]  }
 0x800   :  { %8267 = vmatprep.subr.bf16.mxu0 %v13820_v54  ;;  %8353 = vmatprep.subr.bf16.mxu1 %v13823_v55  ;;  %v13910_v54 = vld [vmem:[%s18189_s2 + $0x1de4] ss:$16 sps:$4 sm:$0xff]   ;;  %v13913_v55 = vld [vmem:[%s18189_s2 + $0x1dec] ss:$16 sps:$4 sm:$0xff]  }
 0x802   :  { %7328 = vmatmul.mubr.bf16.vlgmr.msra.gmra.mrb[28].mxu0 %v17035_v47  ;;  %7414 = vmatmul.mubr.bf16.vlgmr.msra.gmra.mrb[28].mxu1 %v17035_v47  ;;  %v13835_v47 = vld [vmem:[%s18189_s2 + $0x1c4c] ss:$16 sps:$4 sm:$0xff]  }
 0x803   :  { %8268 = vmatpush1.bf16.msra.mxu0 %v13818_v56  ;;  %8354 = vmatpush1.bf16.msra.mxu1 %v13821_v58  ;;  %v13908_v56 = vld [vmem:[%s18189_s2 + $0x1de0] ss:$16 sps:$4 sm:$0xff]   ;;  %v13911_v58 = vld [vmem:[%s18189_s2 + $0x1de8] ss:$16 sps:$4 sm:$0xff]  }
 0x804   :  { %8269 = vmatprep.subr.bf16.mxu0 %v13826_v60  ;;  %8355 = vmatprep.subr.bf16.mxu1 %v13829_v62  ;;  %v13916_v60 = vld [vmem:[%s18189_s2 + $0x1e04] ss:$16 sps:$4 sm:$0xff]   ;;  %v13919_v62 = vld [vmem:[%s18189_s2 + $0x1e0c] ss:$16 sps:$4 sm:$0xff]  }
 0x807   :  { %8270 = vmatpush1.bf16.msra.mxu0 %v13824_v63  ;;  %8356 = vmatpush1.bf16.msra.mxu1 %v13827_v0  ;;  %v11716_v63 = vld [vmem:[%s18190_s5 + $0x1c] sm:$0xf] }
 0x808   :  { %8271 = vmatprep.subr.bf16.mxu0 %v13832_v1  ;;  %8357 = vmatprep.subr.bf16.mxu1 %v13835_v47  ;;  %v11717_v0 = vld [vmem:[%s18191_s6 + $0x1c] sm:$0xf]  ;;  %v7430_v1 = vrot.slane %v11716_v63, %v14601_v38  ;;  %v7438_v47 = vrot.slane %v11716_v63, %v14615_v57 }
 0x80b   :  { %8272 = vmatpush1.bf16.msra.mxu0 %v13830_v2  ;;  %8358 = vmatpush1.bf16.msra.mxu1 %v13833_v4  ;;  %v7434_v2 = vrot.slane %v11716_v63, %v14606_v40  ;;  %v7442_v4 = vrot.slane %v11716_v63, %v14617_v59  ;;  %v13940_v63 = vld [vmem:[%s18189_s2 + $0x1e84] ss:$16 sps:$4 sm:$0xff]  }
 0x80c   :  { %8273 = vmatprep.subr.bf16.mxu0 %v13838_v5  ;;  %8359 = vmatprep.subr.bf16.mxu1 %v13841_v6  ;;  %v7461_v5 = vrot.slane %v11717_v0, %v14601_v38  ;;  %v7469_v6 = vrot.slane %v11717_v0, %v14615_v57 }
 0x80f   :  { %8274 = vmatpush1.bf16.msra.mxu0 %v13836_v7  ;;  %8360 = vmatpush1.bf16.msra.mxu1 %v13839_v53 }
 0x810   :  { %8275 = vmatprep.subr.bf16.mxu0 %v13844_v8  ;;  %8361 = vmatprep.subr.bf16.mxu1 %v13847_v10  ;;  %v7465_v8 = vrot.slane %v11717_v0, %v14606_v40  ;;  %v7473_v10 = vrot.slane %v11717_v0, %v14617_v59  ;;  %v13943_v0 = vld [vmem:[%s18189_s2 + $0x1e8c] ss:$16 sps:$4 sm:$0xff]  }
 0x813   :  { %8276 = vmatpush1.bf16.msra.mxu0 %v13842_v11  ;;  %8362 = vmatpush1.bf16.msra.mxu1 %v13845_v12 }
 0x814   :  { %8277 = vmatprep.subr.bf16.mxu0 %v13850_v13  ;;  %8363 = vmatprep.subr.bf16.mxu1 %v13853_v61 }
 0x817   :  { %8278 = vmatpush1.bf16.msra.mxu0 %v13848_v14  ;;  %8364 = vmatpush1.bf16.msra.mxu1 %v13851_v16 }
 0x818   :  { %8279 = vmatprep.subr.bf16.mxu0 %v13856_v17  ;;  %8365 = vmatprep.subr.bf16.mxu1 %v13859_v18 }
 0x81b   :  { %8280 = vmatpush1.bf16.msra.mxu0 %v13854_v19  ;;  %8366 = vmatpush1.bf16.msra.mxu1 %v13857_v3 }
 0x81c   :  { %8281 = vmatprep.subr.bf16.mxu0 %v13862_v20  ;;  %8367 = vmatprep.subr.bf16.mxu1 %v13865_v21 }
 0x81f   :  { %8282 = vmatpush1.bf16.msra.mxu0 %v13860_v22  ;;  %8368 = vmatpush1.bf16.msra.mxu1 %v13863_v23 }
 0x820   :  { %8283 = vmatprep.subr.bf16.mxu0 %v13868_v24  ;;  %8369 = vmatprep.subr.bf16.mxu1 %v13871_v9 }
 0x823   :  { %8284 = vmatpush1.bf16.msra.mxu0 %v13866_v25  ;;  %8370 = vmatpush1.bf16.msra.mxu1 %v13869_v26 }
 0x824   :  { %8285 = vmatprep.subr.bf16.mxu0 %v13874_v27  ;;  %8371 = vmatprep.subr.bf16.mxu1 %v13877_v28 }
 0x827   :  { %8286 = vmatpush1.bf16.msra.mxu0 %v13872_v29  ;;  %8372 = vmatpush1.bf16.msra.mxu1 %v13875_v15 }
 0x828   :  { %8287 = vmatprep.subr.bf16.mxu0 %v13880_v30  ;;  %8373 = vmatprep.subr.bf16.mxu1 %v13883_v31 }
 0x82b   :  { %8288 = vmatpush1.bf16.msra.mxu0 %v13878_v32  ;;  %8374 = vmatpush1.bf16.msra.mxu1 %v13881_v33 }
 0x82c   :  { %8289 = vmatprep.subr.bf16.mxu0 %v13886_v34  ;;  %8375 = vmatprep.subr.bf16.mxu1 %v13889_v35 }
 0x82f   :  { %8290 = vmatpush1.bf16.msra.mxu0 %v13884_v36  ;;  %8376 = vmatpush1.bf16.msra.mxu1 %v13887_v37 }
 0x830   :  { %8291 = vmatprep.subr.bf16.mxu0 %v13892_v39  ;;  %8377 = vmatprep.subr.bf16.mxu1 %v13895_v41 }
 0x833   :  { %8292 = vmatpush1.bf16.msra.mxu0 %v13890_v42  ;;  %8378 = vmatpush1.bf16.msra.mxu1 %v13893_v43  ;;  %v13914_v43 = vld [vmem:[%s18189_s2 + $0x1e00] ss:$16 sps:$4 sm:$0xff]  }
 0x834   :  { %8293 = vmatprep.subr.bf16.mxu0 %v13898_v44  ;;  %8379 = vmatprep.subr.bf16.mxu1 %v13901_v45  ;;  %v13917_v44 = vld [vmem:[%s18189_s2 + $0x1e08] ss:$16 sps:$4 sm:$0xff]  }
 0x837   :  { %8294 = vmatpush1.bf16.msra.mxu0 %v13896_v46  ;;  %8380 = vmatpush1.bf16.msra.mxu1 %v13899_v48  ;;  %v13922_v46 = vld [vmem:[%s18189_s2 + $0x1e24] ss:$16 sps:$4 sm:$0xff]   ;;  %v13925_v48 = vld [vmem:[%s18189_s2 + $0x1e2c] ss:$16 sps:$4 sm:$0xff]  }
 0x838   :  { %8295 = vmatprep.subr.bf16.mxu0 %v13904_v49  ;;  %8381 = vmatprep.subr.bf16.mxu1 %v13907_v50  ;;  %v13920_v49 = vld [vmem:[%s18189_s2 + $0x1e20] ss:$16 sps:$4 sm:$0xff]   ;;  %v13923_v50 = vld [vmem:[%s18189_s2 + $0x1e28] ss:$16 sps:$4 sm:$0xff]  }
 0x83b   :  { %8296 = vmatpush1.bf16.msra.mxu0 %v13902_v51  ;;  %8382 = vmatpush1.bf16.msra.mxu1 %v13905_v52  ;;  %v13928_v51 = vld [vmem:[%s18189_s2 + $0x1e44] ss:$16 sps:$4 sm:$0xff]   ;;  %v13931_v52 = vld [vmem:[%s18189_s2 + $0x1e4c] ss:$16 sps:$4 sm:$0xff]  }
 0x83c   :  { %8297 = vmatprep.subr.bf16.mxu0 %v13910_v54  ;;  %8383 = vmatprep.subr.bf16.mxu1 %v13913_v55  ;;  %v13926_v54 = vld [vmem:[%s18189_s2 + $0x1e40] ss:$16 sps:$4 sm:$0xff]   ;;  %v13929_v55 = vld [vmem:[%s18189_s2 + $0x1e48] ss:$16 sps:$4 sm:$0xff]  }
 0x83f   :  { %8298 = vmatpush1.bf16.msra.mxu0 %v13908_v56  ;;  %8384 = vmatpush1.bf16.msra.mxu1 %v13911_v58  ;;  %v13934_v56 = vld [vmem:[%s18189_s2 + $0x1e64] ss:$16 sps:$4 sm:$0xff]   ;;  %v13937_v58 = vld [vmem:[%s18189_s2 + $0x1e6c] ss:$16 sps:$4 sm:$0xff]  }
 0x840   :  { %8310 = vmatprep.subr.bf16.mxu0 %v13916_v60  ;;  %8396 = vmatprep.subr.bf16.mxu1 %v13919_v62  ;;  %v13932_v60 = vld [vmem:[%s18189_s2 + $0x1e60] ss:$16 sps:$4 sm:$0xff]   ;;  %v13935_v62 = vld [vmem:[%s18189_s2 + $0x1e68] ss:$16 sps:$4 sm:$0xff]  }
 0x8d5   :  { %v7329_v7 = vpop.f32.mrb[28].mxu0  ;;  %v7415_v53 = vpop.f32.mrb[28].mxu1 }
 0x8d6   :  { %v7447_v11 = vmul.f32 %v7430_v1, %v7329_v7  ;;  %v7449_v12 = vmul.f32 %v7438_v47, %v7415_v53  ;;  %v7331_v13 = vpop.f32.mrb[29].mxu0  ;;  %v7417_v61 = vpop.f32.mrb[29].mxu1  ;;  %v13952_v7 = vld [vmem:[%s18189_s2 + $0x1ec4] ss:$16 sps:$4 sm:$0xff]   ;;  %v13955_v53 = vld [vmem:[%s18189_s2 + $0x1ecc] ss:$16 sps:$4 sm:$0xff]  }
 0x8d7   :  { %v7448_v14 = vmul.f32 %v7434_v2, %v7331_v13  ;;  %v7450_v16 = vmul.f32 %v7442_v4, %v7417_v61  ;;  %v7333_v17 = vpop.f32.mrb[30].mxu0  ;;  %v7419_v18 = vpop.f32.mrb[30].mxu1  ;;  %v13956_v13 = vld [vmem:[%s18189_s2 + $0x1ee0] ss:$16 sps:$4 sm:$0xff]   ;;  %v13959_v61 = vld [vmem:[%s18189_s2 + $0x1ee8] ss:$16 sps:$4 sm:$0xff]  }
 0x8d8   :  { %v7478_v19 = vadd.f32 %v7461_v5, %v7447_v11  ;;  %v7480_v3 = vadd.f32 %v7469_v6, %v7449_v12  ;;  %v7451_v20 = vmul.f32 %v7430_v1, %v7333_v17  ;;  %v7453_v21 = vmul.f32 %v7438_v47, %v7419_v18  ;;  %v7335_v22 = vpop.f32.mrb[31].mxu0  ;;  %v7421_v23 = vpop.f32.mrb[31].mxu1  ;;  %v13938_v1 = vld [vmem:[%s18189_s2 + $0x1e80] ss:$16 sps:$4 sm:$0xff]   ;;  %v13941_v47 = vld [vmem:[%s18189_s2 + $0x1e88] ss:$16 sps:$4 sm:$0xff]  }
 0x8d9   :  { %v7479_v24 = vadd.f32 %v7465_v8, %v7448_v14  ;;  %v7481_v9 = vadd.f32 %v7473_v10, %v7450_v16  ;;  %v7452_v25 = vmul.f32 %v7434_v2, %v7335_v22  ;;  %v7454_v26 = vmul.f32 %v7442_v4, %v7421_v23  ;;  %v13946_v2 = vld [vmem:[%s18189_s2 + $0x1ea4] ss:$16 sps:$4 sm:$0xff]   ;;  %v13949_v4 = vld [vmem:[%s18189_s2 + $0x1eac] ss:$16 sps:$4 sm:$0xff]   ;;  %v13962_v17 = vld [vmem:[%s18189_s2 + $0x1f00] ss:$16 sps:$4 sm:$0xff]  }
 0x8da   :  { %v7482_v27 = vadd.f32 %v7461_v5, %v7451_v20  ;;  %v7484_v28 = vadd.f32 %v7469_v6, %v7453_v21  ;;  %v7486_v30 = vmax.f32 %v7478_v19, 0.0  ;;  %v7488_v31 = vmax.f32 %v7480_v3, 0.0  ;;  %v13944_v5 = vld [vmem:[%s18189_s2 + $0x1ea0] ss:$16 sps:$4 sm:$0xff]   ;;  %v13947_v6 = vld [vmem:[%s18189_s2 + $0x1ea8] ss:$16 sps:$4 sm:$0xff]  }
 0x8db   :  { %v7483_v29 = vadd.f32 %v7465_v8, %v7452_v25  ;;  %v7485_v15 = vadd.f32 %v7473_v10, %v7454_v26  ;;  %v7487_v34 = vmax.f32 %v7479_v24, 0.0  ;;  %v7489_v35 = vmax.f32 %v7481_v9, 0.0  ;;  %v13950_v8 = vld [vmem:[%s18189_s2 + $0x1ec0] ss:$16 sps:$4 sm:$0xff]   ;;  %v13953_v10 = vld [vmem:[%s18189_s2 + $0x1ec8] ss:$16 sps:$4 sm:$0xff]  }
 0x8dc   :  { %v7490_v32 = vmax.f32 %v7482_v27, 0.0  ;;  %v7492_v33 = vmax.f32 %v7484_v28, 0.0  ;;  %v13958_v11 = vld [vmem:[%s18189_s2 + $0x1ee4] ss:$16 sps:$4 sm:$0xff]   ;;  %v13961_v12 = vld [vmem:[%s18189_s2 + $0x1eec] ss:$16 sps:$4 sm:$0xff]  }
 0x8dd   :  { %v7491_v36 = vmax.f32 %v7483_v29, 0.0  ;;  %v7493_v37 = vmax.f32 %v7485_v15, 0.0  ;;  %v13964_v14 = vld [vmem:[%s18189_s2 + $0x1f04] ss:$16 sps:$4 sm:$0xff]   ;;  %v13967_v16 = vld [vmem:[%s18189_s2 + $0x1f0c] ss:$16 sps:$4 sm:$0xff]  }
 0x8de   :  { %v7494_v39 = vpack.c.bf16 %v7490_v32, %v7486_v30  ;;  %v17437_v41 = vpack.c.bf16 %v7492_v33, %v7488_v31  ;;  %v13965_v18 = vld [vmem:[%s18189_s2 + $0x1f08] ss:$16 sps:$4 sm:$0xff]   ;;  %v13970_v19 = vld [vmem:[%s18189_s2 + $0x1f24] ss:$16 sps:$4 sm:$0xff]   ;;  %v13973_v3 = vld [vmem:[%s18189_s2 + $0x1f2c] ss:$16 sps:$4 sm:$0xff]  }
 0x8df   :  { %v7495_v42 = vpack.c.bf16 %v7491_v36, %v7487_v34  ;;  %v7497_v45 = vpack.c.bf16 %v7493_v37, %v7489_v35  ;;  %v13968_v20 = vld [vmem:[%s18189_s2 + $0x1f20] ss:$16 sps:$4 sm:$0xff]   ;;  %v13971_v21 = vld [vmem:[%s18189_s2 + $0x1f28] ss:$16 sps:$4 sm:$0xff]   ;;  %v13976_v22 = vld [vmem:[%s18189_s2 + $0x1f44] ss:$16 sps:$4 sm:$0xff]  }
 0x8e0   :  { %v13979_v23 = vld [vmem:[%s18189_s2 + $0x1f4c] ss:$16 sps:$4 sm:$0xff]   ;;  %v13974_v24 = vld [vmem:[%s18189_s2 + $0x1f40] ss:$16 sps:$4 sm:$0xff]   ;;  %v13977_v9 = vld [vmem:[%s18189_s2 + $0x1f48] ss:$16 sps:$4 sm:$0xff]  }
 0x8e1   :  { %8299 = vmatprep.mubr.bf16.mxu0 %v7495_v42  ;;  %8385 = vmatprep.mubr.bf16.mxu1 %v7495_v42  ;;  %v13982_v25 = vld [vmem:[%s18189_s2 + $0x1f64] ss:$16 sps:$4 sm:$0xff]   ;;  %v13985_v26 = vld [vmem:[%s18189_s2 + $0x1f6c] ss:$16 sps:$4 sm:$0xff]   ;;  %v13980_v27 = vld [vmem:[%s18189_s2 + $0x1f60] ss:$16 sps:$4 sm:$0xff]  }
 0x8e2   :  { %8300 = vmatmul.mubr.bf16.vlgmr.msra.gmra.mrb[32].mxu0 %v7494_v39  ;;  %8386 = vmatmul.mubr.bf16.vlgmr.msra.gmra.mrb[32].mxu1 %v7494_v39  ;;  %v13983_v28 = vld [vmem:[%s18189_s2 + $0x1f68] ss:$16 sps:$4 sm:$0xff]   ;;  %v13988_v29 = vld [vmem:[%s18189_s2 + $0x1f84] ss:$16 sps:$4 sm:$0xff]   ;;  %v13991_v15 = vld [vmem:[%s18189_s2 + $0x1f8c] ss:$16 sps:$4 sm:$0xff]  }
 0x8e3   :  { %8311 = vmatpush1.bf16.msra.mxu0 %v13914_v43  ;;  %8397 = vmatpush1.bf16.msra.mxu1 %v13917_v44  ;;  %v13986_v30 = vld [vmem:[%s18189_s2 + $0x1f80] ss:$16 sps:$4 sm:$0xff]   ;;  %v13989_v31 = vld [vmem:[%s18189_s2 + $0x1f88] ss:$16 sps:$4 sm:$0xff]   ;;  %v13994_v32 = vld [vmem:[%s18189_s2 + $0x1fa4] ss:$16 sps:$4 sm:$0xff]  }
 0x8e4   :  { %8342 = vmatprep.mubr.bf16.mxu0 %v7497_v45  ;;  %8428 = vmatprep.mubr.bf16.mxu1 %v7497_v45  ;;  %v13997_v33 = vld [vmem:[%s18189_s2 + $0x1fac] ss:$16 sps:$4 sm:$0xff]   ;;  %v13992_v34 = vld [vmem:[%s18189_s2 + $0x1fa0] ss:$16 sps:$4 sm:$0xff]   ;;  %v13995_v35 = vld [vmem:[%s18189_s2 + $0x1fa8] ss:$16 sps:$4 sm:$0xff]  }
 0x8e5   :  { %8312 = vmatprep.subr.bf16.mxu0 %v13922_v46  ;;  %8398 = vmatprep.subr.bf16.mxu1 %v13925_v48  ;;  %v14000_v36 = vld [vmem:[%s18189_s2 + $0x1fc4] ss:$16 sps:$4 sm:$0xff]   ;;  %v14003_v37 = vld [vmem:[%s18189_s2 + $0x1fcc] ss:$16 sps:$4 sm:$0xff]   ;;  %v13998_v39 = vld [vmem:[%s18189_s2 + $0x1fc0] ss:$16 sps:$4 sm:$0xff]  }
 0x8e6   :  { %v14001_v42 = vld [vmem:[%s18189_s2 + $0x1fc8] ss:$16 sps:$4 sm:$0xff]   ;;  %v14006_v43 = vld [vmem:[%s18189_s2 + $0x1fe4] ss:$16 sps:$4 sm:$0xff]   ;;  %v14009_v44 = vld [vmem:[%s18189_s2 + $0x1fec] ss:$16 sps:$4 sm:$0xff]  }
 0x8e7   :  { %8313 = vmatpush1.bf16.msra.mxu0 %v13920_v49  ;;  %8399 = vmatpush1.bf16.msra.mxu1 %v13923_v50  ;;  %v14004_v45 = vld [vmem:[%s18189_s2 + $0x1fe0] ss:$16 sps:$4 sm:$0xff]   ;;  %v14007_v46 = vld [vmem:[%s18189_s2 + $0x1fe8] ss:$16 sps:$4 sm:$0xff]   ;;  %v14012_v48 = vld [vmem:[%s18189_s2 + $0x2004] ss:$16 sps:$4 sm:$0xff]  }
 0x8e8   :  { %8314 = vmatprep.subr.bf16.mxu0 %v13928_v51  ;;  %8400 = vmatprep.subr.bf16.mxu1 %v13931_v52  ;;  %v14015_v49 = vld [vmem:[%s18189_s2 + $0x200c] ss:$16 sps:$4 sm:$0xff]   ;;  %v14010_v50 = vld [vmem:[%s18189_s2 + $0x2000] ss:$16 sps:$4 sm:$0xff]   ;;  %v14013_v51 = vld [vmem:[%s18189_s2 + $0x2008] ss:$16 sps:$4 sm:$0xff]  }
 0x8e9   :  { %v14018_v52 = vld [vmem:[%s18189_s2 + $0x2024] ss:$16 sps:$4 sm:$0xff]  }
 0x8eb   :  { %8315 = vmatpush1.bf16.msra.mxu0 %v13926_v54  ;;  %8401 = vmatpush1.bf16.msra.mxu1 %v13929_v55  ;;  %v14021_v54 = vld [vmem:[%s18189_s2 + $0x202c] ss:$16 sps:$4 sm:$0xff]   ;;  %v14016_v55 = vld [vmem:[%s18189_s2 + $0x2020] ss:$16 sps:$4 sm:$0xff]  }
 0x8ec   :  { %8316 = vmatprep.subr.bf16.mxu0 %v13934_v56  ;;  %8402 = vmatprep.subr.bf16.mxu1 %v13937_v58  ;;  %v14019_v56 = vld [vmem:[%s18189_s2 + $0x2028] ss:$16 sps:$4 sm:$0xff]   ;;  %v14024_v58 = vld [vmem:[%s18189_s2 + $0x2044] ss:$16 sps:$4 sm:$0xff]  }
 0x8ef   :  { %8317 = vmatpush1.bf16.msra.mxu0 %v13932_v60  ;;  %8403 = vmatpush1.bf16.msra.mxu1 %v13935_v62  ;;  %v14022_v60 = vld [vmem:[%s18189_s2 + $0x2040] ss:$16 sps:$4 sm:$0xff]   ;;  %v14025_v62 = vld [vmem:[%s18189_s2 + $0x2048] ss:$16 sps:$4 sm:$0xff]  }
 0x8f0   :  { %8318 = vmatprep.subr.bf16.mxu0 %v13940_v63  ;;  %8404 = vmatprep.subr.bf16.mxu1 %v13943_v0  ;;  %v14030_v63 = vld [vmem:[%s18189_s2 + $0x2064] ss:$16 sps:$4 sm:$0xff]   ;;  %v14033_v0 = vld [vmem:[%s18189_s2 + $0x206c] ss:$16 sps:$4 sm:$0xff]  }
 0x8f3   :  { %8319 = vmatpush1.bf16.msra.mxu0 %v13938_v1  ;;  %8405 = vmatpush1.bf16.msra.mxu1 %v13941_v47  ;;  %v14028_v1 = vld [vmem:[%s18189_s2 + $0x2060] ss:$16 sps:$4 sm:$0xff]   ;;  %v14031_v47 = vld [vmem:[%s18189_s2 + $0x2068] ss:$16 sps:$4 sm:$0xff]  }
 0x8f4   :  { %8320 = vmatprep.subr.bf16.mxu0 %v13946_v2  ;;  %8406 = vmatprep.subr.bf16.mxu1 %v13949_v4  ;;  %v14036_v2 = vld [vmem:[%s18189_s2 + $0x2084] ss:$16 sps:$4 sm:$0xff]   ;;  %v14039_v4 = vld [vmem:[%s18189_s2 + $0x208c] ss:$16 sps:$4 sm:$0xff]  }
 0x8f7   :  { %8321 = vmatpush1.bf16.msra.mxu0 %v13944_v5  ;;  %8407 = vmatpush1.bf16.msra.mxu1 %v13947_v6  ;;  %v14034_v5 = vld [vmem:[%s18189_s2 + $0x2080] ss:$16 sps:$4 sm:$0xff]   ;;  %v14037_v6 = vld [vmem:[%s18189_s2 + $0x2088] ss:$16 sps:$4 sm:$0xff]  }
 0x8f8   :  { %8322 = vmatprep.subr.bf16.mxu0 %v13952_v7  ;;  %8408 = vmatprep.subr.bf16.mxu1 %v13955_v53  ;;  %v14042_v7 = vld [vmem:[%s18189_s2 + $0x20a4] ss:$16 sps:$4 sm:$0xff]   ;;  %v14045_v53 = vld [vmem:[%s18189_s2 + $0x20ac] ss:$16 sps:$4 sm:$0xff]  }
 0x8fb   :  { %8323 = vmatpush1.bf16.msra.mxu0 %v13950_v8  ;;  %8409 = vmatpush1.bf16.msra.mxu1 %v13953_v10  ;;  %v14040_v8 = vld [vmem:[%s18189_s2 + $0x20a0] ss:$16 sps:$4 sm:$0xff]   ;;  %v14043_v10 = vld [vmem:[%s18189_s2 + $0x20a8] ss:$16 sps:$4 sm:$0xff]  }
 0x8fc   :  { %8324 = vmatprep.subr.bf16.mxu0 %v13958_v11  ;;  %8410 = vmatprep.subr.bf16.mxu1 %v13961_v12  ;;  %v14048_v11 = vld [vmem:[%s18189_s2 + $0x20c4] ss:$16 sps:$4 sm:$0xff]   ;;  %v14051_v12 = vld [vmem:[%s18189_s2 + $0x20cc] ss:$16 sps:$4 sm:$0xff]  }
 0x8ff   :  { %8325 = vmatpush1.bf16.msra.mxu0 %v13956_v13  ;;  %8411 = vmatpush1.bf16.msra.mxu1 %v13959_v61  ;;  %v14046_v13 = vld [vmem:[%s18189_s2 + $0x20c0] ss:$16 sps:$4 sm:$0xff]   ;;  %v14049_v61 = vld [vmem:[%s18189_s2 + $0x20c8] ss:$16 sps:$4 sm:$0xff]  }
 0x900   :  { %8326 = vmatprep.subr.bf16.mxu0 %v13964_v14  ;;  %8412 = vmatprep.subr.bf16.mxu1 %v13967_v16  ;;  %v14054_v14 = vld [vmem:[%s18189_s2 + $0x20e4] ss:$16 sps:$4 sm:$0xff]   ;;  %v14057_v16 = vld [vmem:[%s18189_s2 + $0x20ec] ss:$16 sps:$4 sm:$0xff]  }
 0x903   :  { %8327 = vmatpush1.bf16.msra.mxu0 %v13962_v17  ;;  %8413 = vmatpush1.bf16.msra.mxu1 %v13965_v18  ;;  %v14052_v17 = vld [vmem:[%s18189_s2 + $0x20e0] ss:$16 sps:$4 sm:$0xff]   ;;  %v14055_v18 = vld [vmem:[%s18189_s2 + $0x20e8] ss:$16 sps:$4 sm:$0xff]  }
 0x904   :  { %8328 = vmatprep.subr.bf16.mxu0 %v13970_v19  ;;  %8414 = vmatprep.subr.bf16.mxu1 %v13973_v3  ;;  %v14060_v19 = vld [vmem:[%s18189_s2 + $0x2104] ss:$16 sps:$4 sm:$0xff]   ;;  %v14063_v3 = vld [vmem:[%s18189_s2 + $0x210c] ss:$16 sps:$4 sm:$0xff]  }
 0x907   :  { %8329 = vmatpush1.bf16.msra.mxu0 %v13968_v20  ;;  %8415 = vmatpush1.bf16.msra.mxu1 %v13971_v21  ;;  %v14058_v20 = vld [vmem:[%s18189_s2 + $0x2100] ss:$16 sps:$4 sm:$0xff]   ;;  %v14061_v21 = vld [vmem:[%s18189_s2 + $0x2108] ss:$16 sps:$4 sm:$0xff]  }
 0x908   :  { %8330 = vmatprep.subr.bf16.mxu0 %v13976_v22  ;;  %8416 = vmatprep.subr.bf16.mxu1 %v13979_v23  ;;  %v14066_v22 = vld [vmem:[%s18189_s2 + $0x2124] ss:$16 sps:$4 sm:$0xff]   ;;  %v14069_v23 = vld [vmem:[%s18189_s2 + $0x212c] ss:$16 sps:$4 sm:$0xff]  }
 0x90b   :  { %8331 = vmatpush1.bf16.msra.mxu0 %v13974_v24  ;;  %8417 = vmatpush1.bf16.msra.mxu1 %v13977_v9  ;;  %v14064_v24 = vld [vmem:[%s18189_s2 + $0x2120] ss:$16 sps:$4 sm:$0xff]   ;;  %v14067_v9 = vld [vmem:[%s18189_s2 + $0x2128] ss:$16 sps:$4 sm:$0xff]  }
 0x90c   :  { %8332 = vmatprep.subr.bf16.mxu0 %v13982_v25  ;;  %8418 = vmatprep.subr.bf16.mxu1 %v13985_v26  ;;  %v14072_v25 = vld [vmem:[%s18189_s2 + $0x2144] ss:$16 sps:$4 sm:$0xff]   ;;  %v14075_v26 = vld [vmem:[%s18189_s2 + $0x214c] ss:$16 sps:$4 sm:$0xff]  }
 0x90f   :  { %8333 = vmatpush1.bf16.msra.mxu0 %v13980_v27  ;;  %8419 = vmatpush1.bf16.msra.mxu1 %v13983_v28  ;;  %v14070_v27 = vld [vmem:[%s18189_s2 + $0x2140] ss:$16 sps:$4 sm:$0xff]   ;;  %v14073_v28 = vld [vmem:[%s18189_s2 + $0x2148] ss:$16 sps:$4 sm:$0xff]  }
 0x910   :  { %8334 = vmatprep.subr.bf16.mxu0 %v13988_v29  ;;  %8420 = vmatprep.subr.bf16.mxu1 %v13991_v15  ;;  %v14078_v29 = vld [vmem:[%s18189_s2 + $0x2164] ss:$16 sps:$4 sm:$0xff]   ;;  %v14081_v15 = vld [vmem:[%s18189_s2 + $0x216c] ss:$16 sps:$4 sm:$0xff]  }
 0x913   :  { %8335 = vmatpush1.bf16.msra.mxu0 %v13986_v30  ;;  %8421 = vmatpush1.bf16.msra.mxu1 %v13989_v31  ;;  %v14076_v30 = vld [vmem:[%s18189_s2 + $0x2160] ss:$16 sps:$4 sm:$0xff]   ;;  %v14079_v31 = vld [vmem:[%s18189_s2 + $0x2168] ss:$16 sps:$4 sm:$0xff]  }
 0x914   :  { %8336 = vmatprep.subr.bf16.mxu0 %v13994_v32  ;;  %8422 = vmatprep.subr.bf16.mxu1 %v13997_v33  ;;  %v14084_v32 = vld [vmem:[%s18189_s2 + $0x2184] ss:$16 sps:$4 sm:$0xff]   ;;  %v14087_v33 = vld [vmem:[%s18189_s2 + $0x218c] ss:$16 sps:$4 sm:$0xff]  }
 0x917   :  { %8337 = vmatpush1.bf16.msra.mxu0 %v13992_v34  ;;  %8423 = vmatpush1.bf16.msra.mxu1 %v13995_v35  ;;  %v14082_v34 = vld [vmem:[%s18189_s2 + $0x2180] ss:$16 sps:$4 sm:$0xff]   ;;  %v14085_v35 = vld [vmem:[%s18189_s2 + $0x2188] ss:$16 sps:$4 sm:$0xff]  }
 0x918   :  { %8338 = vmatprep.subr.bf16.mxu0 %v14000_v36  ;;  %8424 = vmatprep.subr.bf16.mxu1 %v14003_v37  ;;  %v14090_v36 = vld [vmem:[%s18189_s2 + $0x21a4] ss:$16 sps:$4 sm:$0xff]   ;;  %v14093_v37 = vld [vmem:[%s18189_s2 + $0x21ac] ss:$16 sps:$4 sm:$0xff]  }
 0x91b   :  { %8339 = vmatpush1.bf16.msra.mxu0 %v13998_v39  ;;  %8425 = vmatpush1.bf16.msra.mxu1 %v14001_v42  ;;  %v14088_v39 = vld [vmem:[%s18189_s2 + $0x21a0] ss:$16 sps:$4 sm:$0xff]   ;;  %v14091_v42 = vld [vmem:[%s18189_s2 + $0x21a8] ss:$16 sps:$4 sm:$0xff]  }
 0x91c   :  { %8340 = vmatprep.subr.bf16.mxu0 %v14006_v43  ;;  %8426 = vmatprep.subr.bf16.mxu1 %v14009_v44  ;;  %v14096_v43 = vld [vmem:[%s18189_s2 + $0x21c4] ss:$16 sps:$4 sm:$0xff]   ;;  %v14099_v44 = vld [vmem:[%s18189_s2 + $0x21cc] ss:$16 sps:$4 sm:$0xff]  }
 0x91f   :  { %8341 = vmatpush1.bf16.msra.mxu0 %v14004_v45  ;;  %8427 = vmatpush1.bf16.msra.mxu1 %v14007_v46  ;;  %v14094_v45 = vld [vmem:[%s18189_s2 + $0x21c0] ss:$16 sps:$4 sm:$0xff]   ;;  %v14097_v46 = vld [vmem:[%s18189_s2 + $0x21c8] ss:$16 sps:$4 sm:$0xff]  }
 0x920   :  { %9282 = vmatprep.subr.bf16.mxu0 %v14012_v48  ;;  %9368 = vmatprep.subr.bf16.mxu1 %v14015_v49  ;;  %v14102_v48 = vld [vmem:[%s18189_s2 + $0x21e4] ss:$16 sps:$4 sm:$0xff]   ;;  %v14105_v49 = vld [vmem:[%s18189_s2 + $0x21ec] ss:$16 sps:$4 sm:$0xff]  }
 0x922   :  { %8343 = vmatmul.mubr.bf16.vlgmr.msra.gmra.mrb[32].mxu0 %v17437_v41  ;;  %8429 = vmatmul.mubr.bf16.vlgmr.msra.gmra.mrb[32].mxu1 %v17437_v41  ;;  %v14027_v41 = vld [vmem:[%s18189_s2 + $0x204c] ss:$16 sps:$4 sm:$0xff]  }
 0x923   :  { %9283 = vmatpush1.bf16.msra.mxu0 %v14010_v50  ;;  %9369 = vmatpush1.bf16.msra.mxu1 %v14013_v51  ;;  %v14100_v50 = vld [vmem:[%s18189_s2 + $0x21e0] ss:$16 sps:$4 sm:$0xff]   ;;  %v14103_v51 = vld [vmem:[%s18189_s2 + $0x21e8] ss:$16 sps:$4 sm:$0xff]  }
 0x924   :  { %9284 = vmatprep.subr.bf16.mxu0 %v14018_v52  ;;  %9370 = vmatprep.subr.bf16.mxu1 %v14021_v54  ;;  %v14108_v52 = vld [vmem:[%s18189_s2 + $0x2204] ss:$16 sps:$4 sm:$0xff]   ;;  %v14111_v54 = vld [vmem:[%s18189_s2 + $0x220c] ss:$16 sps:$4 sm:$0xff]  }
 0x927   :  { %9285 = vmatpush1.bf16.msra.mxu0 %v14016_v55  ;;  %9371 = vmatpush1.bf16.msra.mxu1 %v14019_v56  ;;  %v11974_v55 = vld [vmem:[%s18190_s5 + $0x20] sm:$0xf] }
 0x928   :  { %9286 = vmatprep.subr.bf16.mxu0 %v14024_v58  ;;  %9372 = vmatprep.subr.bf16.mxu1 %v14027_v41  ;;  %v11975_v56 = vld [vmem:[%s18191_s6 + $0x20] sm:$0xf]  ;;  %v8445_v58 = vrot.slane %v11974_v55, %v14601_v38  ;;  %v8453_v41 = vrot.slane %v11974_v55, %v14615_v57 }
 0x92b   :  { %9287 = vmatpush1.bf16.msra.mxu0 %v14022_v60  ;;  %9373 = vmatpush1.bf16.msra.mxu1 %v14025_v62  ;;  %v8449_v60 = vrot.slane %v11974_v55, %v14606_v40  ;;  %v8457_v62 = vrot.slane %v11974_v55, %v14617_v59  ;;  %v14132_v55 = vld [vmem:[%s18189_s2 + $0x2284] ss:$16 sps:$4 sm:$0xff]  }
 0x92c   :  { %9288 = vmatprep.subr.bf16.mxu0 %v14030_v63  ;;  %9374 = vmatprep.subr.bf16.mxu1 %v14033_v0  ;;  %v8476_v63 = vrot.slane %v11975_v56, %v14601_v38  ;;  %v8484_v0 = vrot.slane %v11975_v56, %v14615_v57 }
 0x92f   :  { %9289 = vmatpush1.bf16.msra.mxu0 %v14028_v1  ;;  %9375 = vmatpush1.bf16.msra.mxu1 %v14031_v47 }
 0x930   :  { %9290 = vmatprep.subr.bf16.mxu0 %v14036_v2  ;;  %9376 = vmatprep.subr.bf16.mxu1 %v14039_v4  ;;  %v8480_v2 = vrot.slane %v11975_v56, %v14606_v40  ;;  %v8488_v4 = vrot.slane %v11975_v56, %v14617_v59  ;;  %v14135_v56 = vld [vmem:[%s18189_s2 + $0x228c] ss:$16 sps:$4 sm:$0xff]  }
 0x933   :  { %9291 = vmatpush1.bf16.msra.mxu0 %v14034_v5  ;;  %9377 = vmatpush1.bf16.msra.mxu1 %v14037_v6 }
 0x934   :  { %9292 = vmatprep.subr.bf16.mxu0 %v14042_v7  ;;  %9378 = vmatprep.subr.bf16.mxu1 %v14045_v53 }
 0x937   :  { %9293 = vmatpush1.bf16.msra.mxu0 %v14040_v8  ;;  %9379 = vmatpush1.bf16.msra.mxu1 %v14043_v10 }
 0x938   :  { %9294 = vmatprep.subr.bf16.mxu0 %v14048_v11  ;;  %9380 = vmatprep.subr.bf16.mxu1 %v14051_v12 }
 0x93b   :  { %9295 = vmatpush1.bf16.msra.mxu0 %v14046_v13  ;;  %9381 = vmatpush1.bf16.msra.mxu1 %v14049_v61 }
 0x93c   :  { %9296 = vmatprep.subr.bf16.mxu0 %v14054_v14  ;;  %9382 = vmatprep.subr.bf16.mxu1 %v14057_v16 }
 0x93f   :  { %9297 = vmatpush1.bf16.msra.mxu0 %v14052_v17  ;;  %9383 = vmatpush1.bf16.msra.mxu1 %v14055_v18 }
 0x940   :  { %9298 = vmatprep.subr.bf16.mxu0 %v14060_v19  ;;  %9384 = vmatprep.subr.bf16.mxu1 %v14063_v3 }
 0x943   :  { %9299 = vmatpush1.bf16.msra.mxu0 %v14058_v20  ;;  %9385 = vmatpush1.bf16.msra.mxu1 %v14061_v21 }
 0x944   :  { %9300 = vmatprep.subr.bf16.mxu0 %v14066_v22  ;;  %9386 = vmatprep.subr.bf16.mxu1 %v14069_v23 }
 0x947   :  { %9301 = vmatpush1.bf16.msra.mxu0 %v14064_v24  ;;  %9387 = vmatpush1.bf16.msra.mxu1 %v14067_v9 }
 0x948   :  { %9302 = vmatprep.subr.bf16.mxu0 %v14072_v25  ;;  %9388 = vmatprep.subr.bf16.mxu1 %v14075_v26 }
 0x94b   :  { %9303 = vmatpush1.bf16.msra.mxu0 %v14070_v27  ;;  %9389 = vmatpush1.bf16.msra.mxu1 %v14073_v28 }
 0x94c   :  { %9304 = vmatprep.subr.bf16.mxu0 %v14078_v29  ;;  %9390 = vmatprep.subr.bf16.mxu1 %v14081_v15 }
 0x94f   :  { %9305 = vmatpush1.bf16.msra.mxu0 %v14076_v30  ;;  %9391 = vmatpush1.bf16.msra.mxu1 %v14079_v31 }
 0x950   :  { %9306 = vmatprep.subr.bf16.mxu0 %v14084_v32  ;;  %9392 = vmatprep.subr.bf16.mxu1 %v14087_v33 }
 0x953   :  { %9307 = vmatpush1.bf16.msra.mxu0 %v14082_v34  ;;  %9393 = vmatpush1.bf16.msra.mxu1 %v14085_v35  ;;  %v14106_v35 = vld [vmem:[%s18189_s2 + $0x2200] ss:$16 sps:$4 sm:$0xff]  }
 0x954   :  { %9308 = vmatprep.subr.bf16.mxu0 %v14090_v36  ;;  %9394 = vmatprep.subr.bf16.mxu1 %v14093_v37  ;;  %v14109_v36 = vld [vmem:[%s18189_s2 + $0x2208] ss:$16 sps:$4 sm:$0xff]  }
 0x957   :  { %9309 = vmatpush1.bf16.msra.mxu0 %v14088_v39  ;;  %9395 = vmatpush1.bf16.msra.mxu1 %v14091_v42  ;;  %v14114_v39 = vld [vmem:[%s18189_s2 + $0x2224] ss:$16 sps:$4 sm:$0xff]   ;;  %v14117_v42 = vld [vmem:[%s18189_s2 + $0x222c] ss:$16 sps:$4 sm:$0xff]  }
 0x958   :  { %9310 = vmatprep.subr.bf16.mxu0 %v14096_v43  ;;  %9396 = vmatprep.subr.bf16.mxu1 %v14099_v44  ;;  %v14112_v43 = vld [vmem:[%s18189_s2 + $0x2220] ss:$16 sps:$4 sm:$0xff]   ;;  %v14115_v44 = vld [vmem:[%s18189_s2 + $0x2228] ss:$16 sps:$4 sm:$0xff]  }
 0x95b   :  { %9311 = vmatpush1.bf16.msra.mxu0 %v14094_v45  ;;  %9397 = vmatpush1.bf16.msra.mxu1 %v14097_v46  ;;  %v14120_v45 = vld [vmem:[%s18189_s2 + $0x2244] ss:$16 sps:$4 sm:$0xff]   ;;  %v14123_v46 = vld [vmem:[%s18189_s2 + $0x224c] ss:$16 sps:$4 sm:$0xff]  }
 0x95c   :  { %9312 = vmatprep.subr.bf16.mxu0 %v14102_v48  ;;  %9398 = vmatprep.subr.bf16.mxu1 %v14105_v49  ;;  %v14118_v48 = vld [vmem:[%s18189_s2 + $0x2240] ss:$16 sps:$4 sm:$0xff]   ;;  %v14121_v49 = vld [vmem:[%s18189_s2 + $0x2248] ss:$16 sps:$4 sm:$0xff]  }
 0x95f   :  { %9313 = vmatpush1.bf16.msra.mxu0 %v14100_v50  ;;  %9399 = vmatpush1.bf16.msra.mxu1 %v14103_v51  ;;  %v14126_v50 = vld [vmem:[%s18189_s2 + $0x2264] ss:$16 sps:$4 sm:$0xff]   ;;  %v14129_v51 = vld [vmem:[%s18189_s2 + $0x226c] ss:$16 sps:$4 sm:$0xff]  }
 0x960   :  { %9325 = vmatprep.subr.bf16.mxu0 %v14108_v52  ;;  %9411 = vmatprep.subr.bf16.mxu1 %v14111_v54  ;;  %v14124_v52 = vld [vmem:[%s18189_s2 + $0x2260] ss:$16 sps:$4 sm:$0xff]   ;;  %v14127_v54 = vld [vmem:[%s18189_s2 + $0x2268] ss:$16 sps:$4 sm:$0xff]  }
 0x9f5   :  { %v8344_v1 = vpop.f32.mrb[32].mxu0  ;;  %v8430_v47 = vpop.f32.mrb[32].mxu1 }
 0x9f6   :  { %v8462_v5 = vmul.f32 %v8445_v58, %v8344_v1  ;;  %v8464_v6 = vmul.f32 %v8453_v41, %v8430_v47  ;;  %v8346_v7 = vpop.f32.mrb[33].mxu0  ;;  %v8432_v53 = vpop.f32.mrb[33].mxu1  ;;  %v14144_v1 = vld [vmem:[%s18189_s2 + $0x22c4] ss:$16 sps:$4 sm:$0xff]   ;;  %v14147_v47 = vld [vmem:[%s18189_s2 + $0x22cc] ss:$16 sps:$4 sm:$0xff]  }
 0x9f7   :  { %v8463_v8 = vmul.f32 %v8449_v60, %v8346_v7  ;;  %v8465_v10 = vmul.f32 %v8457_v62, %v8432_v53  ;;  %v8348_v11 = vpop.f32.mrb[34].mxu0  ;;  %v8434_v12 = vpop.f32.mrb[34].mxu1  ;;  %v14148_v7 = vld [vmem:[%s18189_s2 + $0x22e0] ss:$16 sps:$4 sm:$0xff]   ;;  %v14151_v53 = vld [vmem:[%s18189_s2 + $0x22e8] ss:$16 sps:$4 sm:$0xff]  }
 0x9f8   :  { %v8493_v13 = vadd.f32 %v8476_v63, %v8462_v5  ;;  %v8495_v61 = vadd.f32 %v8484_v0, %v8464_v6  ;;  %v8466_v14 = vmul.f32 %v8445_v58, %v8348_v11  ;;  %v8468_v16 = vmul.f32 %v8453_v41, %v8434_v12  ;;  %v8350_v17 = vpop.f32.mrb[35].mxu0  ;;  %v8436_v18 = vpop.f32.mrb[35].mxu1  ;;  %v14130_v58 = vld [vmem:[%s18189_s2 + $0x2280] ss:$16 sps:$4 sm:$0xff]   ;;  %v14133_v41 = vld [vmem:[%s18189_s2 + $0x2288] ss:$16 sps:$4 sm:$0xff]  }
 0x9f9   :  { %v8494_v19 = vadd.f32 %v8480_v2, %v8463_v8  ;;  %v8496_v3 = vadd.f32 %v8488_v4, %v8465_v10  ;;  %v8467_v20 = vmul.f32 %v8449_v60, %v8350_v17  ;;  %v8469_v21 = vmul.f32 %v8457_v62, %v8436_v18  ;;  %v14138_v60 = vld [vmem:[%s18189_s2 + $0x22a4] ss:$16 sps:$4 sm:$0xff]   ;;  %v14141_v62 = vld [vmem:[%s18189_s2 + $0x22ac] ss:$16 sps:$4 sm:$0xff]   ;;  %v14154_v11 = vld [vmem:[%s18189_s2 + $0x2300] ss:$16 sps:$4 sm:$0xff]  }
 0x9fa   :  { %v8497_v22 = vadd.f32 %v8476_v63, %v8466_v14  ;;  %v8499_v23 = vadd.f32 %v8484_v0, %v8468_v16  ;;  %v8501_v25 = vmax.f32 %v8493_v13, 0.0  ;;  %v8503_v26 = vmax.f32 %v8495_v61, 0.0  ;;  %v14136_v63 = vld [vmem:[%s18189_s2 + $0x22a0] ss:$16 sps:$4 sm:$0xff]   ;;  %v14139_v0 = vld [vmem:[%s18189_s2 + $0x22a8] ss:$16 sps:$4 sm:$0xff]  }
 0x9fb   :  { %v8498_v24 = vadd.f32 %v8480_v2, %v8467_v20  ;;  %v8500_v9 = vadd.f32 %v8488_v4, %v8469_v21  ;;  %v8502_v29 = vmax.f32 %v8494_v19, 0.0  ;;  %v8504_v15 = vmax.f32 %v8496_v3, 0.0  ;;  %v14142_v2 = vld [vmem:[%s18189_s2 + $0x22c0] ss:$16 sps:$4 sm:$0xff]   ;;  %v14145_v4 = vld [vmem:[%s18189_s2 + $0x22c8] ss:$16 sps:$4 sm:$0xff]  }
 0x9fc   :  { %v8505_v27 = vmax.f32 %v8497_v22, 0.0  ;;  %v8507_v28 = vmax.f32 %v8499_v23, 0.0  ;;  %v14150_v5 = vld [vmem:[%s18189_s2 + $0x22e4] ss:$16 sps:$4 sm:$0xff]   ;;  %v14153_v6 = vld [vmem:[%s18189_s2 + $0x22ec] ss:$16 sps:$4 sm:$0xff]  }
 0x9fd   :  { %v8506_v30 = vmax.f32 %v8498_v24, 0.0  ;;  %v8508_v31 = vmax.f32 %v8500_v9, 0.0  ;;  %v14156_v8 = vld [vmem:[%s18189_s2 + $0x2304] ss:$16 sps:$4 sm:$0xff]   ;;  %v14159_v10 = vld [vmem:[%s18189_s2 + $0x230c] ss:$16 sps:$4 sm:$0xff]  }
 0x9fe   :  { %v8509_v32 = vpack.c.bf16 %v8505_v27, %v8501_v25  ;;  %v17839_v33 = vpack.c.bf16 %v8507_v28, %v8503_v26  ;;  %v14157_v12 = vld [vmem:[%s18189_s2 + $0x2308] ss:$16 sps:$4 sm:$0xff]   ;;  %v14162_v13 = vld [vmem:[%s18189_s2 + $0x2324] ss:$16 sps:$4 sm:$0xff]   ;;  %v14165_v61 = vld [vmem:[%s18189_s2 + $0x232c] ss:$16 sps:$4 sm:$0xff]  }
 0x9ff   :  { %v8510_v34 = vpack.c.bf16 %v8506_v30, %v8502_v29  ;;  %v8512_v37 = vpack.c.bf16 %v8508_v31, %v8504_v15  ;;  %v14160_v14 = vld [vmem:[%s18189_s2 + $0x2320] ss:$16 sps:$4 sm:$0xff]   ;;  %v14163_v16 = vld [vmem:[%s18189_s2 + $0x2328] ss:$16 sps:$4 sm:$0xff]   ;;  %v14168_v17 = vld [vmem:[%s18189_s2 + $0x2344] ss:$16 sps:$4 sm:$0xff]  }
 0xa00   :  { %v14171_v18 = vld [vmem:[%s18189_s2 + $0x234c] ss:$16 sps:$4 sm:$0xff]   ;;  %v14166_v19 = vld [vmem:[%s18189_s2 + $0x2340] ss:$16 sps:$4 sm:$0xff]   ;;  %v14169_v3 = vld [vmem:[%s18189_s2 + $0x2348] ss:$16 sps:$4 sm:$0xff]  }
 0xa01   :  { %9314 = vmatprep.mubr.bf16.mxu0 %v8510_v34  ;;  %9400 = vmatprep.mubr.bf16.mxu1 %v8510_v34  ;;  %v14174_v20 = vld [vmem:[%s18189_s2 + $0x2364] ss:$16 sps:$4 sm:$0xff]   ;;  %v14177_v21 = vld [vmem:[%s18189_s2 + $0x236c] ss:$16 sps:$4 sm:$0xff]   ;;  %v14172_v22 = vld [vmem:[%s18189_s2 + $0x2360] ss:$16 sps:$4 sm:$0xff]  }
 0xa02   :  { %9315 = vmatmul.mubr.bf16.vlgmr.msra.gmra.mrb[36].mxu0 %v8509_v32  ;;  %9401 = vmatmul.mubr.bf16.vlgmr.msra.gmra.mrb[36].mxu1 %v8509_v32  ;;  %v14175_v23 = vld [vmem:[%s18189_s2 + $0x2368] ss:$16 sps:$4 sm:$0xff]   ;;  %v14180_v24 = vld [vmem:[%s18189_s2 + $0x2384] ss:$16 sps:$4 sm:$0xff]   ;;  %v14183_v9 = vld [vmem:[%s18189_s2 + $0x238c] ss:$16 sps:$4 sm:$0xff]  }
 0xa03   :  { %9326 = vmatpush1.bf16.msra.mxu0 %v14106_v35  ;;  %9412 = vmatpush1.bf16.msra.mxu1 %v14109_v36  ;;  %v14178_v25 = vld [vmem:[%s18189_s2 + $0x2380] ss:$16 sps:$4 sm:$0xff]   ;;  %v14181_v26 = vld [vmem:[%s18189_s2 + $0x2388] ss:$16 sps:$4 sm:$0xff]   ;;  %v14186_v27 = vld [vmem:[%s18189_s2 + $0x23a4] ss:$16 sps:$4 sm:$0xff]  }
 0xa04   :  { %9357 = vmatprep.mubr.bf16.mxu0 %v8512_v37  ;;  %9443 = vmatprep.mubr.bf16.mxu1 %v8512_v37  ;;  %v14189_v28 = vld [vmem:[%s18189_s2 + $0x23ac] ss:$16 sps:$4 sm:$0xff]   ;;  %v14184_v29 = vld [vmem:[%s18189_s2 + $0x23a0] ss:$16 sps:$4 sm:$0xff]   ;;  %v14187_v15 = vld [vmem:[%s18189_s2 + $0x23a8] ss:$16 sps:$4 sm:$0xff]  }
 0xa05   :  { %9327 = vmatprep.subr.bf16.mxu0 %v14114_v39  ;;  %9413 = vmatprep.subr.bf16.mxu1 %v14117_v42  ;;  %v14192_v30 = vld [vmem:[%s18189_s2 + $0x23c4] ss:$16 sps:$4 sm:$0xff]   ;;  %v14195_v31 = vld [vmem:[%s18189_s2 + $0x23cc] ss:$16 sps:$4 sm:$0xff]   ;;  %v14190_v32 = vld [vmem:[%s18189_s2 + $0x23c0] ss:$16 sps:$4 sm:$0xff]  }
 0xa06   :  { %v14193_v34 = vld [vmem:[%s18189_s2 + $0x23c8] ss:$16 sps:$4 sm:$0xff]   ;;  %v14198_v35 = vld [vmem:[%s18189_s2 + $0x23e4] ss:$16 sps:$4 sm:$0xff]   ;;  %v14201_v36 = vld [vmem:[%s18189_s2 + $0x23ec] ss:$16 sps:$4 sm:$0xff]  }
 0xa07   :  { %9328 = vmatpush1.bf16.msra.mxu0 %v14112_v43  ;;  %9414 = vmatpush1.bf16.msra.mxu1 %v14115_v44  ;;  %v14196_v37 = vld [vmem:[%s18189_s2 + $0x23e0] ss:$16 sps:$4 sm:$0xff]   ;;  %v14199_v39 = vld [vmem:[%s18189_s2 + $0x23e8] ss:$16 sps:$4 sm:$0xff]  }
 0xa08   :  { %9329 = vmatprep.subr.bf16.mxu0 %v14120_v45  ;;  %9415 = vmatprep.subr.bf16.mxu1 %v14123_v46  ;;  %v14202_v42 = vld [vmem:[%s18192_s3 + $0x40] sm:$0xff]   ;;  %v14206_v46 = vld [vmem:[%s18192_s3 + $0x48] sm:$0xff]  }
 0xa09   :  { %v14203_v43 = vld [vmem:[%s18192_s3 + $0xc0] sm:$0xff]  }
 0xa0a   :  { %v14204_v44 = vld [vmem:[%s18192_s3] sm:$0xff]  }
 0xa0b   :  { %9330 = vmatpush1.bf16.msra.mxu0 %v14118_v48  ;;  %9416 = vmatpush1.bf16.msra.mxu1 %v14121_v49  ;;  %v14205_v45 = vld [vmem:[%s18192_s3 + $0x80] sm:$0xff]   ;;  %v14207_v48 = vld [vmem:[%s18192_s3 + $0xc8] sm:$0xff]  }
 0xa0c   :  { %9331 = vmatprep.subr.bf16.mxu0 %v14126_v50  ;;  %9417 = vmatprep.subr.bf16.mxu1 %v14129_v51  ;;  %v14208_v49 = vld [vmem:[%s18192_s3 + $0x8] sm:$0xff]   ;;  %v14210_v51 = vld [vmem:[%s18192_s3 + $0x50] sm:$0xff]  }
 0xa0d   :  { %v14209_v50 = vld [vmem:[%s18192_s3 + $0x88] sm:$0xff]  }
 0xa0f   :  { %9332 = vmatpush1.bf16.msra.mxu0 %v14124_v52  ;;  %9418 = vmatpush1.bf16.msra.mxu1 %v14127_v54  ;;  %v14212_v52 = vld [vmem:[%s18192_s3 + $0x10] sm:$0xff]  }
 0xa10   :  { %9333 = vmatprep.subr.bf16.mxu0 %v14132_v55  ;;  %9419 = vmatprep.subr.bf16.mxu1 %v14135_v56  ;;  %v14213_v54 = vld [vmem:[%s18192_s3 + $0x90] sm:$0xff]   ;;  %v14214_v55 = vld [vmem:[%s18192_s3 + $0x58] sm:$0xff]  }
 0xa11   :  { %v14215_v56 = vld [vmem:[%s18192_s3 + $0xd8] sm:$0xff]  }
 0xa13   :  { %9334 = vmatpush1.bf16.msra.mxu0 %v14130_v58  ;;  %9420 = vmatpush1.bf16.msra.mxu1 %v14133_v41  ;;  %v14216_v58 = vld [vmem:[%s18192_s3 + $0x18] sm:$0xff]  }
 0xa14   :  { %9335 = vmatprep.subr.bf16.mxu0 %v14138_v60  ;;  %9421 = vmatprep.subr.bf16.mxu1 %v14141_v62  ;;  %v14217_v41 = vld [vmem:[%s18192_s3 + $0x98] sm:$0xff]   ;;  %v14218_v60 = vld [vmem:[%s18192_s3 + $0x60] sm:$0xff]  }
 0xa15   :  { %v14219_v62 = vld [vmem:[%s18192_s3 + $0xe0] sm:$0xff]  }
 0xa17   :  { %9336 = vmatpush1.bf16.msra.mxu0 %v14136_v63  ;;  %9422 = vmatpush1.bf16.msra.mxu1 %v14139_v0  ;;  %v14220_v63 = vld [vmem:[%s18192_s3 + $0x20] sm:$0xff]  }
 0xa18   :  { %9337 = vmatprep.subr.bf16.mxu0 %v14144_v1  ;;  %9423 = vmatprep.subr.bf16.mxu1 %v14147_v47  ;;  %v14221_v0 = vld [vmem:[%s18192_s3 + $0xa0] sm:$0xff]   ;;  %v14222_v1 = vld [vmem:[%s18192_s3 + $0x68] sm:$0xff]  }
 0xa19   :  { %v14223_v47 = vld [vmem:[%s18192_s3 + $0xe8] sm:$0xff]  }
 0xa1b   :  { %9338 = vmatpush1.bf16.msra.mxu0 %v14142_v2  ;;  %9424 = vmatpush1.bf16.msra.mxu1 %v14145_v4  ;;  %v14224_v2 = vld [vmem:[%s18192_s3 + $0x28] sm:$0xff]  }
 0xa1c   :  { %9339 = vmatprep.subr.bf16.mxu0 %v14150_v5  ;;  %9425 = vmatprep.subr.bf16.mxu1 %v14153_v6  ;;  %v14225_v4 = vld [vmem:[%s18192_s3 + $0xa8] sm:$0xff]   ;;  %v14226_v5 = vld [vmem:[%s18192_s3 + $0x70] sm:$0xff]  }
 0xa1d   :  { %v14227_v6 = vld [vmem:[%s18192_s3 + $0xf0] sm:$0xff]  }
 0xa1f   :  { %9340 = vmatpush1.bf16.msra.mxu0 %v14148_v7  ;;  %9426 = vmatpush1.bf16.msra.mxu1 %v14151_v53  ;;  %v14228_v7 = vld [vmem:[%s18192_s3 + $0x30] sm:$0xff]  }
 0xa20   :  { %9341 = vmatprep.subr.bf16.mxu0 %v14156_v8  ;;  %9427 = vmatprep.subr.bf16.mxu1 %v14159_v10  ;;  %v14229_v53 = vld [vmem:[%s18192_s3 + $0xb0] sm:$0xff]   ;;  %v14230_v8 = vld [vmem:[%s18192_s3 + $0x78] sm:$0xff]  }
 0xa21   :  { %v14231_v10 = vld [vmem:[%s18192_s3 + $0xf8] sm:$0xff]  }
 0xa23   :  { %9342 = vmatpush1.bf16.msra.mxu0 %v14154_v11  ;;  %9428 = vmatpush1.bf16.msra.mxu1 %v14157_v12  ;;  %v14232_v11 = vld [vmem:[%s18192_s3 + $0x38] sm:$0xff]  }
 0xa24   :  { %9343 = vmatprep.subr.bf16.mxu0 %v14162_v13  ;;  %9429 = vmatprep.subr.bf16.mxu1 %v14165_v61  ;;  %v14233_v12 = vld [vmem:[%s18192_s3 + $0xb8] sm:$0xff]   ;;  %v14247_v13 = vmov 0.0   ;;  %v12232_v61 = vld [vmem:[%s18190_s5 + $0x24] sm:$0xf] }
 0xa27   :  { %9344 = vmatpush1.bf16.msra.mxu0 %v14160_v14  ;;  %9430 = vmatpush1.bf16.msra.mxu1 %v14163_v16  ;;  %v12233_v14 = vld [vmem:[%s18191_s6 + $0x24] sm:$0xf]  ;;  %v9460_v16 = vrot.slane %v12232_v61, %v14601_v38 }
 0xa28   :  { %9345 = vmatprep.subr.bf16.mxu0 %v14168_v17  ;;  %9431 = vmatprep.subr.bf16.mxu1 %v14171_v18  ;;  %v9468_v17 = vrot.slane %v12232_v61, %v14615_v57  ;;  %v9464_v18 = vrot.slane %v12232_v61, %v14606_v40 }
 0xa2b   :  { %9346 = vmatpush1.bf16.msra.mxu0 %v14166_v19  ;;  %9432 = vmatpush1.bf16.msra.mxu1 %v14169_v3  ;;  %v9472_v19 = vrot.slane %v12232_v61, %v14617_v59  ;;  %v9491_v3 = vrot.slane %v12233_v14, %v14601_v38 }
 0xa2c   :  { %9347 = vmatprep.subr.bf16.mxu0 %v14174_v20  ;;  %9433 = vmatprep.subr.bf16.mxu1 %v14177_v21  ;;  %v9499_v20 = vrot.slane %v12233_v14, %v14615_v57 }
 0xa2f   :  { %9348 = vmatpush1.bf16.msra.mxu0 %v14172_v22  ;;  %9434 = vmatpush1.bf16.msra.mxu1 %v14175_v23  ;;  %v9495_v23 = vrot.slane %v12233_v14, %v14606_v40 }
 0xa30   :  { %9349 = vmatprep.subr.bf16.mxu0 %v14180_v24  ;;  %9435 = vmatprep.subr.bf16.mxu1 %v14183_v9  ;;  %v9503_v24 = vrot.slane %v12233_v14, %v14617_v59 }
 0xa33   :  { %9350 = vmatpush1.bf16.msra.mxu0 %v14178_v25  ;;  %9436 = vmatpush1.bf16.msra.mxu1 %v14181_v26 }
 0xa34   :  { %9351 = vmatprep.subr.bf16.mxu0 %v14186_v27  ;;  %9437 = vmatprep.subr.bf16.mxu1 %v14189_v28 }
 0xa37   :  { %9352 = vmatpush1.bf16.msra.mxu0 %v14184_v29  ;;  %9438 = vmatpush1.bf16.msra.mxu1 %v14187_v15 }
 0xa38   :  { %9353 = vmatprep.subr.bf16.mxu0 %v14192_v30  ;;  %9439 = vmatprep.subr.bf16.mxu1 %v14195_v31 }
 0xa3b   :  { %9354 = vmatpush1.bf16.msra.mxu0 %v14190_v32  ;;  %9440 = vmatpush1.bf16.msra.mxu1 %v14193_v34 }
 0xa3c   :  { %9355 = vmatprep.subr.bf16.mxu0 %v14198_v35  ;;  %9441 = vmatprep.subr.bf16.mxu1 %v14201_v36 }
 0xa3f   :  { %9356 = vmatpush1.bf16.msra.mxu0 %v14196_v37  ;;  %9442 = vmatpush1.bf16.msra.mxu1 %v14199_v39 }
 0xa40   :  { %12277 = vmatprep.subr.bf16.mxu0 %v14202_v42  ;;  %12299 = vmatprep.subr.bf16.mxu1 %v14203_v43 }
 0xa42   :  { %9358 = vmatmul.mubr.bf16.vlgmr.msra.gmra.mrb[36].mxu0 %v17839_v33  ;;  %9444 = vmatmul.mubr.bf16.vlgmr.msra.gmra.mrb[36].mxu1 %v17839_v33  ;;  %v14211_v33 = vld [vmem:[%s18192_s3 + $0xd0] sm:$0xff]  }
 0xa43   :  { %12278 = vmatpush3.bf16.msra.mxu0 %v14204_v44  ;;  %12300 = vmatpush3.bf16.msra.mxu1 %v14205_v45 }
 0xa44   :  { %12279 = vmatprep.subr.bf16.mxu0 %v14206_v46  ;;  %12301 = vmatprep.subr.bf16.mxu1 %v14207_v48 }
 0xa47   :  { %12280 = vmatpush3.bf16.msra.mxu0 %v14208_v49  ;;  %12302 = vmatpush3.bf16.msra.mxu1 %v14209_v50 }
 0xa48   :  { %12281 = vmatprep.subr.bf16.mxu0 %v14210_v51  ;;  %12303 = vmatprep.subr.bf16.mxu1 %v14211_v33 }
 0xa4b   :  { %12282 = vmatpush3.bf16.msra.mxu0 %v14212_v52  ;;  %12304 = vmatpush3.bf16.msra.mxu1 %v14213_v54 }
 0xa4c   :  { %12283 = vmatprep.subr.bf16.mxu0 %v14214_v55  ;;  %12305 = vmatprep.subr.bf16.mxu1 %v14215_v56 }
 0xa4f   :  { %12284 = vmatpush3.bf16.msra.mxu0 %v14216_v58  ;;  %12306 = vmatpush3.bf16.msra.mxu1 %v14217_v41  ;;  %v14234_v41 = vld [vmem:[%s18193_s4] sm:$0xff]  }
 0xa50   :  { %12285 = vmatprep.subr.bf16.mxu0 %v14218_v60  ;;  %12307 = vmatprep.subr.bf16.mxu1 %v14219_v62  ;;  %v14235_v60 = vld [vmem:[%s18193_s4 + $0x8] sm:$0xff]   ;;  %v14236_v62 = vld [vmem:[%s18193_s4 + $0x10] sm:$0xff]  }
 0xa53   :  { %12286 = vmatpush3.bf16.msra.mxu0 %v14220_v63  ;;  %12308 = vmatpush3.bf16.msra.mxu1 %v14221_v0  ;;  %v14237_v63 = vld [vmem:[%s18193_s4 + $0x18] sm:$0xff]   ;;  %v14238_v0 = vld [vmem:[%s18193_s4 + $0x20] sm:$0xff]  }
 0xa54   :  { %12287 = vmatprep.subr.bf16.mxu0 %v14222_v1  ;;  %12309 = vmatprep.subr.bf16.mxu1 %v14223_v47  ;;  %v14239_v1 = vld [vmem:[%s18193_s4 + $0x28] sm:$0xff]   ;;  %v14240_v47 = vld [vmem:[%s18193_s4 + $0x30] sm:$0xff]  }
 0xa57   :  { %12288 = vmatpush3.bf16.msra.mxu0 %v14224_v2  ;;  %12310 = vmatpush3.bf16.msra.mxu1 %v14225_v4  ;;  %v14241_v2 = vld [vmem:[%s18193_s4 + $0x38] sm:$0xff]  }
 0xa58   :  { %12289 = vmatprep.subr.bf16.mxu0 %v14226_v5  ;;  %12311 = vmatprep.subr.bf16.mxu1 %v14227_v6 }
 0xa5b   :  { %12290 = vmatpush3.bf16.msra.mxu0 %v14228_v7  ;;  %12312 = vmatpush3.bf16.msra.mxu1 %v14229_v53 }
 0xa5c   :  { %12291 = vmatprep.subr.bf16.mxu0 %v14230_v8  ;;  %12313 = vmatprep.subr.bf16.mxu1 %v14231_v10 }
 0xa5f   :  { %12292 = vmatpush3.bf16.msra.mxu0 %v14232_v11  ;;  %12314 = vmatpush3.bf16.msra.mxu1 %v14233_v12  ;;  %v12266_v12 = vld [vmem:[%s18194_s7] ss:$0 sm:$0xff] }
 0xa60   :  { %12330 = vmatprep.subr.bf16.mxu0 %v14247_v13 }
 0xb15   :  { %v9359_v21 = vpop.f32.mrb[36].mxu0  ;;  %v9445_v22 = vpop.f32.mrb[36].mxu1 }
 0xb16   :  { %v9477_v9 = vmul.f32 %v9460_v16, %v9359_v21  ;;  %v9479_v25 = vmul.f32 %v9468_v17, %v9445_v22  ;;  %v9361_v26 = vpop.f32.mrb[37].mxu0  ;;  %v9447_v27 = vpop.f32.mrb[37].mxu1 }
 0xb17   :  { %v9478_v28 = vmul.f32 %v9464_v18, %v9361_v26  ;;  %v9480_v29 = vmul.f32 %v9472_v19, %v9447_v27  ;;  %v9363_v15 = vpop.f32.mrb[38].mxu0  ;;  %v9449_v30 = vpop.f32.mrb[38].mxu1 }
 0xb18   :  { %v9508_v31 = vadd.f32 %v9491_v3, %v9477_v9  ;;  %v9510_v32 = vadd.f32 %v9499_v20, %v9479_v25  ;;  %v9481_v34 = vmul.f32 %v9460_v16, %v9363_v15  ;;  %v9483_v38 = vmul.f32 %v9468_v17, %v9449_v30  ;;  %v9365_v35 = vpop.f32.mrb[39].mxu0  ;;  %v9451_v57 = vpop.f32.mrb[39].mxu1  ;;  %v12268_v25 = vld [vmem:[%s18196_s9] ss:$0 sm:$0xff] }
 0xb19   :  { %v9509_v36 = vadd.f32 %v9495_v23, %v9478_v28  ;;  %v9511_v37 = vadd.f32 %v9503_v24, %v9480_v29  ;;  %v9482_v39 = vmul.f32 %v9464_v18, %v9365_v35  ;;  %v9484_v40 = vmul.f32 %v9472_v19, %v9451_v57 }
 0xb1a   :  { %v9512_v42 = vadd.f32 %v9491_v3, %v9481_v34  ;;  %v9514_v59 = vadd.f32 %v9499_v20, %v9483_v38  ;;  %v9516_v45 = vmax.f32 %v9508_v31, 0.0  ;;  %v9518_v46 = vmax.f32 %v9510_v32, 0.0 }
 0xb1b   :  { %v9513_v43 = vadd.f32 %v9495_v23, %v9482_v39  ;;  %v9515_v44 = vadd.f32 %v9503_v24, %v9484_v40  ;;  %v9517_v50 = vmax.f32 %v9509_v36, 0.0  ;;  %v9519_v51 = vmax.f32 %v9511_v37, 0.0 }
 0xb1c   :  { %v9520_v48 = vmax.f32 %v9512_v42, 0.0  ;;  %v9522_v49 = vmax.f32 %v9514_v59, 0.0 }
 0xb1d   :  { %v9521_v33 = vmax.f32 %v9513_v43, 0.0  ;;  %v9523_v52 = vmax.f32 %v9515_v44, 0.0 }
 0xb1e   :  { %v9524_v54 = vpack.c.bf16 %v9520_v48, %v9516_v45  ;;  %v9526_v55 = vpack.c.bf16 %v9522_v49, %v9518_v46 }
 0xb1f   :  { %v9525_v56 = vpack.c.bf16 %v9521_v33, %v9517_v50  ;;  %v9527_v58 = vpack.c.bf16 %v9523_v52, %v9519_v51 }
 0xb21   :  { %9816 = vmatprep.mubr.bf16.mxu0 %v9525_v56  ;;  %9857 = vmatprep.mubr.bf16.mxu1 %v9527_v58 }
 0xb22   :  { %9817 = vmatmul.mubr.bf16.vlgmr.msra.gmra.mrb[40].mxu0 %v9524_v54  ;;  %9858 = vmatmul.mubr.bf16.vlgmr.msra.gmra.mrb[40].mxu1 %v9526_v55 }
 0xb23   :  { %12331 = vmatpush3.bf16.msra.mxu0 %v14234_v41  ;;  %12346 = vmatprep.mubr.msk.bf16.mxu0 %vm14248_vm0, %v14247_v13 }
 0xb24   :  { %12332 = vmatprep.subr.bf16.mxu0 %v14247_v13 }
 0xb27   :  { %12333 = vmatpush3.bf16.msra.mxu0 %v14235_v60 }
 0xb28   :  { %12334 = vmatprep.subr.bf16.mxu0 %v14247_v13 }
 0xb2b   :  { %12335 = vmatpush3.bf16.msra.mxu0 %v14236_v62 }
 0xb2c   :  { %12336 = vmatprep.subr.bf16.mxu0 %v14247_v13 }
 0xb2f   :  { %12337 = vmatpush3.bf16.msra.mxu0 %v14237_v63 }
 0xb30   :  { %12338 = vmatprep.subr.bf16.mxu0 %v14247_v13 }
 0xb33   :  { %12339 = vmatpush3.bf16.msra.mxu0 %v14238_v0 }
 0xb34   :  { %12340 = vmatprep.subr.bf16.mxu0 %v14247_v13 }
 0xb37   :  { %12341 = vmatpush3.bf16.msra.mxu0 %v14239_v1 }
 0xb38   :  { %12342 = vmatprep.subr.bf16.mxu0 %v14247_v13 }
 0xb3b   :  { %12343 = vmatpush3.bf16.msra.mxu0 %v14240_v47 }
 0xb3c   :  { %12344 = vmatprep.subr.bf16.mxu0 %v14247_v13  ;;  %v12267_v13 = vld [vmem:[%s18195_s8] ss:$0 sm:$0xff] }
 0xb3f   :  { %12345 = vmatpush3.bf16.msra.mxu0 %v14241_v2 }
 0xbf5   :  { %v12293_v4 = vpop.f32.mrb[40].mxu0  ;;  %v12315_v5 = vpop.f32.mrb[40].mxu1 }
 0xbf6   :  { %v12294_v6 = vpop.f32.mrb[41].mxu0  ;;  %v12316_v7 = vpop.f32.mrb[41].mxu1 }
 0xbf7   :  { %v12295_v53 = vadd.f32 %v12294_v6, %v12293_v4  ;;  %v12317_v8 = vadd.f32 %v12316_v7, %v12315_v5  ;;  %v12296_v10 = vpop.f32.mrb[42].mxu0  ;;  %v12318_v11 = vpop.f32.mrb[42].mxu1 }
 0xbf8   :  { %v12297_v61 = vpop.f32.mrb[43].mxu0  ;;  %v12319_v14 = vpop.f32.mrb[43].mxu1 }
 0xbf9   :  { %v9860_v16 = vadd.f32 %v12317_v8, %v12295_v53  ;;  %v12298_v17 = vadd.f32 %v12297_v61, %v12296_v10  ;;  %v12320_v18 = vadd.f32 %v12319_v14, %v12318_v11 }
 0xbfb   :  { %v9873_v19 = vmul.f32 %v12266_v12, %v9860_v16  ;;  %v9863_v3 = vadd.f32 %v12320_v18, %v12298_v17 }
 0xbfd   :  { %v9882_v20 = vadd.f32 %v12267_v13, %v9873_v19  ;;  %v9874_v21 = vmul.f32 %v12266_v12, %v9863_v3 }
 0xbff   :  { %v9883_v22 = vadd.f32 %v12267_v13, %v9874_v21  ;;  %v9884_v23 = vmax.f32 %v9882_v20, 0.0 }
 0xc01   :  { %v9885_v24 = vmax.f32 %v9883_v22, 0.0 }
 0xc03   :  { %v9886_v9 = vpack.c.bf16 %v9885_v24, %v9884_v23 }
 0xc05   :  { %12347 = vmatmul.mubr.bf16.vlgmr.msra.gmra.mrb[44].mxu0 %v9886_v9 }
 0xcd8   :  { %v9992_v26 = vpop.f32.mrb[44].mxu0 }
 0xcd9   :  { %v9993_v27 = vadd.f32 %v12268_v25, %v9992_v26  ;;  %v12348_v28 = vpop.f32.mrb[45].mxu0 }
 0xcda   :  { %v9995_v29 = vpop.f32.mrb[46].mxu0 }
 0xcdb   :  { %14242 = vtanh.f32 %v9993_v27  ;;  %v9996_v15 = vadd.f32 %v12268_v25, %v9995_v29  ;;  %v12349_v30 = vpop.f32.mrb[47].mxu0 }
 0xcdd   :  { %14244 = vtanh.f32 %v9996_v15 }
 0xce5   :  { %v14243_v31 = vpop.eup %14242 }
 0xce6   :  { %10001 = vst [vmem:[%s18197_s10] sm:$0xff] %v14243_v31 }
 0xce7   :  { %v14245_v32 = vpop.eup %14244 }
 0xce8   :  { %10002 = vst [vmem:[%s18197_s10 + $0x8] sm:$0xff] %v14245_v32 }

</bundles_post_ra>
